<compile_context>
chip_gen: v7x
topology: tpu7x:2x2x1
jax: 0.10.0
libtpu: 0.0.40
codegen_flags: <defaults>
</compile_context>

<pallas_src>
import math

import jax
import jax.numpy as jnp
from jax.experimental import pallas as pl
from jax.experimental.pallas import tpu as pltpu

D_MODEL = 32
NUM_HEADS = 4
HEAD_DIM = D_MODEL // NUM_HEADS
DIM_FF = 64
EPS = 1e-5          # nn.LayerNorm default
NUM_LAYERS = 2
LANE = 128          # lane-tile width; every slab segment starts on this boundary

# ---------------------- packed parameter slab layout ----------------------- #
W_ITEMS = (
    ("sa_wqk", 2 * D_MODEL), ("sa_wv", D_MODEL), ("sa_wo", D_MODEL),
    ("ca_wq", D_MODEL), ("ca_wk", D_MODEL), ("ca_wv", D_MODEL),
    ("ca_wo", D_MODEL), ("w1", DIM_FF),
)
B_ITEMS = (
    ("sa_bqk", 2 * D_MODEL), ("sa_bv", D_MODEL), ("sa_bo", D_MODEL),
    ("ca_bq", D_MODEL), ("ca_bk", D_MODEL), ("ca_bv", D_MODEL),
    ("ca_bo", D_MODEL), ("b1", DIM_FF), ("b2", D_MODEL),
    ("ln1_w", D_MODEL), ("ln1_b", D_MODEL),
    ("ln3_w", D_MODEL), ("ln3_b", D_MODEL),
    ("ln4_w", D_MODEL), ("ln4_b", D_MODEL),
)


def _aligned_offsets(items):
    """Every segment starts at a 128-lane boundary (no intra-tile slab slices)."""
    off, table = 0, {}
    for name, size in items:
        table[name] = (off, size)
        off += ((size + LANE - 1) // LANE) * LANE
    return table, off


W_OFF, W_TOT = _aligned_offsets(W_ITEMS)   # W_TOT = 8 * 128 = 1024
B_OFF, B_TOT = _aligned_offsets(B_ITEMS)   # B_TOT = 15 * 128 = 1920


def pack_layer_params(layer_params):
    """Fold the attention scale into Wq/bq and pack layers into aligned slabs."""
    scale = 1.0 / math.sqrt(HEAD_DIM)
    w_slabs, w2s, b_slabs = [], [], []
    for p in layer_params:
        w_parts = {
            "sa_wqk": jnp.concatenate([p["sa_wq"] * scale, p["sa_wk"]], axis=1),
            "sa_wv": p["sa_wv"], "sa_wo": p["sa_wo"],
            "ca_wq": p["ca_wq"] * scale, "ca_wk": p["ca_wk"],
            "ca_wv": p["ca_wv"], "ca_wo": p["ca_wo"], "w1": p["w1"],
        }
        b_parts = {
            "sa_bqk": jnp.concatenate([p["sa_bq"] * scale, p["sa_bk"]], axis=1),
            "sa_bv": p["sa_bv"], "sa_bo": p["sa_bo"],
            "ca_bq": p["ca_bq"] * scale, "ca_bk": p["ca_bk"],
            "ca_bv": p["ca_bv"], "ca_bo": p["ca_bo"],
            "b1": p["b1"], "b2": p["b2"],
            "ln1_w": p["ln1_w"], "ln1_b": p["ln1_b"],
            "ln3_w": p["ln3_w"], "ln3_b": p["ln3_b"],
            "ln4_w": p["ln4_w"], "ln4_b": p["ln4_b"],
        }
        w_slab = jnp.zeros((D_MODEL, W_TOT), jnp.float32)
        for name, size in W_ITEMS:
            o, _ = W_OFF[name]
            w_slab = w_slab.at[:, o:o + size].set(w_parts[name])
        b_slab = jnp.zeros((1, B_TOT), jnp.float32)
        for name, size in B_ITEMS:
            o, _ = B_OFF[name]
            b_slab = b_slab.at[:, o:o + size].set(b_parts[name])
        w_slabs.append(w_slab)
        w2s.append(p["w2"])
        b_slabs.append(b_slab)
    return jnp.stack(w_slabs), jnp.stack(w2s), jnp.stack(b_slabs)


# --------------------------------- kernel ----------------------------------- #
def _make_decoder_kernel(n_batch, l_tgt, s_mem, num_layers):
    def kernel(tgt_ref, memv_ref, memk_ref, qpos_ref,
               w_ref, w2_ref, b_ref, fnorm_ref, out_ref):
        x = tgt_ref[...]        # (N*L, D)  running activation (Python carry)
        qpos = qpos_ref[...]    # (N*L, D)
        memv = memv_ref[...]    # (N*S, D)  memory (attention values)
        memk = memk_ref[...]    # (N*S, D)  memory + pos, hoisted in wrapper
        fw = fnorm_ref[:, :D_MODEL]
        fb = fnorm_ref[:, LANE:LANE + D_MODEL]

        def layer_norm(v, w, b):
            mu = jnp.mean(v, axis=-1, keepdims=True)
            var = jnp.mean((v - mu) ** 2, axis=-1, keepdims=True)
            return (v - mu) * jax.lax.rsqrt(var + EPS) * w + b

        def attn(q, k, v, wo, bo, lq, lk):
            # q: (N*lq, D), 1/sqrt(hd) scale already folded in; k, v: (N*lk, D).
            # wo: (D, D) output projection, bo: (1, D).
            # 1) all (batch, head) score blocks stacked along SUBLANES.
            blocks = []
            for b in range(n_batch):
                qb = q[b * lq:(b + 1) * lq]
                kb = k[b * lk:(b + 1) * lk]
                for h in range(NUM_HEADS):
                    sl = slice(h * HEAD_DIM, (h + 1) * HEAD_DIM)
                    # contract last dims directly: no materialized k.T
                    blocks.append(jax.lax.dot_general(
                        qb[:, sl], kb[:, sl], (((1,), (1,)), ((), ())),
                        preferred_element_type=jnp.float32))
            s = jnp.concatenate(blocks, axis=0)            # (N*H*lq, lk)
            # 2) single softmax over the whole stack (one EUP/XLU pass).
            s = s - jnp.max(s, axis=-1, keepdims=True)
            p = jnp.exp(s)
            p = p * pl.reciprocal(jnp.sum(p, axis=-1, keepdims=True),
                                  approx=True)
            # 3) PV with W_o folded per head -> no lane-axis head concat.
            outs = []
            for b in range(n_batch):
                vb = v[b * lk:(b + 1) * lk]
                acc = None
                for h in range(NUM_HEADS):
                    sl = slice(h * HEAD_DIM, (h + 1) * HEAD_DIM)
                    r0 = (b * NUM_HEADS + h) * lq
                    oh = jnp.dot(p[r0:r0 + lq], vb[:, sl],
                                 preferred_element_type=jnp.float32)
                    oh = jnp.dot(oh, wo[sl, :],
                                 preferred_element_type=jnp.float32)
                    acc = oh if acc is None else acc + oh
                outs.append(acc)                            # (lq, D)
            return jnp.concatenate(outs, axis=0) + bo       # (N*lq, D)

        for l in range(num_layers):
            def wseg(name, _l=l):
                o, sz = W_OFF[name]
                return w_ref[_l, :, o:o + sz]       # 128-lane-aligned ref slice

            def bseg(name, _l=l):
                o, sz = B_OFF[name]
                return b_ref[_l, :, o:o + sz]

            # --- self-attention: q = k = x + query_pos, value = x ---
            qk_in = x + qpos
            qk = jnp.dot(qk_in, wseg("sa_wqk"),
                         preferred_element_type=jnp.float32) + bseg("sa_bqk")
            v_sa = jnp.dot(x, wseg("sa_wv"),
                           preferred_element_type=jnp.float32) + bseg("sa_bv")
            sa = attn(qk[:, :D_MODEL], qk[:, D_MODEL:2 * D_MODEL], v_sa,
                      wseg("sa_wo"), bseg("sa_bo"), l_tgt, l_tgt)
            x = layer_norm(x + sa, bseg("ln1_w"), bseg("ln1_b"))

            # --- cross-attention over image memory ---
            q_ca = jnp.dot(x + qpos, wseg("ca_wq"),
                           preferred_element_type=jnp.float32) + bseg("ca_bq")
            k_ca = jnp.dot(memk, wseg("ca_wk"),
                           preferred_element_type=jnp.float32) + bseg("ca_bk")
            v_ca = jnp.dot(memv, wseg("ca_wv"),
                           preferred_element_type=jnp.float32) + bseg("ca_bv")
            ca = attn(q_ca, k_ca, v_ca, wseg("ca_wo"), bseg("ca_bo"),
                      l_tgt, s_mem)
            x = layer_norm(x + ca, bseg("ln3_w"), bseg("ln3_b"))

            # --- MLP: Linear -> ReLU -> (Dropout=id) -> Linear ---
            hdn = jnp.maximum(
                jnp.dot(x, wseg("w1"), preferred_element_type=jnp.float32)
                + bseg("b1"), 0.0)
            mlp = jnp.dot(hdn, w2_ref[l],
                          preferred_element_type=jnp.float32) + bseg("b2")
            x = layer_norm(x + mlp, bseg("ln4_w"), bseg("ln4_b"))

            # return_intermediate=True: emit the final-norm'ed output per layer
            out_ref[l] = layer_norm(x, fw, fb)

    return kernel


# -------------------------------- wrapper ----------------------------------- #
def mdetr_transformer_decoder(tgt, memory, layer_params, final_norm,
                              pos=None, query_pos=None):
    """TransformerDecoder forward (return_intermediate=True, norm applied)."""
    L, N, D = tgt.shape
    S = memory.shape[0]
    num_layers = len(layer_params)
    if query_pos is None:
        query_pos = jnp.zeros_like(tgt)
    if pos is None:
        pos = jnp.zeros_like(memory)

    # batch-major, rows stacked along sublanes: (N*L, D) / (N*S, D)
    tgt2 = jnp.transpose(tgt, (1, 0, 2)).reshape(N * L, D)
    memv2 = jnp.transpose(memory, (1, 0, 2)).reshape(N * S, D)
    qpos2 = jnp.transpose(query_pos, (1, 0, 2)).reshape(N * L, D)
    # layer-invariant (memory + pos) hoisted out of the kernel layer loop
    memk2 = memv2 + jnp.transpose(pos, (1, 0, 2)).reshape(N * S, D)

    w_all, w2_all, b_all = pack_layer_params(layer_params)
    b_all = b_all.reshape(num_layers, 1, B_TOT)
    fnorm = jnp.zeros((1, 2 * LANE), jnp.float32)
    fnorm = fnorm.at[:, :D_MODEL].set(final_norm["w"])
    fnorm = fnorm.at[:, LANE:LANE + D_MODEL].set(final_norm["b"])

    kernel = _make_decoder_kernel(N, L, S, num_layers)
    vmem = pl.BlockSpec(memory_space=pltpu.MemorySpace.VMEM)

    out = pl.pallas_call(
        kernel,
        out_shape=jax.ShapeDtypeStruct((num_layers, N * L, D), jnp.float32),
        in_specs=[vmem] * 8,      # everything resident in VMEM, single step
        out_specs=vmem,
    )(tgt2, memv2, memk2, qpos2, w_all, w2_all, b_all, fnorm)

    # (num_layers, N*L, D) -> (num_layers, L, N, D)  (PyTorch stack layout)
    return jnp.transpose(out.reshape(num_layers, N, L, D), (0, 2, 1, 3))


# --------------------------- params / reference ----------------------------- #
def _init_layer_params(key):
    keys = iter(jax.random.split(key, 24))

    def w(shape, scale=0.1):
        return jax.random.normal(next(keys), shape, jnp.float32) * scale

    p = {}
    for pre in ("sa", "ca"):
        p[pre + "_wq"] = w((D_MODEL, D_MODEL))
        p[pre + "_wk"] = w((D_MODEL, D_MODEL))
        p[pre + "_wv"] = w((D_MODEL, D_MODEL))
        p[pre + "_bq"] = w((1, D_MODEL), 0.02)
        p[pre + "_bk"] = w((1, D_MODEL), 0.02)
        p[pre + "_bv"] = w((1, D_MODEL), 0.02)
        p[pre + "_wo"] = w((D_MODEL, D_MODEL))
        p[pre + "_bo"] = w((1, D_MODEL), 0.02)
    p["w1"] = w((D_MODEL, DIM_FF))
    p["b1"] = w((1, DIM_FF), 0.02)
    p["w2"] = w((DIM_FF, D_MODEL))
    p["b2"] = w((1, D_MODEL), 0.02)
    for ln in ("ln1", "ln3", "ln4"):
        p[ln + "_w"] = jnp.ones((1, D_MODEL), jnp.float32)
        p[ln + "_b"] = jnp.zeros((1, D_MODEL), jnp.float32)
    return p


def init_params(key, num_layers):
    keys = jax.random.split(key, num_layers + 2)
    layers = [_init_layer_params(k) for k in keys[:num_layers]]
    final = {
        "w": 1.0 + 0.05 * jax.random.normal(keys[num_layers], (1, D_MODEL)),
        "b": 0.05 * jax.random.normal(keys[num_layers + 1], (1, D_MODEL)),
    }
    return layers, final


def reference(tgt, memory, layer_params, final_norm, pos, query_pos):
    x = jnp.transpose(tgt, (1, 0, 2))
    mem = jnp.transpose(memory, (1, 0, 2))
    qp = jnp.transpose(query_pos, (1, 0, 2))
    pp = jnp.transpose(pos, (1, 0, 2))

    def mha(qi, ki, vi, p, pre):
        q = qi @ p[pre + "_wq"] + p[pre + "_bq"]
        k = ki @ p[pre + "_wk"] + p[pre + "_bk"]
        v = vi @ p[pre + "_wv"] + p[pre + "_bv"]
        Nb, Lq, _ = q.shape
        Lk = k.shape[1]
        qh = q.reshape(Nb, Lq, NUM_HEADS, HEAD_DIM)
        kh = k.reshape(Nb, Lk, NUM_HEADS, HEAD_DIM)
        vh = v.reshape(Nb, Lk, NUM_HEADS, HEAD_DIM)
        s = jnp.einsum('nqhd,nkhd->nhqk', qh, kh) / math.sqrt(HEAD_DIM)
        a = jax.nn.softmax(s, axis=-1)
        o = jnp.einsum('nhqk,nkhd->nqhd', a, vh).reshape(Nb, Lq, D_MODEL)
        return o @ p[pre + "_wo"] + p[pre + "_bo"]

    def ln(v, w, b):
        mu = v.mean(-1, keepdims=True)
        var = ((v - mu) ** 2).mean(-1, keepdims=True)
        return (v - mu) / jnp.sqrt(var + EPS) * w + b

    inter = []
    for p in layer_params:
        sa = mha(x + qp, x + qp, x, p, "sa")
        x = ln(x + sa, p["ln1_w"], p["ln1_b"])
        ca = mha(x + qp, mem + pp, mem, p, "ca")
        x = ln(x + ca, p["ln3_w"], p["ln3_b"])
        h = jax.nn.relu(x @ p["w1"] + p["b1"])
        m = h @ p["w2"] + p["b2"]
        x = ln(x + m, p["ln4_w"], p["ln4_b"])
        inter.append(ln(x, final_norm["w"], final_norm["b"]))
    out = jnp.stack(inter)                     # (nl, N, L, D)
    return jnp.transpose(out, (0, 2, 1, 3))    # (nl, L, N, D)


# ---------------------------------- main ------------------------------------ #
if __name__ == "__main__":
    key = jax.random.PRNGKey(0)
    kt, km, kq, kp, kw = jax.random.split(key, 5)
    L, S, N = 8, 16, 2  # num_queries, memory length, batch
    tgt = jax.random.normal(kt, (L, N, D_MODEL), jnp.float32)
    memory = jax.random.normal(km, (S, N, D_MODEL), jnp.float32)
    query_pos = jax.random.normal(kq, (L, N, D_MODEL), jnp.float32)
    pos = jax.random.normal(kp, (S, N, D_MODEL), jnp.float32)
    layer_params, final_norm = init_params(kw, NUM_LAYERS)

    out = mdetr_transformer_decoder(tgt, memory, layer_params, final_norm,
                                    pos=pos, query_pos=query_pos)
    out = jax.block_until_ready(out)

    ref = reference(tgt, memory, layer_params, final_norm, pos, query_pos)
    assert out.shape == (NUM_LAYERS, L, N, D_MODEL)
    err = float(jnp.max(jnp.abs(out - ref)))
    # tolerance slightly loosened for the approximate (EUP) softmax reciprocal
    assert jnp.allclose(out, ref, atol=2e-3, rtol=2e-3), f"max abs err {err}"
    print("KERNEL_OK")
</pallas_src>

<mosaic_0001>
module attributes {stable_mosaic.version = 11 : i64} {
  func.func @kernel(%arg0: memref<16x32xf32, #tpu.memory_space<vmem>>, %arg1: memref<32x32xf32, #tpu.memory_space<vmem>>, %arg2: memref<32x32xf32, #tpu.memory_space<vmem>>, %arg3: memref<16x32xf32, #tpu.memory_space<vmem>>, %arg4: memref<2x32x1024xf32, #tpu.memory_space<vmem>>, %arg5: memref<2x64x32xf32, #tpu.memory_space<vmem>>, %arg6: memref<2x1x1920xf32, #tpu.memory_space<vmem>>, %arg7: memref<1x256xf32, #tpu.memory_space<vmem>>, %arg8: memref<2x16x32xf32, #tpu.memory_space<vmem>>) attributes {dimension_semantics = [], scalar_prefetch = 0 : i64, scratch_operands = 0 : i64, tpu.core_type = #tpu.core_type<tc>} {
    %c0 = arith.constant 0 : index
    %c0_0 = arith.constant 0 : index
    %0 = vector.load %arg0[%c0, %c0_0] : memref<16x32xf32, #tpu.memory_space<vmem>>, vector<16x32xf32>
    %c0_1 = arith.constant 0 : index
    %c0_2 = arith.constant 0 : index
    %1 = vector.load %arg3[%c0_1, %c0_2] : memref<16x32xf32, #tpu.memory_space<vmem>>, vector<16x32xf32>
    %c0_3 = arith.constant 0 : index
    %c0_4 = arith.constant 0 : index
    %2 = vector.load %arg1[%c0_3, %c0_4] : memref<32x32xf32, #tpu.memory_space<vmem>>, vector<32x32xf32>
    %c0_5 = arith.constant 0 : index
    %c0_6 = arith.constant 0 : index
    %3 = vector.load %arg2[%c0_5, %c0_6] : memref<32x32xf32, #tpu.memory_space<vmem>>, vector<32x32xf32>
    %c0_7 = arith.constant 0 : index
    %c0_8 = arith.constant 0 : index
    %4 = vector.load %arg7[%c0_7, %c0_8] : memref<1x256xf32, #tpu.memory_space<vmem>>, vector<1x32xf32>
    %c0_9 = arith.constant 0 : index
    %c128 = arith.constant 128 : index
    %5 = vector.load %arg7[%c0_9, %c128] : memref<1x256xf32, #tpu.memory_space<vmem>>, vector<1x32xf32>
    %6 = arith.addf %0, %1 : vector<16x32xf32>
    %c0_10 = arith.constant 0 : index
    %c0_11 = arith.constant 0 : index
    %c0_12 = arith.constant 0 : index
    %7 = vector.load %arg4[%c0_10, %c0_11, %c0_12] : memref<2x32x1024xf32, #tpu.memory_space<vmem>>, vector<1x32x64xf32>
    %8 = vector.shape_cast %7 : vector<1x32x64xf32> to vector<32x64xf32>
    %cst = arith.constant dense<0.000000e+00> : vector<16x64xf32>
    %9 = tpu.matmul %6, %8, %cst {dimension_numbers = #tpu.dot_dimension_numbers<[1], [0], [0], [1], [0, 0, 1, 1], [], []>} : vector<16x32xf32>, vector<32x64xf32>, vector<16x64xf32> -> vector<16x64xf32>
    %c0_13 = arith.constant 0 : index
    %c0_14 = arith.constant 0 : index
    %c0_15 = arith.constant 0 : index
    %10 = vector.load %arg6[%c0_13, %c0_14, %c0_15] : memref<2x1x1920xf32, #tpu.memory_space<vmem>>, vector<1x1x64xf32>
    %11 = vector.shape_cast %10 : vector<1x1x64xf32> to vector<1x64xf32>
    %12 = vector.broadcast %11 : vector<1x64xf32> to vector<16x64xf32>
    %13 = arith.addf %9, %12 : vector<16x64xf32>
    %c0_16 = arith.constant 0 : index
    %c0_17 = arith.constant 0 : index
    %c128_18 = arith.constant 128 : index
    %14 = vector.load %arg4[%c0_16, %c0_17, %c128_18] : memref<2x32x1024xf32, #tpu.memory_space<vmem>>, vector<1x32x32xf32>
    %15 = vector.shape_cast %14 : vector<1x32x32xf32> to vector<32x32xf32>
    %cst_19 = arith.constant dense<0.000000e+00> : vector<16x32xf32>
    %16 = tpu.matmul %0, %15, %cst_19 {dimension_numbers = #tpu.dot_dimension_numbers<[1], [0], [0], [1], [0, 0, 1, 1], [], []>} : vector<16x32xf32>, vector<32x32xf32>, vector<16x32xf32> -> vector<16x32xf32>
    %c0_20 = arith.constant 0 : index
    %c0_21 = arith.constant 0 : index
    %c128_22 = arith.constant 128 : index
    %17 = vector.load %arg6[%c0_20, %c0_21, %c128_22] : memref<2x1x1920xf32, #tpu.memory_space<vmem>>, vector<1x1x32xf32>
    %18 = vector.shape_cast %17 : vector<1x1x32xf32> to vector<1x32xf32>
    %19 = vector.broadcast %18 : vector<1x32xf32> to vector<16x32xf32>
    %20 = arith.addf %16, %19 : vector<16x32xf32>
    %21 = vector.extract_strided_slice %13 {offsets = [0, 0], sizes = [16, 32], strides = [1, 1]} : vector<16x64xf32> to vector<16x32xf32>
    %22 = vector.extract_strided_slice %13 {offsets = [0, 32], sizes = [16, 32], strides = [1, 1]} : vector<16x64xf32> to vector<16x32xf32>
    %c0_23 = arith.constant 0 : index
    %c0_24 = arith.constant 0 : index
    %c256 = arith.constant 256 : index
    %23 = vector.load %arg4[%c0_23, %c0_24, %c256] : memref<2x32x1024xf32, #tpu.memory_space<vmem>>, vector<1x32x32xf32>
    %24 = vector.shape_cast %23 : vector<1x32x32xf32> to vector<32x32xf32>
    %c0_25 = arith.constant 0 : index
    %c0_26 = arith.constant 0 : index
    %c256_27 = arith.constant 256 : index
    %25 = vector.load %arg6[%c0_25, %c0_26, %c256_27] : memref<2x1x1920xf32, #tpu.memory_space<vmem>>, vector<1x1x32xf32>
    %26 = vector.shape_cast %25 : vector<1x1x32xf32> to vector<1x32xf32>
    %27 = vector.extract_strided_slice %21 {offsets = [0, 0], sizes = [8, 32], strides = [1, 1]} : vector<16x32xf32> to vector<8x32xf32>
    %28 = vector.extract_strided_slice %22 {offsets = [0, 0], sizes = [8, 32], strides = [1, 1]} : vector<16x32xf32> to vector<8x32xf32>
    %29 = vector.extract_strided_slice %27 {offsets = [0, 0], sizes = [8, 8], strides = [1, 1]} : vector<8x32xf32> to vector<8x8xf32>
    %30 = vector.extract_strided_slice %28 {offsets = [0, 0], sizes = [8, 8], strides = [1, 1]} : vector<8x32xf32> to vector<8x8xf32>
    %cst_28 = arith.constant dense<0.000000e+00> : vector<8x8xf32>
    %31 = tpu.matmul %29, %30, %cst_28 {dimension_numbers = #tpu.dot_dimension_numbers<[1], [1], [0], [0], [0, 0, 1, 0], [], []>} : vector<8x8xf32>, vector<8x8xf32>, vector<8x8xf32> -> vector<8x8xf32>
    %32 = vector.extract_strided_slice %27 {offsets = [0, 8], sizes = [8, 8], strides = [1, 1]} : vector<8x32xf32> to vector<8x8xf32>
    %33 = vector.extract_strided_slice %28 {offsets = [0, 8], sizes = [8, 8], strides = [1, 1]} : vector<8x32xf32> to vector<8x8xf32>
    %cst_29 = arith.constant dense<0.000000e+00> : vector<8x8xf32>
    %34 = tpu.matmul %32, %33, %cst_29 {dimension_numbers = #tpu.dot_dimension_numbers<[1], [1], [0], [0], [0, 0, 1, 0], [], []>} : vector<8x8xf32>, vector<8x8xf32>, vector<8x8xf32> -> vector<8x8xf32>
    %35 = vector.extract_strided_slice %27 {offsets = [0, 16], sizes = [8, 8], strides = [1, 1]} : vector<8x32xf32> to vector<8x8xf32>
    %36 = vector.extract_strided_slice %28 {offsets = [0, 16], sizes = [8, 8], strides = [1, 1]} : vector<8x32xf32> to vector<8x8xf32>
    %cst_30 = arith.constant dense<0.000000e+00> : vector<8x8xf32>
    %37 = tpu.matmul %35, %36, %cst_30 {dimension_numbers = #tpu.dot_dimension_numbers<[1], [1], [0], [0], [0, 0, 1, 0], [], []>} : vector<8x8xf32>, vector<8x8xf32>, vector<8x8xf32> -> vector<8x8xf32>
    %38 = vector.extract_strided_slice %27 {offsets = [0, 24], sizes = [8, 8], strides = [1, 1]} : vector<8x32xf32> to vector<8x8xf32>
    %39 = vector.extract_strided_slice %28 {offsets = [0, 24], sizes = [8, 8], strides = [1, 1]} : vector<8x32xf32> to vector<8x8xf32>
    %cst_31 = arith.constant dense<0.000000e+00> : vector<8x8xf32>
    %40 = tpu.matmul %38, %39, %cst_31 {dimension_numbers = #tpu.dot_dimension_numbers<[1], [1], [0], [0], [0, 0, 1, 0], [], []>} : vector<8x8xf32>, vector<8x8xf32>, vector<8x8xf32> -> vector<8x8xf32>
    %41 = vector.extract_strided_slice %21 {offsets = [8, 0], sizes = [8, 32], strides = [1, 1]} : vector<16x32xf32> to vector<8x32xf32>
    %42 = vector.extract_strided_slice %22 {offsets = [8, 0], sizes = [8, 32], strides = [1, 1]} : vector<16x32xf32> to vector<8x32xf32>
    %43 = vector.extract_strided_slice %41 {offsets = [0, 0], sizes = [8, 8], strides = [1, 1]} : vector<8x32xf32> to vector<8x8xf32>
    %44 = vector.extract_strided_slice %42 {offsets = [0, 0], sizes = [8, 8], strides = [1, 1]} : vector<8x32xf32> to vector<8x8xf32>
    %cst_32 = arith.constant dense<0.000000e+00> : vector<8x8xf32>
    %45 = tpu.matmul %43, %44, %cst_32 {dimension_numbers = #tpu.dot_dimension_numbers<[1], [1], [0], [0], [0, 0, 1, 0], [], []>} : vector<8x8xf32>, vector<8x8xf32>, vector<8x8xf32> -> vector<8x8xf32>
    %46 = vector.extract_strided_slice %41 {offsets = [0, 8], sizes = [8, 8], strides = [1, 1]} : vector<8x32xf32> to vector<8x8xf32>
    %47 = vector.extract_strided_slice %42 {offsets = [0, 8], sizes = [8, 8], strides = [1, 1]} : vector<8x32xf32> to vector<8x8xf32>
    %cst_33 = arith.constant dense<0.000000e+00> : vector<8x8xf32>
    %48 = tpu.matmul %46, %47, %cst_33 {dimension_numbers = #tpu.dot_dimension_numbers<[1], [1], [0], [0], [0, 0, 1, 0], [], []>} : vector<8x8xf32>, vector<8x8xf32>, vector<8x8xf32> -> vector<8x8xf32>
    %49 = vector.extract_strided_slice %41 {offsets = [0, 16], sizes = [8, 8], strides = [1, 1]} : vector<8x32xf32> to vector<8x8xf32>
    %50 = vector.extract_strided_slice %42 {offsets = [0, 16], sizes = [8, 8], strides = [1, 1]} : vector<8x32xf32> to vector<8x8xf32>
    %cst_34 = arith.constant dense<0.000000e+00> : vector<8x8xf32>
    %51 = tpu.matmul %49, %50, %cst_34 {dimension_numbers = #tpu.dot_dimension_numbers<[1], [1], [0], [0], [0, 0, 1, 0], [], []>} : vector<8x8xf32>, vector<8x8xf32>, vector<8x8xf32> -> vector<8x8xf32>
    %52 = vector.extract_strided_slice %41 {offsets = [0, 24], sizes = [8, 8], strides = [1, 1]} : vector<8x32xf32> to vector<8x8xf32>
    %53 = vector.extract_strided_slice %42 {offsets = [0, 24], sizes = [8, 8], strides = [1, 1]} : vector<8x32xf32> to vector<8x8xf32>
    %cst_35 = arith.constant dense<0.000000e+00> : vector<8x8xf32>
    %54 = tpu.matmul %52, %53, %cst_35 {dimension_numbers = #tpu.dot_dimension_numbers<[1], [1], [0], [0], [0, 0, 1, 0], [], []>} : vector<8x8xf32>, vector<8x8xf32>, vector<8x8xf32> -> vector<8x8xf32>
    %55 = tpu.concatenate %31, %34, %37, %40, %45, %48, %51, %54 in 0 : vector<8x8xf32>, vector<8x8xf32>, vector<8x8xf32>, vector<8x8xf32>, vector<8x8xf32>, vector<8x8xf32>, vector<8x8xf32>, vector<8x8xf32> -> vector<64x8xf32>
    %cst_36 = arith.constant dense<0xFF800000> : vector<64xf32>
    %56 = vector.multi_reduction <maximumf>, %55, %cst_36 [1] : vector<64x8xf32> to vector<64xf32>
    %57 = vector.shape_cast %56 : vector<64xf32> to vector<64x1xf32>
    %58 = vector.broadcast %57 : vector<64x1xf32> to vector<64x8xf32>
    %59 = arith.subf %55, %58 : vector<64x8xf32>
    %60 = math.exp %59 : vector<64x8xf32>
    %cst_37 = arith.constant dense<0.000000e+00> : vector<64xf32>
    %61 = vector.multi_reduction <add>, %60, %cst_37 [1] : vector<64x8xf32> to vector<64xf32>
    %62 = vector.shape_cast %61 : vector<64xf32> to vector<64x1xf32>
    %63 = tpu.reciprocal %62 {approx = true} : vector<64x1xf32> -> vector<64x1xf32>
    %64 = vector.broadcast %63 : vector<64x1xf32> to vector<64x8xf32>
    %65 = arith.mulf %60, %64 : vector<64x8xf32>
    %66 = vector.extract_strided_slice %20 {offsets = [0, 0], sizes = [8, 32], strides = [1, 1]} : vector<16x32xf32> to vector<8x32xf32>
    %67 = vector.extract_strided_slice %65 {offsets = [0, 0], sizes = [8, 8], strides = [1, 1]} : vector<64x8xf32> to vector<8x8xf32>
    %68 = vector.extract_strided_slice %66 {offsets = [0, 0], sizes = [8, 8], strides = [1, 1]} : vector<8x32xf32> to vector<8x8xf32>
    %cst_38 = arith.constant dense<0.000000e+00> : vector<8x8xf32>
    %69 = tpu.matmul %67, %68, %cst_38 {dimension_numbers = #tpu.dot_dimension_numbers<[1], [0], [0], [1], [0, 0, 1, 1], [], []>} : vector<8x8xf32>, vector<8x8xf32>, vector<8x8xf32> -> vector<8x8xf32>
    %70 = vector.extract_strided_slice %24 {offsets = [0, 0], sizes = [8, 32], strides = [1, 1]} : vector<32x32xf32> to vector<8x32xf32>
    %cst_39 = arith.constant dense<0.000000e+00> : vector<8x32xf32>
    %71 = tpu.matmul %69, %70, %cst_39 {dimension_numbers = #tpu.dot_dimension_numbers<[1], [0], [0], [1], [0, 0, 1, 1], [], []>} : vector<8x8xf32>, vector<8x32xf32>, vector<8x32xf32> -> vector<8x32xf32>
    %72 = vector.extract_strided_slice %65 {offsets = [8, 0], sizes = [8, 8], strides = [1, 1]} : vector<64x8xf32> to vector<8x8xf32>
    %73 = vector.extract_strided_slice %66 {offsets = [0, 8], sizes = [8, 8], strides = [1, 1]} : vector<8x32xf32> to vector<8x8xf32>
    %cst_40 = arith.constant dense<0.000000e+00> : vector<8x8xf32>
    %74 = tpu.matmul %72, %73, %cst_40 {dimension_numbers = #tpu.dot_dimension_numbers<[1], [0], [0], [1], [0, 0, 1, 1], [], []>} : vector<8x8xf32>, vector<8x8xf32>, vector<8x8xf32> -> vector<8x8xf32>
    %75 = vector.extract_strided_slice %24 {offsets = [8, 0], sizes = [8, 32], strides = [1, 1]} : vector<32x32xf32> to vector<8x32xf32>
    %cst_41 = arith.constant dense<0.000000e+00> : vector<8x32xf32>
    %76 = tpu.matmul %74, %75, %cst_41 {dimension_numbers = #tpu.dot_dimension_numbers<[1], [0], [0], [1], [0, 0, 1, 1], [], []>} : vector<8x8xf32>, vector<8x32xf32>, vector<8x32xf32> -> vector<8x32xf32>
    %77 = arith.addf %71, %76 : vector<8x32xf32>
    %78 = vector.extract_strided_slice %65 {offsets = [16, 0], sizes = [8, 8], strides = [1, 1]} : vector<64x8xf32> to vector<8x8xf32>
    %79 = vector.extract_strided_slice %66 {offsets = [0, 16], sizes = [8, 8], strides = [1, 1]} : vector<8x32xf32> to vector<8x8xf32>
    %cst_42 = arith.constant dense<0.000000e+00> : vector<8x8xf32>
    %80 = tpu.matmul %78, %79, %cst_42 {dimension_numbers = #tpu.dot_dimension_numbers<[1], [0], [0], [1], [0, 0, 1, 1], [], []>} : vector<8x8xf32>, vector<8x8xf32>, vector<8x8xf32> -> vector<8x8xf32>
    %81 = vector.extract_strided_slice %24 {offsets = [16, 0], sizes = [8, 32], strides = [1, 1]} : vector<32x32xf32> to vector<8x32xf32>
    %cst_43 = arith.constant dense<0.000000e+00> : vector<8x32xf32>
    %82 = tpu.matmul %80, %81, %cst_43 {dimension_numbers = #tpu.dot_dimension_numbers<[1], [0], [0], [1], [0, 0, 1, 1], [], []>} : vector<8x8xf32>, vector<8x32xf32>, vector<8x32xf32> -> vector<8x32xf32>
    %83 = arith.addf %77, %82 : vector<8x32xf32>
    %84 = vector.extract_strided_slice %65 {offsets = [24, 0], sizes = [8, 8], strides = [1, 1]} : vector<64x8xf32> to vector<8x8xf32>
    %85 = vector.extract_strided_slice %66 {offsets = [0, 24], sizes = [8, 8], strides = [1, 1]} : vector<8x32xf32> to vector<8x8xf32>
    %cst_44 = arith.constant dense<0.000000e+00> : vector<8x8xf32>
    %86 = tpu.matmul %84, %85, %cst_44 {dimension_numbers = #tpu.dot_dimension_numbers<[1], [0], [0], [1], [0, 0, 1, 1], [], []>} : vector<8x8xf32>, vector<8x8xf32>, vector<8x8xf32> -> vector<8x8xf32>
    %87 = vector.extract_strided_slice %24 {offsets = [24, 0], sizes = [8, 32], strides = [1, 1]} : vector<32x32xf32> to vector<8x32xf32>
    %cst_45 = arith.constant dense<0.000000e+00> : vector<8x32xf32>
    %88 = tpu.matmul %86, %87, %cst_45 {dimension_numbers = #tpu.dot_dimension_numbers<[1], [0], [0], [1], [0, 0, 1, 1], [], []>} : vector<8x8xf32>, vector<8x32xf32>, vector<8x32xf32> -> vector<8x32xf32>
    %89 = arith.addf %83, %88 : vector<8x32xf32>
    %90 = vector.extract_strided_slice %20 {offsets = [8, 0], sizes = [8, 32], strides = [1, 1]} : vector<16x32xf32> to vector<8x32xf32>
    %91 = vector.extract_strided_slice %65 {offsets = [32, 0], sizes = [8, 8], strides = [1, 1]} : vector<64x8xf32> to vector<8x8xf32>
    %92 = vector.extract_strided_slice %90 {offsets = [0, 0], sizes = [8, 8], strides = [1, 1]} : vector<8x32xf32> to vector<8x8xf32>
    %cst_46 = arith.constant dense<0.000000e+00> : vector<8x8xf32>
    %93 = tpu.matmul %91, %92, %cst_46 {dimension_numbers = #tpu.dot_dimension_numbers<[1], [0], [0], [1], [0, 0, 1, 1], [], []>} : vector<8x8xf32>, vector<8x8xf32>, vector<8x8xf32> -> vector<8x8xf32>
    %94 = vector.extract_strided_slice %24 {offsets = [0, 0], sizes = [8, 32], strides = [1, 1]} : vector<32x32xf32> to vector<8x32xf32>
    %cst_47 = arith.constant dense<0.000000e+00> : vector<8x32xf32>
    %95 = tpu.matmul %93, %94, %cst_47 {dimension_numbers = #tpu.dot_dimension_numbers<[1], [0], [0], [1], [0, 0, 1, 1], [], []>} : vector<8x8xf32>, vector<8x32xf32>, vector<8x32xf32> -> vector<8x32xf32>
    %96 = vector.extract_strided_slice %65 {offsets = [40, 0], sizes = [8, 8], strides = [1, 1]} : vector<64x8xf32> to vector<8x8xf32>
    %97 = vector.extract_strided_slice %90 {offsets = [0, 8], sizes = [8, 8], strides = [1, 1]} : vector<8x32xf32> to vector<8x8xf32>
    %cst_48 = arith.constant dense<0.000000e+00> : vector<8x8xf32>
    %98 = tpu.matmul %96, %97, %cst_48 {dimension_numbers = #tpu.dot_dimension_numbers<[1], [0], [0], [1], [0, 0, 1, 1], [], []>} : vector<8x8xf32>, vector<8x8xf32>, vector<8x8xf32> -> vector<8x8xf32>
    %99 = vector.extract_strided_slice %24 {offsets = [8, 0], sizes = [8, 32], strides = [1, 1]} : vector<32x32xf32> to vector<8x32xf32>
    %cst_49 = arith.constant dense<0.000000e+00> : vector<8x32xf32>
    %100 = tpu.matmul %98, %99, %cst_49 {dimension_numbers = #tpu.dot_dimension_numbers<[1], [0], [0], [1], [0, 0, 1, 1], [], []>} : vector<8x8xf32>, vector<8x32xf32>, vector<8x32xf32> -> vector<8x32xf32>
    %101 = arith.addf %95, %100 : vector<8x32xf32>
    %102 = vector.extract_strided_slice %65 {offsets = [48, 0], sizes = [8, 8], strides = [1, 1]} : vector<64x8xf32> to vector<8x8xf32>
    %103 = vector.extract_strided_slice %90 {offsets = [0, 16], sizes = [8, 8], strides = [1, 1]} : vector<8x32xf32> to vector<8x8xf32>
    %cst_50 = arith.constant dense<0.000000e+00> : vector<8x8xf32>
    %104 = tpu.matmul %102, %103, %cst_50 {dimension_numbers = #tpu.dot_dimension_numbers<[1], [0], [0], [1], [0, 0, 1, 1], [], []>} : vector<8x8xf32>, vector<8x8xf32>, vector<8x8xf32> -> vector<8x8xf32>
    %105 = vector.extract_strided_slice %24 {offsets = [16, 0], sizes = [8, 32], strides = [1, 1]} : vector<32x32xf32> to vector<8x32xf32>
    %cst_51 = arith.constant dense<0.000000e+00> : vector<8x32xf32>
    %106 = tpu.matmul %104, %105, %cst_51 {dimension_numbers = #tpu.dot_dimension_numbers<[1], [0], [0], [1], [0, 0, 1, 1], [], []>} : vector<8x8xf32>, vector<8x32xf32>, vector<8x32xf32> -> vector<8x32xf32>
    %107 = arith.addf %101, %106 : vector<8x32xf32>
    %108 = vector.extract_strided_slice %65 {offsets = [56, 0], sizes = [8, 8], strides = [1, 1]} : vector<64x8xf32> to vector<8x8xf32>
    %109 = vector.extract_strided_slice %90 {offsets = [0, 24], sizes = [8, 8], strides = [1, 1]} : vector<8x32xf32> to vector<8x8xf32>
    %cst_52 = arith.constant dense<0.000000e+00> : vector<8x8xf32>
    %110 = tpu.matmul %108, %109, %cst_52 {dimension_numbers = #tpu.dot_dimension_numbers<[1], [0], [0], [1], [0, 0, 1, 1], [], []>} : vector<8x8xf32>, vector<8x8xf32>, vector<8x8xf32> -> vector<8x8xf32>
    %111 = vector.extract_strided_slice %24 {offsets = [24, 0], sizes = [8, 32], strides = [1, 1]} : vector<32x32xf32> to vector<8x32xf32>
    %cst_53 = arith.constant dense<0.000000e+00> : vector<8x32xf32>
    %112 = tpu.matmul %110, %111, %cst_53 {dimension_numbers = #tpu.dot_dimension_numbers<[1], [0], [0], [1], [0, 0, 1, 1], [], []>} : vector<8x8xf32>, vector<8x32xf32>, vector<8x32xf32> -> vector<8x32xf32>
    %113 = arith.addf %107, %112 : vector<8x32xf32>
    %114 = tpu.concatenate %89, %113 in 0 : vector<8x32xf32>, vector<8x32xf32> -> vector<16x32xf32>
    %115 = vector.broadcast %26 : vector<1x32xf32> to vector<16x32xf32>
    %116 = arith.addf %114, %115 : vector<16x32xf32>
    %117 = arith.addf %0, %116 : vector<16x32xf32>
    %c0_54 = arith.constant 0 : index
    %c0_55 = arith.constant 0 : index
    %c1152 = arith.constant 1152 : index
    %118 = vector.load %arg6[%c0_54, %c0_55, %c1152] : memref<2x1x1920xf32, #tpu.memory_space<vmem>>, vector<1x1x32xf32>
    %119 = vector.shape_cast %118 : vector<1x1x32xf32> to vector<1x32xf32>
    %c0_56 = arith.constant 0 : index
    %c0_57 = arith.constant 0 : index
    %c1280 = arith.constant 1280 : index
    %120 = vector.load %arg6[%c0_56, %c0_57, %c1280] : memref<2x1x1920xf32, #tpu.memory_space<vmem>>, vector<1x1x32xf32>
    %121 = vector.shape_cast %120 : vector<1x1x32xf32> to vector<1x32xf32>
    %cst_58 = arith.constant dense<0.000000e+00> : vector<16xf32>
    %122 = vector.multi_reduction <add>, %117, %cst_58 [1] : vector<16x32xf32> to vector<16xf32>
    %123 = vector.shape_cast %122 : vector<16xf32> to vector<16x1xf32>
    %cst_59 = arith.constant 3.200000e+01 : f32
    %124 = vector.broadcast %cst_59 : f32 to vector<16x1xf32>
    %125 = arith.divf %123, %124 : vector<16x1xf32>
    %126 = vector.broadcast %125 : vector<16x1xf32> to vector<16x32xf32>
    %127 = arith.subf %117, %126 : vector<16x32xf32>
    %128 = arith.mulf %127, %127 : vector<16x32xf32>
    %cst_60 = arith.constant dense<0.000000e+00> : vector<16xf32>
    %129 = vector.multi_reduction <add>, %128, %cst_60 [1] : vector<16x32xf32> to vector<16xf32>
    %130 = vector.shape_cast %129 : vector<16xf32> to vector<16x1xf32>
    %cst_61 = arith.constant 3.200000e+01 : f32
    %131 = vector.broadcast %cst_61 : f32 to vector<16x1xf32>
    %132 = arith.divf %130, %131 : vector<16x1xf32>
    %133 = vector.broadcast %125 : vector<16x1xf32> to vector<16x32xf32>
    %134 = arith.subf %117, %133 : vector<16x32xf32>
    %cst_62 = arith.constant 9.99999974E-6 : f32
    %135 = vector.broadcast %cst_62 : f32 to vector<16x1xf32>
    %136 = arith.addf %132, %135 : vector<16x1xf32>
    %137 = math.rsqrt %136 : vector<16x1xf32>
    %138 = vector.broadcast %137 : vector<16x1xf32> to vector<16x32xf32>
    %139 = arith.mulf %134, %138 : vector<16x32xf32>
    %140 = vector.broadcast %119 : vector<1x32xf32> to vector<16x32xf32>
    %141 = arith.mulf %139, %140 : vector<16x32xf32>
    %142 = vector.broadcast %121 : vector<1x32xf32> to vector<16x32xf32>
    %143 = arith.addf %141, %142 : vector<16x32xf32>
    %144 = arith.addf %143, %1 : vector<16x32xf32>
    %c0_63 = arith.constant 0 : index
    %c0_64 = arith.constant 0 : index
    %c384 = arith.constant 384 : index
    %145 = vector.load %arg4[%c0_63, %c0_64, %c384] : memref<2x32x1024xf32, #tpu.memory_space<vmem>>, vector<1x32x32xf32>
    %146 = vector.shape_cast %145 : vector<1x32x32xf32> to vector<32x32xf32>
    %cst_65 = arith.constant dense<0.000000e+00> : vector<16x32xf32>
    %147 = tpu.matmul %144, %146, %cst_65 {dimension_numbers = #tpu.dot_dimension_numbers<[1], [0], [0], [1], [0, 0, 1, 1], [], []>} : vector<16x32xf32>, vector<32x32xf32>, vector<16x32xf32> -> vector<16x32xf32>
    %c0_66 = arith.constant 0 : index
    %c0_67 = arith.constant 0 : index
    %c384_68 = arith.constant 384 : index
    %148 = vector.load %arg6[%c0_66, %c0_67, %c384_68] : memref<2x1x1920xf32, #tpu.memory_space<vmem>>, vector<1x1x32xf32>
    %149 = vector.shape_cast %148 : vector<1x1x32xf32> to vector<1x32xf32>
    %150 = vector.broadcast %149 : vector<1x32xf32> to vector<16x32xf32>
    %151 = arith.addf %147, %150 : vector<16x32xf32>
    %c0_69 = arith.constant 0 : index
    %c0_70 = arith.constant 0 : index
    %c512 = arith.constant 512 : index
    %152 = vector.load %arg4[%c0_69, %c0_70, %c512] : memref<2x32x1024xf32, #tpu.memory_space<vmem>>, vector<1x32x32xf32>
    %153 = vector.shape_cast %152 : vector<1x32x32xf32> to vector<32x32xf32>
    %cst_71 = arith.constant dense<0.000000e+00> : vector<32x32xf32>
    %154 = tpu.matmul %3, %153, %cst_71 {dimension_numbers = #tpu.dot_dimension_numbers<[1], [0], [0], [1], [0, 0, 1, 1], [], []>} : vector<32x32xf32>, vector<32x32xf32>, vector<32x32xf32> -> vector<32x32xf32>
    %c0_72 = arith.constant 0 : index
    %c0_73 = arith.constant 0 : index
    %c512_74 = arith.constant 512 : index
    %155 = vector.load %arg6[%c0_72, %c0_73, %c512_74] : memref<2x1x1920xf32, #tpu.memory_space<vmem>>, vector<1x1x32xf32>
    %156 = vector.shape_cast %155 : vector<1x1x32xf32> to vector<1x32xf32>
    %157 = vector.broadcast %156 : vector<1x32xf32> to vector<32x32xf32>
    %158 = arith.addf %154, %157 : vector<32x32xf32>
    %c0_75 = arith.constant 0 : index
    %c0_76 = arith.constant 0 : index
    %c640 = arith.constant 640 : index
    %159 = vector.load %arg4[%c0_75, %c0_76, %c640] : memref<2x32x1024xf32, #tpu.memory_space<vmem>>, vector<1x32x32xf32>
    %160 = vector.shape_cast %159 : vector<1x32x32xf32> to vector<32x32xf32>
    %cst_77 = arith.constant dense<0.000000e+00> : vector<32x32xf32>
    %161 = tpu.matmul %2, %160, %cst_77 {dimension_numbers = #tpu.dot_dimension_numbers<[1], [0], [0], [1], [0, 0, 1, 1], [], []>} : vector<32x32xf32>, vector<32x32xf32>, vector<32x32xf32> -> vector<32x32xf32>
    %c0_78 = arith.constant 0 : index
    %c0_79 = arith.constant 0 : index
    %c640_80 = arith.constant 640 : index
    %162 = vector.load %arg6[%c0_78, %c0_79, %c640_80] : memref<2x1x1920xf32, #tpu.memory_space<vmem>>, vector<1x1x32xf32>
    %163 = vector.shape_cast %162 : vector<1x1x32xf32> to vector<1x32xf32>
    %164 = vector.broadcast %163 : vector<1x32xf32> to vector<32x32xf32>
    %165 = arith.addf %161, %164 : vector<32x32xf32>
    %c0_81 = arith.constant 0 : index
    %c0_82 = arith.constant 0 : index
    %c768 = arith.constant 768 : index
    %166 = vector.load %arg4[%c0_81, %c0_82, %c768] : memref<2x32x1024xf32, #tpu.memory_space<vmem>>, vector<1x32x32xf32>
    %167 = vector.shape_cast %166 : vector<1x32x32xf32> to vector<32x32xf32>
    %c0_83 = arith.constant 0 : index
    %c0_84 = arith.constant 0 : index
    %c768_85 = arith.constant 768 : index
    %168 = vector.load %arg6[%c0_83, %c0_84, %c768_85] : memref<2x1x1920xf32, #tpu.memory_space<vmem>>, vector<1x1x32xf32>
    %169 = vector.shape_cast %168 : vector<1x1x32xf32> to vector<1x32xf32>
    %170 = vector.extract_strided_slice %151 {offsets = [0, 0], sizes = [8, 32], strides = [1, 1]} : vector<16x32xf32> to vector<8x32xf32>
    %171 = vector.extract_strided_slice %158 {offsets = [0, 0], sizes = [16, 32], strides = [1, 1]} : vector<32x32xf32> to vector<16x32xf32>
    %172 = vector.extract_strided_slice %170 {offsets = [0, 0], sizes = [8, 8], strides = [1, 1]} : vector<8x32xf32> to vector<8x8xf32>
    %173 = vector.extract_strided_slice %171 {offsets = [0, 0], sizes = [16, 8], strides = [1, 1]} : vector<16x32xf32> to vector<16x8xf32>
    %cst_86 = arith.constant dense<0.000000e+00> : vector<8x16xf32>
    %174 = tpu.matmul %172, %173, %cst_86 {dimension_numbers = #tpu.dot_dimension_numbers<[1], [1], [0], [0], [0, 0, 1, 0], [], []>} : vector<8x8xf32>, vector<16x8xf32>, vector<8x16xf32> -> vector<8x16xf32>
    %175 = vector.extract_strided_slice %170 {offsets = [0, 8], sizes = [8, 8], strides = [1, 1]} : vector<8x32xf32> to vector<8x8xf32>
    %176 = vector.extract_strided_slice %171 {offsets = [0, 8], sizes = [16, 8], strides = [1, 1]} : vector<16x32xf32> to vector<16x8xf32>
    %cst_87 = arith.constant dense<0.000000e+00> : vector<8x16xf32>
    %177 = tpu.matmul %175, %176, %cst_87 {dimension_numbers = #tpu.dot_dimension_numbers<[1], [1], [0], [0], [0, 0, 1, 0], [], []>} : vector<8x8xf32>, vector<16x8xf32>, vector<8x16xf32> -> vector<8x16xf32>
    %178 = vector.extract_strided_slice %170 {offsets = [0, 16], sizes = [8, 8], strides = [1, 1]} : vector<8x32xf32> to vector<8x8xf32>
    %179 = vector.extract_strided_slice %171 {offsets = [0, 16], sizes = [16, 8], strides = [1, 1]} : vector<16x32xf32> to vector<16x8xf32>
    %cst_88 = arith.constant dense<0.000000e+00> : vector<8x16xf32>
    %180 = tpu.matmul %178, %179, %cst_88 {dimension_numbers = #tpu.dot_dimension_numbers<[1], [1], [0], [0], [0, 0, 1, 0], [], []>} : vector<8x8xf32>, vector<16x8xf32>, vector<8x16xf32> -> vector<8x16xf32>
    %181 = vector.extract_strided_slice %170 {offsets = [0, 24], sizes = [8, 8], strides = [1, 1]} : vector<8x32xf32> to vector<8x8xf32>
    %182 = vector.extract_strided_slice %171 {offsets = [0, 24], sizes = [16, 8], strides = [1, 1]} : vector<16x32xf32> to vector<16x8xf32>
    %cst_89 = arith.constant dense<0.000000e+00> : vector<8x16xf32>
    %183 = tpu.matmul %181, %182, %cst_89 {dimension_numbers = #tpu.dot_dimension_numbers<[1], [1], [0], [0], [0, 0, 1, 0], [], []>} : vector<8x8xf32>, vector<16x8xf32>, vector<8x16xf32> -> vector<8x16xf32>
    %184 = vector.extract_strided_slice %151 {offsets = [8, 0], sizes = [8, 32], strides = [1, 1]} : vector<16x32xf32> to vector<8x32xf32>
    %185 = vector.extract_strided_slice %158 {offsets = [16, 0], sizes = [16, 32], strides = [1, 1]} : vector<32x32xf32> to vector<16x32xf32>
    %186 = vector.extract_strided_slice %184 {offsets = [0, 0], sizes = [8, 8], strides = [1, 1]} : vector<8x32xf32> to vector<8x8xf32>
    %187 = vector.extract_strided_slice %185 {offsets = [0, 0], sizes = [16, 8], strides = [1, 1]} : vector<16x32xf32> to vector<16x8xf32>
    %cst_90 = arith.constant dense<0.000000e+00> : vector<8x16xf32>
    %188 = tpu.matmul %186, %187, %cst_90 {dimension_numbers = #tpu.dot_dimension_numbers<[1], [1], [0], [0], [0, 0, 1, 0], [], []>} : vector<8x8xf32>, vector<16x8xf32>, vector<8x16xf32> -> vector<8x16xf32>
    %189 = vector.extract_strided_slice %184 {offsets = [0, 8], sizes = [8, 8], strides = [1, 1]} : vector<8x32xf32> to vector<8x8xf32>
    %190 = vector.extract_strided_slice %185 {offsets = [0, 8], sizes = [16, 8], strides = [1, 1]} : vector<16x32xf32> to vector<16x8xf32>
    %cst_91 = arith.constant dense<0.000000e+00> : vector<8x16xf32>
    %191 = tpu.matmul %189, %190, %cst_91 {dimension_numbers = #tpu.dot_dimension_numbers<[1], [1], [0], [0], [0, 0, 1, 0], [], []>} : vector<8x8xf32>, vector<16x8xf32>, vector<8x16xf32> -> vector<8x16xf32>
    %192 = vector.extract_strided_slice %184 {offsets = [0, 16], sizes = [8, 8], strides = [1, 1]} : vector<8x32xf32> to vector<8x8xf32>
    %193 = vector.extract_strided_slice %185 {offsets = [0, 16], sizes = [16, 8], strides = [1, 1]} : vector<16x32xf32> to vector<16x8xf32>
    %cst_92 = arith.constant dense<0.000000e+00> : vector<8x16xf32>
    %194 = tpu.matmul %192, %193, %cst_92 {dimension_numbers = #tpu.dot_dimension_numbers<[1], [1], [0], [0], [0, 0, 1, 0], [], []>} : vector<8x8xf32>, vector<16x8xf32>, vector<8x16xf32> -> vector<8x16xf32>
    %195 = vector.extract_strided_slice %184 {offsets = [0, 24], sizes = [8, 8], strides = [1, 1]} : vector<8x32xf32> to vector<8x8xf32>
    %196 = vector.extract_strided_slice %185 {offsets = [0, 24], sizes = [16, 8], strides = [1, 1]} : vector<16x32xf32> to vector<16x8xf32>
    %cst_93 = arith.constant dense<0.000000e+00> : vector<8x16xf32>
    %197 = tpu.matmul %195, %196, %cst_93 {dimension_numbers = #tpu.dot_dimension_numbers<[1], [1], [0], [0], [0, 0, 1, 0], [], []>} : vector<8x8xf32>, vector<16x8xf32>, vector<8x16xf32> -> vector<8x16xf32>
    %198 = tpu.concatenate %174, %177, %180, %183, %188, %191, %194, %197 in 0 : vector<8x16xf32>, vector<8x16xf32>, vector<8x16xf32>, vector<8x16xf32>, vector<8x16xf32>, vector<8x16xf32>, vector<8x16xf32>, vector<8x16xf32> -> vector<64x16xf32>
    %cst_94 = arith.constant dense<0xFF800000> : vector<64xf32>
    %199 = vector.multi_reduction <maximumf>, %198, %cst_94 [1] : vector<64x16xf32> to vector<64xf32>
    %200 = vector.shape_cast %199 : vector<64xf32> to vector<64x1xf32>
    %201 = vector.broadcast %200 : vector<64x1xf32> to vector<64x16xf32>
    %202 = arith.subf %198, %201 : vector<64x16xf32>
    %203 = math.exp %202 : vector<64x16xf32>
    %cst_95 = arith.constant dense<0.000000e+00> : vector<64xf32>
    %204 = vector.multi_reduction <add>, %203, %cst_95 [1] : vector<64x16xf32> to vector<64xf32>
    %205 = vector.shape_cast %204 : vector<64xf32> to vector<64x1xf32>
    %206 = tpu.reciprocal %205 {approx = true} : vector<64x1xf32> -> vector<64x1xf32>
    %207 = vector.broadcast %206 : vector<64x1xf32> to vector<64x16xf32>
    %208 = arith.mulf %203, %207 : vector<64x16xf32>
    %209 = vector.extract_strided_slice %165 {offsets = [0, 0], sizes = [16, 32], strides = [1, 1]} : vector<32x32xf32> to vector<16x32xf32>
    %210 = vector.extract_strided_slice %208 {offsets = [0, 0], sizes = [8, 16], strides = [1, 1]} : vector<64x16xf32> to vector<8x16xf32>
    %211 = vector.extract_strided_slice %209 {offsets = [0, 0], sizes = [16, 8], strides = [1, 1]} : vector<16x32xf32> to vector<16x8xf32>
    %cst_96 = arith.constant dense<0.000000e+00> : vector<8x8xf32>
    %212 = tpu.matmul %210, %211, %cst_96 {dimension_numbers = #tpu.dot_dimension_numbers<[1], [0], [0], [1], [0, 0, 1, 1], [], []>} : vector<8x16xf32>, vector<16x8xf32>, vector<8x8xf32> -> vector<8x8xf32>
    %213 = vector.extract_strided_slice %167 {offsets = [0, 0], sizes = [8, 32], strides = [1, 1]} : vector<32x32xf32> to vector<8x32xf32>
    %cst_97 = arith.constant dense<0.000000e+00> : vector<8x32xf32>
    %214 = tpu.matmul %212, %213, %cst_97 {dimension_numbers = #tpu.dot_dimension_numbers<[1], [0], [0], [1], [0, 0, 1, 1], [], []>} : vector<8x8xf32>, vector<8x32xf32>, vector<8x32xf32> -> vector<8x32xf32>
    %215 = vector.extract_strided_slice %208 {offsets = [8, 0], sizes = [8, 16], strides = [1, 1]} : vector<64x16xf32> to vector<8x16xf32>
    %216 = vector.extract_strided_slice %209 {offsets = [0, 8], sizes = [16, 8], strides = [1, 1]} : vector<16x32xf32> to vector<16x8xf32>
    %cst_98 = arith.constant dense<0.000000e+00> : vector<8x8xf32>
    %217 = tpu.matmul %215, %216, %cst_98 {dimension_numbers = #tpu.dot_dimension_numbers<[1], [0], [0], [1], [0, 0, 1, 1], [], []>} : vector<8x16xf32>, vector<16x8xf32>, vector<8x8xf32> -> vector<8x8xf32>
    %218 = vector.extract_strided_slice %167 {offsets = [8, 0], sizes = [8, 32], strides = [1, 1]} : vector<32x32xf32> to vector<8x32xf32>
    %cst_99 = arith.constant dense<0.000000e+00> : vector<8x32xf32>
    %219 = tpu.matmul %217, %218, %cst_99 {dimension_numbers = #tpu.dot_dimension_numbers<[1], [0], [0], [1], [0, 0, 1, 1], [], []>} : vector<8x8xf32>, vector<8x32xf32>, vector<8x32xf32> -> vector<8x32xf32>
    %220 = arith.addf %214, %219 : vector<8x32xf32>
    %221 = vector.extract_strided_slice %208 {offsets = [16, 0], sizes = [8, 16], strides = [1, 1]} : vector<64x16xf32> to vector<8x16xf32>
    %222 = vector.extract_strided_slice %209 {offsets = [0, 16], sizes = [16, 8], strides = [1, 1]} : vector<16x32xf32> to vector<16x8xf32>
    %cst_100 = arith.constant dense<0.000000e+00> : vector<8x8xf32>
    %223 = tpu.matmul %221, %222, %cst_100 {dimension_numbers = #tpu.dot_dimension_numbers<[1], [0], [0], [1], [0, 0, 1, 1], [], []>} : vector<8x16xf32>, vector<16x8xf32>, vector<8x8xf32> -> vector<8x8xf32>
    %224 = vector.extract_strided_slice %167 {offsets = [16, 0], sizes = [8, 32], strides = [1, 1]} : vector<32x32xf32> to vector<8x32xf32>
    %cst_101 = arith.constant dense<0.000000e+00> : vector<8x32xf32>
    %225 = tpu.matmul %223, %224, %cst_101 {dimension_numbers = #tpu.dot_dimension_numbers<[1], [0], [0], [1], [0, 0, 1, 1], [], []>} : vector<8x8xf32>, vector<8x32xf32>, vector<8x32xf32> -> vector<8x32xf32>
    %226 = arith.addf %220, %225 : vector<8x32xf32>
    %227 = vector.extract_strided_slice %208 {offsets = [24, 0], sizes = [8, 16], strides = [1, 1]} : vector<64x16xf32> to vector<8x16xf32>
    %228 = vector.extract_strided_slice %209 {offsets = [0, 24], sizes = [16, 8], strides = [1, 1]} : vector<16x32xf32> to vector<16x8xf32>
    %cst_102 = arith.constant dense<0.000000e+00> : vector<8x8xf32>
    %229 = tpu.matmul %227, %228, %cst_102 {dimension_numbers = #tpu.dot_dimension_numbers<[1], [0], [0], [1], [0, 0, 1, 1], [], []>} : vector<8x16xf32>, vector<16x8xf32>, vector<8x8xf32> -> vector<8x8xf32>
    %230 = vector.extract_strided_slice %167 {offsets = [24, 0], sizes = [8, 32], strides = [1, 1]} : vector<32x32xf32> to vector<8x32xf32>
    %cst_103 = arith.constant dense<0.000000e+00> : vector<8x32xf32>
    %231 = tpu.matmul %229, %230, %cst_103 {dimension_numbers = #tpu.dot_dimension_numbers<[1], [0], [0], [1], [0, 0, 1, 1], [], []>} : vector<8x8xf32>, vector<8x32xf32>, vector<8x32xf32> -> vector<8x32xf32>
    %232 = arith.addf %226, %231 : vector<8x32xf32>
    %233 = vector.extract_strided_slice %165 {offsets = [16, 0], sizes = [16, 32], strides = [1, 1]} : vector<32x32xf32> to vector<16x32xf32>
    %234 = vector.extract_strided_slice %208 {offsets = [32, 0], sizes = [8, 16], strides = [1, 1]} : vector<64x16xf32> to vector<8x16xf32>
    %235 = vector.extract_strided_slice %233 {offsets = [0, 0], sizes = [16, 8], strides = [1, 1]} : vector<16x32xf32> to vector<16x8xf32>
    %cst_104 = arith.constant dense<0.000000e+00> : vector<8x8xf32>
    %236 = tpu.matmul %234, %235, %cst_104 {dimension_numbers = #tpu.dot_dimension_numbers<[1], [0], [0], [1], [0, 0, 1, 1], [], []>} : vector<8x16xf32>, vector<16x8xf32>, vector<8x8xf32> -> vector<8x8xf32>
    %237 = vector.extract_strided_slice %167 {offsets = [0, 0], sizes = [8, 32], strides = [1, 1]} : vector<32x32xf32> to vector<8x32xf32>
    %cst_105 = arith.constant dense<0.000000e+00> : vector<8x32xf32>
    %238 = tpu.matmul %236, %237, %cst_105 {dimension_numbers = #tpu.dot_dimension_numbers<[1], [0], [0], [1], [0, 0, 1, 1], [], []>} : vector<8x8xf32>, vector<8x32xf32>, vector<8x32xf32> -> vector<8x32xf32>
    %239 = vector.extract_strided_slice %208 {offsets = [40, 0], sizes = [8, 16], strides = [1, 1]} : vector<64x16xf32> to vector<8x16xf32>
    %240 = vector.extract_strided_slice %233 {offsets = [0, 8], sizes = [16, 8], strides = [1, 1]} : vector<16x32xf32> to vector<16x8xf32>
    %cst_106 = arith.constant dense<0.000000e+00> : vector<8x8xf32>
    %241 = tpu.matmul %239, %240, %cst_106 {dimension_numbers = #tpu.dot_dimension_numbers<[1], [0], [0], [1], [0, 0, 1, 1], [], []>} : vector<8x16xf32>, vector<16x8xf32>, vector<8x8xf32> -> vector<8x8xf32>
    %242 = vector.extract_strided_slice %167 {offsets = [8, 0], sizes = [8, 32], strides = [1, 1]} : vector<32x32xf32> to vector<8x32xf32>
    %cst_107 = arith.constant dense<0.000000e+00> : vector<8x32xf32>
    %243 = tpu.matmul %241, %242, %cst_107 {dimension_numbers = #tpu.dot_dimension_numbers<[1], [0], [0], [1], [0, 0, 1, 1], [], []>} : vector<8x8xf32>, vector<8x32xf32>, vector<8x32xf32> -> vector<8x32xf32>
    %244 = arith.addf %238, %243 : vector<8x32xf32>
    %245 = vector.extract_strided_slice %208 {offsets = [48, 0], sizes = [8, 16], strides = [1, 1]} : vector<64x16xf32> to vector<8x16xf32>
    %246 = vector.extract_strided_slice %233 {offsets = [0, 16], sizes = [16, 8], strides = [1, 1]} : vector<16x32xf32> to vector<16x8xf32>
    %cst_108 = arith.constant dense<0.000000e+00> : vector<8x8xf32>
    %247 = tpu.matmul %245, %246, %cst_108 {dimension_numbers = #tpu.dot_dimension_numbers<[1], [0], [0], [1], [0, 0, 1, 1], [], []>} : vector<8x16xf32>, vector<16x8xf32>, vector<8x8xf32> -> vector<8x8xf32>
    %248 = vector.extract_strided_slice %167 {offsets = [16, 0], sizes = [8, 32], strides = [1, 1]} : vector<32x32xf32> to vector<8x32xf32>
    %cst_109 = arith.constant dense<0.000000e+00> : vector<8x32xf32>
    %249 = tpu.matmul %247, %248, %cst_109 {dimension_numbers = #tpu.dot_dimension_numbers<[1], [0], [0], [1], [0, 0, 1, 1], [], []>} : vector<8x8xf32>, vector<8x32xf32>, vector<8x32xf32> -> vector<8x32xf32>
    %250 = arith.addf %244, %249 : vector<8x32xf32>
    %251 = vector.extract_strided_slice %208 {offsets = [56, 0], sizes = [8, 16], strides = [1, 1]} : vector<64x16xf32> to vector<8x16xf32>
    %252 = vector.extract_strided_slice %233 {offsets = [0, 24], sizes = [16, 8], strides = [1, 1]} : vector<16x32xf32> to vector<16x8xf32>
    %cst_110 = arith.constant dense<0.000000e+00> : vector<8x8xf32>
    %253 = tpu.matmul %251, %252, %cst_110 {dimension_numbers = #tpu.dot_dimension_numbers<[1], [0], [0], [1], [0, 0, 1, 1], [], []>} : vector<8x16xf32>, vector<16x8xf32>, vector<8x8xf32> -> vector<8x8xf32>
    %254 = vector.extract_strided_slice %167 {offsets = [24, 0], sizes = [8, 32], strides = [1, 1]} : vector<32x32xf32> to vector<8x32xf32>
    %cst_111 = arith.constant dense<0.000000e+00> : vector<8x32xf32>
    %255 = tpu.matmul %253, %254, %cst_111 {dimension_numbers = #tpu.dot_dimension_numbers<[1], [0], [0], [1], [0, 0, 1, 1], [], []>} : vector<8x8xf32>, vector<8x32xf32>, vector<8x32xf32> -> vector<8x32xf32>
    %256 = arith.addf %250, %255 : vector<8x32xf32>
    %257 = tpu.concatenate %232, %256 in 0 : vector<8x32xf32>, vector<8x32xf32> -> vector<16x32xf32>
    %258 = vector.broadcast %169 : vector<1x32xf32> to vector<16x32xf32>
    %259 = arith.addf %257, %258 : vector<16x32xf32>
    %260 = arith.addf %143, %259 : vector<16x32xf32>
    %c0_112 = arith.constant 0 : index
    %c0_113 = arith.constant 0 : index
    %c1408 = arith.constant 1408 : index
    %261 = vector.load %arg6[%c0_112, %c0_113, %c1408] : memref<2x1x1920xf32, #tpu.memory_space<vmem>>, vector<1x1x32xf32>
    %262 = vector.shape_cast %261 : vector<1x1x32xf32> to vector<1x32xf32>
    %c0_114 = arith.constant 0 : index
    %c0_115 = arith.constant 0 : index
    %c1536 = arith.constant 1536 : index
    %263 = vector.load %arg6[%c0_114, %c0_115, %c1536] : memref<2x1x1920xf32, #tpu.memory_space<vmem>>, vector<1x1x32xf32>
    %264 = vector.shape_cast %263 : vector<1x1x32xf32> to vector<1x32xf32>
    %cst_116 = arith.constant dense<0.000000e+00> : vector<16xf32>
    %265 = vector.multi_reduction <add>, %260, %cst_116 [1] : vector<16x32xf32> to vector<16xf32>
    %266 = vector.shape_cast %265 : vector<16xf32> to vector<16x1xf32>
    %cst_117 = arith.constant 3.200000e+01 : f32
    %267 = vector.broadcast %cst_117 : f32 to vector<16x1xf32>
    %268 = arith.divf %266, %267 : vector<16x1xf32>
    %269 = vector.broadcast %268 : vector<16x1xf32> to vector<16x32xf32>
    %270 = arith.subf %260, %269 : vector<16x32xf32>
    %271 = arith.mulf %270, %270 : vector<16x32xf32>
    %cst_118 = arith.constant dense<0.000000e+00> : vector<16xf32>
    %272 = vector.multi_reduction <add>, %271, %cst_118 [1] : vector<16x32xf32> to vector<16xf32>
    %273 = vector.shape_cast %272 : vector<16xf32> to vector<16x1xf32>
    %cst_119 = arith.constant 3.200000e+01 : f32
    %274 = vector.broadcast %cst_119 : f32 to vector<16x1xf32>
    %275 = arith.divf %273, %274 : vector<16x1xf32>
    %276 = vector.broadcast %268 : vector<16x1xf32> to vector<16x32xf32>
    %277 = arith.subf %260, %276 : vector<16x32xf32>
    %cst_120 = arith.constant 9.99999974E-6 : f32
    %278 = vector.broadcast %cst_120 : f32 to vector<16x1xf32>
    %279 = arith.addf %275, %278 : vector<16x1xf32>
    %280 = math.rsqrt %279 : vector<16x1xf32>
    %281 = vector.broadcast %280 : vector<16x1xf32> to vector<16x32xf32>
    %282 = arith.mulf %277, %281 : vector<16x32xf32>
    %283 = vector.broadcast %262 : vector<1x32xf32> to vector<16x32xf32>
    %284 = arith.mulf %282, %283 : vector<16x32xf32>
    %285 = vector.broadcast %264 : vector<1x32xf32> to vector<16x32xf32>
    %286 = arith.addf %284, %285 : vector<16x32xf32>
    %c0_121 = arith.constant 0 : index
    %c0_122 = arith.constant 0 : index
    %c896 = arith.constant 896 : index
    %287 = vector.load %arg4[%c0_121, %c0_122, %c896] : memref<2x32x1024xf32, #tpu.memory_space<vmem>>, vector<1x32x64xf32>
    %288 = vector.shape_cast %287 : vector<1x32x64xf32> to vector<32x64xf32>
    %cst_123 = arith.constant dense<0.000000e+00> : vector<16x64xf32>
    %289 = tpu.matmul %286, %288, %cst_123 {dimension_numbers = #tpu.dot_dimension_numbers<[1], [0], [0], [1], [0, 0, 1, 1], [], []>} : vector<16x32xf32>, vector<32x64xf32>, vector<16x64xf32> -> vector<16x64xf32>
    %c0_124 = arith.constant 0 : index
    %c0_125 = arith.constant 0 : index
    %c896_126 = arith.constant 896 : index
    %290 = vector.load %arg6[%c0_124, %c0_125, %c896_126] : memref<2x1x1920xf32, #tpu.memory_space<vmem>>, vector<1x1x64xf32>
    %291 = vector.shape_cast %290 : vector<1x1x64xf32> to vector<1x64xf32>
    %292 = vector.broadcast %291 : vector<1x64xf32> to vector<16x64xf32>
    %293 = arith.addf %289, %292 : vector<16x64xf32>
    %cst_127 = arith.constant 0.000000e+00 : f32
    %294 = vector.broadcast %cst_127 : f32 to vector<16x64xf32>
    %295 = arith.maximumf %293, %294 : vector<16x64xf32>
    %c0_128 = arith.constant 0 : index
    %c0_129 = arith.constant 0 : index
    %c0_130 = arith.constant 0 : index
    %296 = vector.load %arg5[%c0_128, %c0_129, %c0_130] : memref<2x64x32xf32, #tpu.memory_space<vmem>>, vector<1x64x32xf32>
    %297 = vector.shape_cast %296 : vector<1x64x32xf32> to vector<64x32xf32>
    %cst_131 = arith.constant dense<0.000000e+00> : vector<16x32xf32>
    %298 = tpu.matmul %295, %297, %cst_131 {dimension_numbers = #tpu.dot_dimension_numbers<[1], [0], [0], [1], [0, 0, 1, 1], [], []>} : vector<16x64xf32>, vector<64x32xf32>, vector<16x32xf32> -> vector<16x32xf32>
    %c0_132 = arith.constant 0 : index
    %c0_133 = arith.constant 0 : index
    %c1024 = arith.constant 1024 : index
    %299 = vector.load %arg6[%c0_132, %c0_133, %c1024] : memref<2x1x1920xf32, #tpu.memory_space<vmem>>, vector<1x1x32xf32>
    %300 = vector.shape_cast %299 : vector<1x1x32xf32> to vector<1x32xf32>
    %301 = vector.broadcast %300 : vector<1x32xf32> to vector<16x32xf32>
    %302 = arith.addf %298, %301 : vector<16x32xf32>
    %303 = arith.addf %286, %302 : vector<16x32xf32>
    %c0_134 = arith.constant 0 : index
    %c0_135 = arith.constant 0 : index
    %c1664 = arith.constant 1664 : index
    %304 = vector.load %arg6[%c0_134, %c0_135, %c1664] : memref<2x1x1920xf32, #tpu.memory_space<vmem>>, vector<1x1x32xf32>
    %305 = vector.shape_cast %304 : vector<1x1x32xf32> to vector<1x32xf32>
    %c0_136 = arith.constant 0 : index
    %c0_137 = arith.constant 0 : index
    %c1792 = arith.constant 1792 : index
    %306 = vector.load %arg6[%c0_136, %c0_137, %c1792] : memref<2x1x1920xf32, #tpu.memory_space<vmem>>, vector<1x1x32xf32>
    %307 = vector.shape_cast %306 : vector<1x1x32xf32> to vector<1x32xf32>
    %cst_138 = arith.constant dense<0.000000e+00> : vector<16xf32>
    %308 = vector.multi_reduction <add>, %303, %cst_138 [1] : vector<16x32xf32> to vector<16xf32>
    %309 = vector.shape_cast %308 : vector<16xf32> to vector<16x1xf32>
    %cst_139 = arith.constant 3.200000e+01 : f32
    %310 = vector.broadcast %cst_139 : f32 to vector<16x1xf32>
    %311 = arith.divf %309, %310 : vector<16x1xf32>
    %312 = vector.broadcast %311 : vector<16x1xf32> to vector<16x32xf32>
    %313 = arith.subf %303, %312 : vector<16x32xf32>
    %314 = arith.mulf %313, %313 : vector<16x32xf32>
    %cst_140 = arith.constant dense<0.000000e+00> : vector<16xf32>
    %315 = vector.multi_reduction <add>, %314, %cst_140 [1] : vector<16x32xf32> to vector<16xf32>
    %316 = vector.shape_cast %315 : vector<16xf32> to vector<16x1xf32>
    %cst_141 = arith.constant 3.200000e+01 : f32
    %317 = vector.broadcast %cst_141 : f32 to vector<16x1xf32>
    %318 = arith.divf %316, %317 : vector<16x1xf32>
    %319 = vector.broadcast %311 : vector<16x1xf32> to vector<16x32xf32>
    %320 = arith.subf %303, %319 : vector<16x32xf32>
    %cst_142 = arith.constant 9.99999974E-6 : f32
    %321 = vector.broadcast %cst_142 : f32 to vector<16x1xf32>
    %322 = arith.addf %318, %321 : vector<16x1xf32>
    %323 = math.rsqrt %322 : vector<16x1xf32>
    %324 = vector.broadcast %323 : vector<16x1xf32> to vector<16x32xf32>
    %325 = arith.mulf %320, %324 : vector<16x32xf32>
    %326 = vector.broadcast %305 : vector<1x32xf32> to vector<16x32xf32>
    %327 = arith.mulf %325, %326 : vector<16x32xf32>
    %328 = vector.broadcast %307 : vector<1x32xf32> to vector<16x32xf32>
    %329 = arith.addf %327, %328 : vector<16x32xf32>
    %cst_143 = arith.constant dense<0.000000e+00> : vector<16xf32>
    %330 = vector.multi_reduction <add>, %329, %cst_143 [1] : vector<16x32xf32> to vector<16xf32>
    %331 = vector.shape_cast %330 : vector<16xf32> to vector<16x1xf32>
    %cst_144 = arith.constant 3.200000e+01 : f32
    %332 = vector.broadcast %cst_144 : f32 to vector<16x1xf32>
    %333 = arith.divf %331, %332 : vector<16x1xf32>
    %334 = vector.broadcast %333 : vector<16x1xf32> to vector<16x32xf32>
    %335 = arith.subf %329, %334 : vector<16x32xf32>
    %336 = arith.mulf %335, %335 : vector<16x32xf32>
    %cst_145 = arith.constant dense<0.000000e+00> : vector<16xf32>
    %337 = vector.multi_reduction <add>, %336, %cst_145 [1] : vector<16x32xf32> to vector<16xf32>
    %338 = vector.shape_cast %337 : vector<16xf32> to vector<16x1xf32>
    %cst_146 = arith.constant 3.200000e+01 : f32
    %339 = vector.broadcast %cst_146 : f32 to vector<16x1xf32>
    %340 = arith.divf %338, %339 : vector<16x1xf32>
    %341 = vector.broadcast %333 : vector<16x1xf32> to vector<16x32xf32>
    %342 = arith.subf %329, %341 : vector<16x32xf32>
    %cst_147 = arith.constant 9.99999974E-6 : f32
    %343 = vector.broadcast %cst_147 : f32 to vector<16x1xf32>
    %344 = arith.addf %340, %343 : vector<16x1xf32>
    %345 = math.rsqrt %344 : vector<16x1xf32>
    %346 = vector.broadcast %345 : vector<16x1xf32> to vector<16x32xf32>
    %347 = arith.mulf %342, %346 : vector<16x32xf32>
    %348 = vector.broadcast %4 : vector<1x32xf32> to vector<16x32xf32>
    %349 = arith.mulf %347, %348 : vector<16x32xf32>
    %350 = vector.broadcast %5 : vector<1x32xf32> to vector<16x32xf32>
    %351 = arith.addf %349, %350 : vector<16x32xf32>
    %c0_148 = arith.constant 0 : index
    %c0_149 = arith.constant 0 : index
    %c0_150 = arith.constant 0 : index
    %352 = vector.load %arg8[%c0_148, %c0_149, %c0_150] : memref<2x16x32xf32, #tpu.memory_space<vmem>>, vector<1x16x32xf32>
    %353 = vector.shape_cast %352 : vector<1x16x32xf32> to vector<16x32xf32>
    %354 = vector.shape_cast %351 : vector<16x32xf32> to vector<1x16x32xf32>
    tpu.vector_store %arg8[%c0_148, %c0_149, %c0_150], %354 {strides = array<i32>} : memref<2x16x32xf32, #tpu.memory_space<vmem>>, vector<1x16x32xf32>,
    %355 = arith.addf %329, %1 : vector<16x32xf32>
    %c1 = arith.constant 1 : index
    %c0_151 = arith.constant 0 : index
    %c0_152 = arith.constant 0 : index
    %356 = vector.load %arg4[%c1, %c0_151, %c0_152] : memref<2x32x1024xf32, #tpu.memory_space<vmem>>, vector<1x32x64xf32>
    %357 = vector.shape_cast %356 : vector<1x32x64xf32> to vector<32x64xf32>
    %cst_153 = arith.constant dense<0.000000e+00> : vector<16x64xf32>
    %358 = tpu.matmul %355, %357, %cst_153 {dimension_numbers = #tpu.dot_dimension_numbers<[1], [0], [0], [1], [0, 0, 1, 1], [], []>} : vector<16x32xf32>, vector<32x64xf32>, vector<16x64xf32> -> vector<16x64xf32>
    %c1_154 = arith.constant 1 : index
    %c0_155 = arith.constant 0 : index
    %c0_156 = arith.constant 0 : index
    %359 = vector.load %arg6[%c1_154, %c0_155, %c0_156] : memref<2x1x1920xf32, #tpu.memory_space<vmem>>, vector<1x1x64xf32>
    %360 = vector.shape_cast %359 : vector<1x1x64xf32> to vector<1x64xf32>
    %361 = vector.broadcast %360 : vector<1x64xf32> to vector<16x64xf32>
    %362 = arith.addf %358, %361 : vector<16x64xf32>
    %c1_157 = arith.constant 1 : index
    %c0_158 = arith.constant 0 : index
    %c128_159 = arith.constant 128 : index
    %363 = vector.load %arg4[%c1_157, %c0_158, %c128_159] : memref<2x32x1024xf32, #tpu.memory_space<vmem>>, vector<1x32x32xf32>
    %364 = vector.shape_cast %363 : vector<1x32x32xf32> to vector<32x32xf32>
    %cst_160 = arith.constant dense<0.000000e+00> : vector<16x32xf32>
    %365 = tpu.matmul %329, %364, %cst_160 {dimension_numbers = #tpu.dot_dimension_numbers<[1], [0], [0], [1], [0, 0, 1, 1], [], []>} : vector<16x32xf32>, vector<32x32xf32>, vector<16x32xf32> -> vector<16x32xf32>
    %c1_161 = arith.constant 1 : index
    %c0_162 = arith.constant 0 : index
    %c128_163 = arith.constant 128 : index
    %366 = vector.load %arg6[%c1_161, %c0_162, %c128_163] : memref<2x1x1920xf32, #tpu.memory_space<vmem>>, vector<1x1x32xf32>
    %367 = vector.shape_cast %366 : vector<1x1x32xf32> to vector<1x32xf32>
    %368 = vector.broadcast %367 : vector<1x32xf32> to vector<16x32xf32>
    %369 = arith.addf %365, %368 : vector<16x32xf32>
    %370 = vector.extract_strided_slice %362 {offsets = [0, 0], sizes = [16, 32], strides = [1, 1]} : vector<16x64xf32> to vector<16x32xf32>
    %371 = vector.extract_strided_slice %362 {offsets = [0, 32], sizes = [16, 32], strides = [1, 1]} : vector<16x64xf32> to vector<16x32xf32>
    %c1_164 = arith.constant 1 : index
    %c0_165 = arith.constant 0 : index
    %c256_166 = arith.constant 256 : index
    %372 = vector.load %arg4[%c1_164, %c0_165, %c256_166] : memref<2x32x1024xf32, #tpu.memory_space<vmem>>, vector<1x32x32xf32>
    %373 = vector.shape_cast %372 : vector<1x32x32xf32> to vector<32x32xf32>
    %c1_167 = arith.constant 1 : index
    %c0_168 = arith.constant 0 : index
    %c256_169 = arith.constant 256 : index
    %374 = vector.load %arg6[%c1_167, %c0_168, %c256_169] : memref<2x1x1920xf32, #tpu.memory_space<vmem>>, vector<1x1x32xf32>
    %375 = vector.shape_cast %374 : vector<1x1x32xf32> to vector<1x32xf32>
    %376 = vector.extract_strided_slice %370 {offsets = [0, 0], sizes = [8, 32], strides = [1, 1]} : vector<16x32xf32> to vector<8x32xf32>
    %377 = vector.extract_strided_slice %371 {offsets = [0, 0], sizes = [8, 32], strides = [1, 1]} : vector<16x32xf32> to vector<8x32xf32>
    %378 = vector.extract_strided_slice %376 {offsets = [0, 0], sizes = [8, 8], strides = [1, 1]} : vector<8x32xf32> to vector<8x8xf32>
    %379 = vector.extract_strided_slice %377 {offsets = [0, 0], sizes = [8, 8], strides = [1, 1]} : vector<8x32xf32> to vector<8x8xf32>
    %cst_170 = arith.constant dense<0.000000e+00> : vector<8x8xf32>
    %380 = tpu.matmul %378, %379, %cst_170 {dimension_numbers = #tpu.dot_dimension_numbers<[1], [1], [0], [0], [0, 0, 1, 0], [], []>} : vector<8x8xf32>, vector<8x8xf32>, vector<8x8xf32> -> vector<8x8xf32>
    %381 = vector.extract_strided_slice %376 {offsets = [0, 8], sizes = [8, 8], strides = [1, 1]} : vector<8x32xf32> to vector<8x8xf32>
    %382 = vector.extract_strided_slice %377 {offsets = [0, 8], sizes = [8, 8], strides = [1, 1]} : vector<8x32xf32> to vector<8x8xf32>
    %cst_171 = arith.constant dense<0.000000e+00> : vector<8x8xf32>
    %383 = tpu.matmul %381, %382, %cst_171 {dimension_numbers = #tpu.dot_dimension_numbers<[1], [1], [0], [0], [0, 0, 1, 0], [], []>} : vector<8x8xf32>, vector<8x8xf32>, vector<8x8xf32> -> vector<8x8xf32>
    %384 = vector.extract_strided_slice %376 {offsets = [0, 16], sizes = [8, 8], strides = [1, 1]} : vector<8x32xf32> to vector<8x8xf32>
    %385 = vector.extract_strided_slice %377 {offsets = [0, 16], sizes = [8, 8], strides = [1, 1]} : vector<8x32xf32> to vector<8x8xf32>
    %cst_172 = arith.constant dense<0.000000e+00> : vector<8x8xf32>
    %386 = tpu.matmul %384, %385, %cst_172 {dimension_numbers = #tpu.dot_dimension_numbers<[1], [1], [0], [0], [0, 0, 1, 0], [], []>} : vector<8x8xf32>, vector<8x8xf32>, vector<8x8xf32> -> vector<8x8xf32>
    %387 = vector.extract_strided_slice %376 {offsets = [0, 24], sizes = [8, 8], strides = [1, 1]} : vector<8x32xf32> to vector<8x8xf32>
    %388 = vector.extract_strided_slice %377 {offsets = [0, 24], sizes = [8, 8], strides = [1, 1]} : vector<8x32xf32> to vector<8x8xf32>
    %cst_173 = arith.constant dense<0.000000e+00> : vector<8x8xf32>
    %389 = tpu.matmul %387, %388, %cst_173 {dimension_numbers = #tpu.dot_dimension_numbers<[1], [1], [0], [0], [0, 0, 1, 0], [], []>} : vector<8x8xf32>, vector<8x8xf32>, vector<8x8xf32> -> vector<8x8xf32>
    %390 = vector.extract_strided_slice %370 {offsets = [8, 0], sizes = [8, 32], strides = [1, 1]} : vector<16x32xf32> to vector<8x32xf32>
    %391 = vector.extract_strided_slice %371 {offsets = [8, 0], sizes = [8, 32], strides = [1, 1]} : vector<16x32xf32> to vector<8x32xf32>
    %392 = vector.extract_strided_slice %390 {offsets = [0, 0], sizes = [8, 8], strides = [1, 1]} : vector<8x32xf32> to vector<8x8xf32>
    %393 = vector.extract_strided_slice %391 {offsets = [0, 0], sizes = [8, 8], strides = [1, 1]} : vector<8x32xf32> to vector<8x8xf32>
    %cst_174 = arith.constant dense<0.000000e+00> : vector<8x8xf32>
    %394 = tpu.matmul %392, %393, %cst_174 {dimension_numbers = #tpu.dot_dimension_numbers<[1], [1], [0], [0], [0, 0, 1, 0], [], []>} : vector<8x8xf32>, vector<8x8xf32>, vector<8x8xf32> -> vector<8x8xf32>
    %395 = vector.extract_strided_slice %390 {offsets = [0, 8], sizes = [8, 8], strides = [1, 1]} : vector<8x32xf32> to vector<8x8xf32>
    %396 = vector.extract_strided_slice %391 {offsets = [0, 8], sizes = [8, 8], strides = [1, 1]} : vector<8x32xf32> to vector<8x8xf32>
    %cst_175 = arith.constant dense<0.000000e+00> : vector<8x8xf32>
    %397 = tpu.matmul %395, %396, %cst_175 {dimension_numbers = #tpu.dot_dimension_numbers<[1], [1], [0], [0], [0, 0, 1, 0], [], []>} : vector<8x8xf32>, vector<8x8xf32>, vector<8x8xf32> -> vector<8x8xf32>
    %398 = vector.extract_strided_slice %390 {offsets = [0, 16], sizes = [8, 8], strides = [1, 1]} : vector<8x32xf32> to vector<8x8xf32>
    %399 = vector.extract_strided_slice %391 {offsets = [0, 16], sizes = [8, 8], strides = [1, 1]} : vector<8x32xf32> to vector<8x8xf32>
    %cst_176 = arith.constant dense<0.000000e+00> : vector<8x8xf32>
    %400 = tpu.matmul %398, %399, %cst_176 {dimension_numbers = #tpu.dot_dimension_numbers<[1], [1], [0], [0], [0, 0, 1, 0], [], []>} : vector<8x8xf32>, vector<8x8xf32>, vector<8x8xf32> -> vector<8x8xf32>
    %401 = vector.extract_strided_slice %390 {offsets = [0, 24], sizes = [8, 8], strides = [1, 1]} : vector<8x32xf32> to vector<8x8xf32>
    %402 = vector.extract_strided_slice %391 {offsets = [0, 24], sizes = [8, 8], strides = [1, 1]} : vector<8x32xf32> to vector<8x8xf32>
    %cst_177 = arith.constant dense<0.000000e+00> : vector<8x8xf32>
    %403 = tpu.matmul %401, %402, %cst_177 {dimension_numbers = #tpu.dot_dimension_numbers<[1], [1], [0], [0], [0, 0, 1, 0], [], []>} : vector<8x8xf32>, vector<8x8xf32>, vector<8x8xf32> -> vector<8x8xf32>
    %404 = tpu.concatenate %380, %383, %386, %389, %394, %397, %400, %403 in 0 : vector<8x8xf32>, vector<8x8xf32>, vector<8x8xf32>, vector<8x8xf32>, vector<8x8xf32>, vector<8x8xf32>, vector<8x8xf32>, vector<8x8xf32> -> vector<64x8xf32>
    %cst_178 = arith.constant dense<0xFF800000> : vector<64xf32>
    %405 = vector.multi_reduction <maximumf>, %404, %cst_178 [1] : vector<64x8xf32> to vector<64xf32>
    %406 = vector.shape_cast %405 : vector<64xf32> to vector<64x1xf32>
    %407 = vector.broadcast %406 : vector<64x1xf32> to vector<64x8xf32>
    %408 = arith.subf %404, %407 : vector<64x8xf32>
    %409 = math.exp %408 : vector<64x8xf32>
    %cst_179 = arith.constant dense<0.000000e+00> : vector<64xf32>
    %410 = vector.multi_reduction <add>, %409, %cst_179 [1] : vector<64x8xf32> to vector<64xf32>
    %411 = vector.shape_cast %410 : vector<64xf32> to vector<64x1xf32>
    %412 = tpu.reciprocal %411 {approx = true} : vector<64x1xf32> -> vector<64x1xf32>
    %413 = vector.broadcast %412 : vector<64x1xf32> to vector<64x8xf32>
    %414 = arith.mulf %409, %413 : vector<64x8xf32>
    %415 = vector.extract_strided_slice %369 {offsets = [0, 0], sizes = [8, 32], strides = [1, 1]} : vector<16x32xf32> to vector<8x32xf32>
    %416 = vector.extract_strided_slice %414 {offsets = [0, 0], sizes = [8, 8], strides = [1, 1]} : vector<64x8xf32> to vector<8x8xf32>
    %417 = vector.extract_strided_slice %415 {offsets = [0, 0], sizes = [8, 8], strides = [1, 1]} : vector<8x32xf32> to vector<8x8xf32>
    %cst_180 = arith.constant dense<0.000000e+00> : vector<8x8xf32>
    %418 = tpu.matmul %416, %417, %cst_180 {dimension_numbers = #tpu.dot_dimension_numbers<[1], [0], [0], [1], [0, 0, 1, 1], [], []>} : vector<8x8xf32>, vector<8x8xf32>, vector<8x8xf32> -> vector<8x8xf32>
    %419 = vector.extract_strided_slice %373 {offsets = [0, 0], sizes = [8, 32], strides = [1, 1]} : vector<32x32xf32> to vector<8x32xf32>
    %cst_181 = arith.constant dense<0.000000e+00> : vector<8x32xf32>
    %420 = tpu.matmul %418, %419, %cst_181 {dimension_numbers = #tpu.dot_dimension_numbers<[1], [0], [0], [1], [0, 0, 1, 1], [], []>} : vector<8x8xf32>, vector<8x32xf32>, vector<8x32xf32> -> vector<8x32xf32>
    %421 = vector.extract_strided_slice %414 {offsets = [8, 0], sizes = [8, 8], strides = [1, 1]} : vector<64x8xf32> to vector<8x8xf32>
    %422 = vector.extract_strided_slice %415 {offsets = [0, 8], sizes = [8, 8], strides = [1, 1]} : vector<8x32xf32> to vector<8x8xf32>
    %cst_182 = arith.constant dense<0.000000e+00> : vector<8x8xf32>
    %423 = tpu.matmul %421, %422, %cst_182 {dimension_numbers = #tpu.dot_dimension_numbers<[1], [0], [0], [1], [0, 0, 1, 1], [], []>} : vector<8x8xf32>, vector<8x8xf32>, vector<8x8xf32> -> vector<8x8xf32>
    %424 = vector.extract_strided_slice %373 {offsets = [8, 0], sizes = [8, 32], strides = [1, 1]} : vector<32x32xf32> to vector<8x32xf32>
    %cst_183 = arith.constant dense<0.000000e+00> : vector<8x32xf32>
    %425 = tpu.matmul %423, %424, %cst_183 {dimension_numbers = #tpu.dot_dimension_numbers<[1], [0], [0], [1], [0, 0, 1, 1], [], []>} : vector<8x8xf32>, vector<8x32xf32>, vector<8x32xf32> -> vector<8x32xf32>
    %426 = arith.addf %420, %425 : vector<8x32xf32>
    %427 = vector.extract_strided_slice %414 {offsets = [16, 0], sizes = [8, 8], strides = [1, 1]} : vector<64x8xf32> to vector<8x8xf32>
    %428 = vector.extract_strided_slice %415 {offsets = [0, 16], sizes = [8, 8], strides = [1, 1]} : vector<8x32xf32> to vector<8x8xf32>
    %cst_184 = arith.constant dense<0.000000e+00> : vector<8x8xf32>
    %429 = tpu.matmul %427, %428, %cst_184 {dimension_numbers = #tpu.dot_dimension_numbers<[1], [0], [0], [1], [0, 0, 1, 1], [], []>} : vector<8x8xf32>, vector<8x8xf32>, vector<8x8xf32> -> vector<8x8xf32>
    %430 = vector.extract_strided_slice %373 {offsets = [16, 0], sizes = [8, 32], strides = [1, 1]} : vector<32x32xf32> to vector<8x32xf32>
    %cst_185 = arith.constant dense<0.000000e+00> : vector<8x32xf32>
    %431 = tpu.matmul %429, %430, %cst_185 {dimension_numbers = #tpu.dot_dimension_numbers<[1], [0], [0], [1], [0, 0, 1, 1], [], []>} : vector<8x8xf32>, vector<8x32xf32>, vector<8x32xf32> -> vector<8x32xf32>
    %432 = arith.addf %426, %431 : vector<8x32xf32>
    %433 = vector.extract_strided_slice %414 {offsets = [24, 0], sizes = [8, 8], strides = [1, 1]} : vector<64x8xf32> to vector<8x8xf32>
    %434 = vector.extract_strided_slice %415 {offsets = [0, 24], sizes = [8, 8], strides = [1, 1]} : vector<8x32xf32> to vector<8x8xf32>
    %cst_186 = arith.constant dense<0.000000e+00> : vector<8x8xf32>
    %435 = tpu.matmul %433, %434, %cst_186 {dimension_numbers = #tpu.dot_dimension_numbers<[1], [0], [0], [1], [0, 0, 1, 1], [], []>} : vector<8x8xf32>, vector<8x8xf32>, vector<8x8xf32> -> vector<8x8xf32>
    %436 = vector.extract_strided_slice %373 {offsets = [24, 0], sizes = [8, 32], strides = [1, 1]} : vector<32x32xf32> to vector<8x32xf32>
    %cst_187 = arith.constant dense<0.000000e+00> : vector<8x32xf32>
    %437 = tpu.matmul %435, %436, %cst_187 {dimension_numbers = #tpu.dot_dimension_numbers<[1], [0], [0], [1], [0, 0, 1, 1], [], []>} : vector<8x8xf32>, vector<8x32xf32>, vector<8x32xf32> -> vector<8x32xf32>
    %438 = arith.addf %432, %437 : vector<8x32xf32>
    %439 = vector.extract_strided_slice %369 {offsets = [8, 0], sizes = [8, 32], strides = [1, 1]} : vector<16x32xf32> to vector<8x32xf32>
    %440 = vector.extract_strided_slice %414 {offsets = [32, 0], sizes = [8, 8], strides = [1, 1]} : vector<64x8xf32> to vector<8x8xf32>
    %441 = vector.extract_strided_slice %439 {offsets = [0, 0], sizes = [8, 8], strides = [1, 1]} : vector<8x32xf32> to vector<8x8xf32>
    %cst_188 = arith.constant dense<0.000000e+00> : vector<8x8xf32>
    %442 = tpu.matmul %440, %441, %cst_188 {dimension_numbers = #tpu.dot_dimension_numbers<[1], [0], [0], [1], [0, 0, 1, 1], [], []>} : vector<8x8xf32>, vector<8x8xf32>, vector<8x8xf32> -> vector<8x8xf32>
    %443 = vector.extract_strided_slice %373 {offsets = [0, 0], sizes = [8, 32], strides = [1, 1]} : vector<32x32xf32> to vector<8x32xf32>
    %cst_189 = arith.constant dense<0.000000e+00> : vector<8x32xf32>
    %444 = tpu.matmul %442, %443, %cst_189 {dimension_numbers = #tpu.dot_dimension_numbers<[1], [0], [0], [1], [0, 0, 1, 1], [], []>} : vector<8x8xf32>, vector<8x32xf32>, vector<8x32xf32> -> vector<8x32xf32>
    %445 = vector.extract_strided_slice %414 {offsets = [40, 0], sizes = [8, 8], strides = [1, 1]} : vector<64x8xf32> to vector<8x8xf32>
    %446 = vector.extract_strided_slice %439 {offsets = [0, 8], sizes = [8, 8], strides = [1, 1]} : vector<8x32xf32> to vector<8x8xf32>
    %cst_190 = arith.constant dense<0.000000e+00> : vector<8x8xf32>
    %447 = tpu.matmul %445, %446, %cst_190 {dimension_numbers = #tpu.dot_dimension_numbers<[1], [0], [0], [1], [0, 0, 1, 1], [], []>} : vector<8x8xf32>, vector<8x8xf32>, vector<8x8xf32> -> vector<8x8xf32>
    %448 = vector.extract_strided_slice %373 {offsets = [8, 0], sizes = [8, 32], strides = [1, 1]} : vector<32x32xf32> to vector<8x32xf32>
    %cst_191 = arith.constant dense<0.000000e+00> : vector<8x32xf32>
    %449 = tpu.matmul %447, %448, %cst_191 {dimension_numbers = #tpu.dot_dimension_numbers<[1], [0], [0], [1], [0, 0, 1, 1], [], []>} : vector<8x8xf32>, vector<8x32xf32>, vector<8x32xf32> -> vector<8x32xf32>
    %450 = arith.addf %444, %449 : vector<8x32xf32>
    %451 = vector.extract_strided_slice %414 {offsets = [48, 0], sizes = [8, 8], strides = [1, 1]} : vector<64x8xf32> to vector<8x8xf32>
    %452 = vector.extract_strided_slice %439 {offsets = [0, 16], sizes = [8, 8], strides = [1, 1]} : vector<8x32xf32> to vector<8x8xf32>
    %cst_192 = arith.constant dense<0.000000e+00> : vector<8x8xf32>
    %453 = tpu.matmul %451, %452, %cst_192 {dimension_numbers = #tpu.dot_dimension_numbers<[1], [0], [0], [1], [0, 0, 1, 1], [], []>} : vector<8x8xf32>, vector<8x8xf32>, vector<8x8xf32> -> vector<8x8xf32>
    %454 = vector.extract_strided_slice %373 {offsets = [16, 0], sizes = [8, 32], strides = [1, 1]} : vector<32x32xf32> to vector<8x32xf32>
    %cst_193 = arith.constant dense<0.000000e+00> : vector<8x32xf32>
    %455 = tpu.matmul %453, %454, %cst_193 {dimension_numbers = #tpu.dot_dimension_numbers<[1], [0], [0], [1], [0, 0, 1, 1], [], []>} : vector<8x8xf32>, vector<8x32xf32>, vector<8x32xf32> -> vector<8x32xf32>
    %456 = arith.addf %450, %455 : vector<8x32xf32>
    %457 = vector.extract_strided_slice %414 {offsets = [56, 0], sizes = [8, 8], strides = [1, 1]} : vector<64x8xf32> to vector<8x8xf32>
    %458 = vector.extract_strided_slice %439 {offsets = [0, 24], sizes = [8, 8], strides = [1, 1]} : vector<8x32xf32> to vector<8x8xf32>
    %cst_194 = arith.constant dense<0.000000e+00> : vector<8x8xf32>
    %459 = tpu.matmul %457, %458, %cst_194 {dimension_numbers = #tpu.dot_dimension_numbers<[1], [0], [0], [1], [0, 0, 1, 1], [], []>} : vector<8x8xf32>, vector<8x8xf32>, vector<8x8xf32> -> vector<8x8xf32>
    %460 = vector.extract_strided_slice %373 {offsets = [24, 0], sizes = [8, 32], strides = [1, 1]} : vector<32x32xf32> to vector<8x32xf32>
    %cst_195 = arith.constant dense<0.000000e+00> : vector<8x32xf32>
    %461 = tpu.matmul %459, %460, %cst_195 {dimension_numbers = #tpu.dot_dimension_numbers<[1], [0], [0], [1], [0, 0, 1, 1], [], []>} : vector<8x8xf32>, vector<8x32xf32>, vector<8x32xf32> -> vector<8x32xf32>
    %462 = arith.addf %456, %461 : vector<8x32xf32>
    %463 = tpu.concatenate %438, %462 in 0 : vector<8x32xf32>, vector<8x32xf32> -> vector<16x32xf32>
    %464 = vector.broadcast %375 : vector<1x32xf32> to vector<16x32xf32>
    %465 = arith.addf %463, %464 : vector<16x32xf32>
    %466 = arith.addf %329, %465 : vector<16x32xf32>
    %c1_196 = arith.constant 1 : index
    %c0_197 = arith.constant 0 : index
    %c1152_198 = arith.constant 1152 : index
    %467 = vector.load %arg6[%c1_196, %c0_197, %c1152_198] : memref<2x1x1920xf32, #tpu.memory_space<vmem>>, vector<1x1x32xf32>
    %468 = vector.shape_cast %467 : vector<1x1x32xf32> to vector<1x32xf32>
    %c1_199 = arith.constant 1 : index
    %c0_200 = arith.constant 0 : index
    %c1280_201 = arith.constant 1280 : index
    %469 = vector.load %arg6[%c1_199, %c0_200, %c1280_201] : memref<2x1x1920xf32, #tpu.memory_space<vmem>>, vector<1x1x32xf32>
    %470 = vector.shape_cast %469 : vector<1x1x32xf32> to vector<1x32xf32>
    %cst_202 = arith.constant dense<0.000000e+00> : vector<16xf32>
    %471 = vector.multi_reduction <add>, %466, %cst_202 [1] : vector<16x32xf32> to vector<16xf32>
    %472 = vector.shape_cast %471 : vector<16xf32> to vector<16x1xf32>
    %cst_203 = arith.constant 3.200000e+01 : f32
    %473 = vector.broadcast %cst_203 : f32 to vector<16x1xf32>
    %474 = arith.divf %472, %473 : vector<16x1xf32>
    %475 = vector.broadcast %474 : vector<16x1xf32> to vector<16x32xf32>
    %476 = arith.subf %466, %475 : vector<16x32xf32>
    %477 = arith.mulf %476, %476 : vector<16x32xf32>
    %cst_204 = arith.constant dense<0.000000e+00> : vector<16xf32>
    %478 = vector.multi_reduction <add>, %477, %cst_204 [1] : vector<16x32xf32> to vector<16xf32>
    %479 = vector.shape_cast %478 : vector<16xf32> to vector<16x1xf32>
    %cst_205 = arith.constant 3.200000e+01 : f32
    %480 = vector.broadcast %cst_205 : f32 to vector<16x1xf32>
    %481 = arith.divf %479, %480 : vector<16x1xf32>
    %482 = vector.broadcast %474 : vector<16x1xf32> to vector<16x32xf32>
    %483 = arith.subf %466, %482 : vector<16x32xf32>
    %cst_206 = arith.constant 9.99999974E-6 : f32
    %484 = vector.broadcast %cst_206 : f32 to vector<16x1xf32>
    %485 = arith.addf %481, %484 : vector<16x1xf32>
    %486 = math.rsqrt %485 : vector<16x1xf32>
    %487 = vector.broadcast %486 : vector<16x1xf32> to vector<16x32xf32>
    %488 = arith.mulf %483, %487 : vector<16x32xf32>
    %489 = vector.broadcast %468 : vector<1x32xf32> to vector<16x32xf32>
    %490 = arith.mulf %488, %489 : vector<16x32xf32>
    %491 = vector.broadcast %470 : vector<1x32xf32> to vector<16x32xf32>
    %492 = arith.addf %490, %491 : vector<16x32xf32>
    %493 = arith.addf %492, %1 : vector<16x32xf32>
    %c1_207 = arith.constant 1 : index
    %c0_208 = arith.constant 0 : index
    %c384_209 = arith.constant 384 : index
    %494 = vector.load %arg4[%c1_207, %c0_208, %c384_209] : memref<2x32x1024xf32, #tpu.memory_space<vmem>>, vector<1x32x32xf32>
    %495 = vector.shape_cast %494 : vector<1x32x32xf32> to vector<32x32xf32>
    %cst_210 = arith.constant dense<0.000000e+00> : vector<16x32xf32>
    %496 = tpu.matmul %493, %495, %cst_210 {dimension_numbers = #tpu.dot_dimension_numbers<[1], [0], [0], [1], [0, 0, 1, 1], [], []>} : vector<16x32xf32>, vector<32x32xf32>, vector<16x32xf32> -> vector<16x32xf32>
    %c1_211 = arith.constant 1 : index
    %c0_212 = arith.constant 0 : index
    %c384_213 = arith.constant 384 : index
    %497 = vector.load %arg6[%c1_211, %c0_212, %c384_213] : memref<2x1x1920xf32, #tpu.memory_space<vmem>>, vector<1x1x32xf32>
    %498 = vector.shape_cast %497 : vector<1x1x32xf32> to vector<1x32xf32>
    %499 = vector.broadcast %498 : vector<1x32xf32> to vector<16x32xf32>
    %500 = arith.addf %496, %499 : vector<16x32xf32>
    %c1_214 = arith.constant 1 : index
    %c0_215 = arith.constant 0 : index
    %c512_216 = arith.constant 512 : index
    %501 = vector.load %arg4[%c1_214, %c0_215, %c512_216] : memref<2x32x1024xf32, #tpu.memory_space<vmem>>, vector<1x32x32xf32>
    %502 = vector.shape_cast %501 : vector<1x32x32xf32> to vector<32x32xf32>
    %cst_217 = arith.constant dense<0.000000e+00> : vector<32x32xf32>
    %503 = tpu.matmul %3, %502, %cst_217 {dimension_numbers = #tpu.dot_dimension_numbers<[1], [0], [0], [1], [0, 0, 1, 1], [], []>} : vector<32x32xf32>, vector<32x32xf32>, vector<32x32xf32> -> vector<32x32xf32>
    %c1_218 = arith.constant 1 : index
    %c0_219 = arith.constant 0 : index
    %c512_220 = arith.constant 512 : index
    %504 = vector.load %arg6[%c1_218, %c0_219, %c512_220] : memref<2x1x1920xf32, #tpu.memory_space<vmem>>, vector<1x1x32xf32>
    %505 = vector.shape_cast %504 : vector<1x1x32xf32> to vector<1x32xf32>
    %506 = vector.broadcast %505 : vector<1x32xf32> to vector<32x32xf32>
    %507 = arith.addf %503, %506 : vector<32x32xf32>
    %c1_221 = arith.constant 1 : index
    %c0_222 = arith.constant 0 : index
    %c640_223 = arith.constant 640 : index
    %508 = vector.load %arg4[%c1_221, %c0_222, %c640_223] : memref<2x32x1024xf32, #tpu.memory_space<vmem>>, vector<1x32x32xf32>
    %509 = vector.shape_cast %508 : vector<1x32x32xf32> to vector<32x32xf32>
    %cst_224 = arith.constant dense<0.000000e+00> : vector<32x32xf32>
    %510 = tpu.matmul %2, %509, %cst_224 {dimension_numbers = #tpu.dot_dimension_numbers<[1], [0], [0], [1], [0, 0, 1, 1], [], []>} : vector<32x32xf32>, vector<32x32xf32>, vector<32x32xf32> -> vector<32x32xf32>
    %c1_225 = arith.constant 1 : index
    %c0_226 = arith.constant 0 : index
    %c640_227 = arith.constant 640 : index
    %511 = vector.load %arg6[%c1_225, %c0_226, %c640_227] : memref<2x1x1920xf32, #tpu.memory_space<vmem>>, vector<1x1x32xf32>
    %512 = vector.shape_cast %511 : vector<1x1x32xf32> to vector<1x32xf32>
    %513 = vector.broadcast %512 : vector<1x32xf32> to vector<32x32xf32>
    %514 = arith.addf %510, %513 : vector<32x32xf32>
    %c1_228 = arith.constant 1 : index
    %c0_229 = arith.constant 0 : index
    %c768_230 = arith.constant 768 : index
    %515 = vector.load %arg4[%c1_228, %c0_229, %c768_230] : memref<2x32x1024xf32, #tpu.memory_space<vmem>>, vector<1x32x32xf32>
    %516 = vector.shape_cast %515 : vector<1x32x32xf32> to vector<32x32xf32>
    %c1_231 = arith.constant 1 : index
    %c0_232 = arith.constant 0 : index
    %c768_233 = arith.constant 768 : index
    %517 = vector.load %arg6[%c1_231, %c0_232, %c768_233] : memref<2x1x1920xf32, #tpu.memory_space<vmem>>, vector<1x1x32xf32>
    %518 = vector.shape_cast %517 : vector<1x1x32xf32> to vector<1x32xf32>
    %519 = vector.extract_strided_slice %500 {offsets = [0, 0], sizes = [8, 32], strides = [1, 1]} : vector<16x32xf32> to vector<8x32xf32>
    %520 = vector.extract_strided_slice %507 {offsets = [0, 0], sizes = [16, 32], strides = [1, 1]} : vector<32x32xf32> to vector<16x32xf32>
    %521 = vector.extract_strided_slice %519 {offsets = [0, 0], sizes = [8, 8], strides = [1, 1]} : vector<8x32xf32> to vector<8x8xf32>
    %522 = vector.extract_strided_slice %520 {offsets = [0, 0], sizes = [16, 8], strides = [1, 1]} : vector<16x32xf32> to vector<16x8xf32>
    %cst_234 = arith.constant dense<0.000000e+00> : vector<8x16xf32>
    %523 = tpu.matmul %521, %522, %cst_234 {dimension_numbers = #tpu.dot_dimension_numbers<[1], [1], [0], [0], [0, 0, 1, 0], [], []>} : vector<8x8xf32>, vector<16x8xf32>, vector<8x16xf32> -> vector<8x16xf32>
    %524 = vector.extract_strided_slice %519 {offsets = [0, 8], sizes = [8, 8], strides = [1, 1]} : vector<8x32xf32> to vector<8x8xf32>
    %525 = vector.extract_strided_slice %520 {offsets = [0, 8], sizes = [16, 8], strides = [1, 1]} : vector<16x32xf32> to vector<16x8xf32>
    %cst_235 = arith.constant dense<0.000000e+00> : vector<8x16xf32>
    %526 = tpu.matmul %524, %525, %cst_235 {dimension_numbers = #tpu.dot_dimension_numbers<[1], [1], [0], [0], [0, 0, 1, 0], [], []>} : vector<8x8xf32>, vector<16x8xf32>, vector<8x16xf32> -> vector<8x16xf32>
    %527 = vector.extract_strided_slice %519 {offsets = [0, 16], sizes = [8, 8], strides = [1, 1]} : vector<8x32xf32> to vector<8x8xf32>
    %528 = vector.extract_strided_slice %520 {offsets = [0, 16], sizes = [16, 8], strides = [1, 1]} : vector<16x32xf32> to vector<16x8xf32>
    %cst_236 = arith.constant dense<0.000000e+00> : vector<8x16xf32>
    %529 = tpu.matmul %527, %528, %cst_236 {dimension_numbers = #tpu.dot_dimension_numbers<[1], [1], [0], [0], [0, 0, 1, 0], [], []>} : vector<8x8xf32>, vector<16x8xf32>, vector<8x16xf32> -> vector<8x16xf32>
    %530 = vector.extract_strided_slice %519 {offsets = [0, 24], sizes = [8, 8], strides = [1, 1]} : vector<8x32xf32> to vector<8x8xf32>
    %531 = vector.extract_strided_slice %520 {offsets = [0, 24], sizes = [16, 8], strides = [1, 1]} : vector<16x32xf32> to vector<16x8xf32>
    %cst_237 = arith.constant dense<0.000000e+00> : vector<8x16xf32>
    %532 = tpu.matmul %530, %531, %cst_237 {dimension_numbers = #tpu.dot_dimension_numbers<[1], [1], [0], [0], [0, 0, 1, 0], [], []>} : vector<8x8xf32>, vector<16x8xf32>, vector<8x16xf32> -> vector<8x16xf32>
    %533 = vector.extract_strided_slice %500 {offsets = [8, 0], sizes = [8, 32], strides = [1, 1]} : vector<16x32xf32> to vector<8x32xf32>
    %534 = vector.extract_strided_slice %507 {offsets = [16, 0], sizes = [16, 32], strides = [1, 1]} : vector<32x32xf32> to vector<16x32xf32>
    %535 = vector.extract_strided_slice %533 {offsets = [0, 0], sizes = [8, 8], strides = [1, 1]} : vector<8x32xf32> to vector<8x8xf32>
    %536 = vector.extract_strided_slice %534 {offsets = [0, 0], sizes = [16, 8], strides = [1, 1]} : vector<16x32xf32> to vector<16x8xf32>
    %cst_238 = arith.constant dense<0.000000e+00> : vector<8x16xf32>
    %537 = tpu.matmul %535, %536, %cst_238 {dimension_numbers = #tpu.dot_dimension_numbers<[1], [1], [0], [0], [0, 0, 1, 0], [], []>} : vector<8x8xf32>, vector<16x8xf32>, vector<8x16xf32> -> vector<8x16xf32>
    %538 = vector.extract_strided_slice %533 {offsets = [0, 8], sizes = [8, 8], strides = [1, 1]} : vector<8x32xf32> to vector<8x8xf32>
    %539 = vector.extract_strided_slice %534 {offsets = [0, 8], sizes = [16, 8], strides = [1, 1]} : vector<16x32xf32> to vector<16x8xf32>
    %cst_239 = arith.constant dense<0.000000e+00> : vector<8x16xf32>
    %540 = tpu.matmul %538, %539, %cst_239 {dimension_numbers = #tpu.dot_dimension_numbers<[1], [1], [0], [0], [0, 0, 1, 0], [], []>} : vector<8x8xf32>, vector<16x8xf32>, vector<8x16xf32> -> vector<8x16xf32>
    %541 = vector.extract_strided_slice %533 {offsets = [0, 16], sizes = [8, 8], strides = [1, 1]} : vector<8x32xf32> to vector<8x8xf32>
    %542 = vector.extract_strided_slice %534 {offsets = [0, 16], sizes = [16, 8], strides = [1, 1]} : vector<16x32xf32> to vector<16x8xf32>
    %cst_240 = arith.constant dense<0.000000e+00> : vector<8x16xf32>
    %543 = tpu.matmul %541, %542, %cst_240 {dimension_numbers = #tpu.dot_dimension_numbers<[1], [1], [0], [0], [0, 0, 1, 0], [], []>} : vector<8x8xf32>, vector<16x8xf32>, vector<8x16xf32> -> vector<8x16xf32>
    %544 = vector.extract_strided_slice %533 {offsets = [0, 24], sizes = [8, 8], strides = [1, 1]} : vector<8x32xf32> to vector<8x8xf32>
    %545 = vector.extract_strided_slice %534 {offsets = [0, 24], sizes = [16, 8], strides = [1, 1]} : vector<16x32xf32> to vector<16x8xf32>
    %cst_241 = arith.constant dense<0.000000e+00> : vector<8x16xf32>
    %546 = tpu.matmul %544, %545, %cst_241 {dimension_numbers = #tpu.dot_dimension_numbers<[1], [1], [0], [0], [0, 0, 1, 0], [], []>} : vector<8x8xf32>, vector<16x8xf32>, vector<8x16xf32> -> vector<8x16xf32>
    %547 = tpu.concatenate %523, %526, %529, %532, %537, %540, %543, %546 in 0 : vector<8x16xf32>, vector<8x16xf32>, vector<8x16xf32>, vector<8x16xf32>, vector<8x16xf32>, vector<8x16xf32>, vector<8x16xf32>, vector<8x16xf32> -> vector<64x16xf32>
    %cst_242 = arith.constant dense<0xFF800000> : vector<64xf32>
    %548 = vector.multi_reduction <maximumf>, %547, %cst_242 [1] : vector<64x16xf32> to vector<64xf32>
    %549 = vector.shape_cast %548 : vector<64xf32> to vector<64x1xf32>
    %550 = vector.broadcast %549 : vector<64x1xf32> to vector<64x16xf32>
    %551 = arith.subf %547, %550 : vector<64x16xf32>
    %552 = math.exp %551 : vector<64x16xf32>
    %cst_243 = arith.constant dense<0.000000e+00> : vector<64xf32>
    %553 = vector.multi_reduction <add>, %552, %cst_243 [1] : vector<64x16xf32> to vector<64xf32>
    %554 = vector.shape_cast %553 : vector<64xf32> to vector<64x1xf32>
    %555 = tpu.reciprocal %554 {approx = true} : vector<64x1xf32> -> vector<64x1xf32>
    %556 = vector.broadcast %555 : vector<64x1xf32> to vector<64x16xf32>
    %557 = arith.mulf %552, %556 : vector<64x16xf32>
    %558 = vector.extract_strided_slice %514 {offsets = [0, 0], sizes = [16, 32], strides = [1, 1]} : vector<32x32xf32> to vector<16x32xf32>
    %559 = vector.extract_strided_slice %557 {offsets = [0, 0], sizes = [8, 16], strides = [1, 1]} : vector<64x16xf32> to vector<8x16xf32>
    %560 = vector.extract_strided_slice %558 {offsets = [0, 0], sizes = [16, 8], strides = [1, 1]} : vector<16x32xf32> to vector<16x8xf32>
    %cst_244 = arith.constant dense<0.000000e+00> : vector<8x8xf32>
    %561 = tpu.matmul %559, %560, %cst_244 {dimension_numbers = #tpu.dot_dimension_numbers<[1], [0], [0], [1], [0, 0, 1, 1], [], []>} : vector<8x16xf32>, vector<16x8xf32>, vector<8x8xf32> -> vector<8x8xf32>
    %562 = vector.extract_strided_slice %516 {offsets = [0, 0], sizes = [8, 32], strides = [1, 1]} : vector<32x32xf32> to vector<8x32xf32>
    %cst_245 = arith.constant dense<0.000000e+00> : vector<8x32xf32>
    %563 = tpu.matmul %561, %562, %cst_245 {dimension_numbers = #tpu.dot_dimension_numbers<[1], [0], [0], [1], [0, 0, 1, 1], [], []>} : vector<8x8xf32>, vector<8x32xf32>, vector<8x32xf32> -> vector<8x32xf32>
    %564 = vector.extract_strided_slice %557 {offsets = [8, 0], sizes = [8, 16], strides = [1, 1]} : vector<64x16xf32> to vector<8x16xf32>
    %565 = vector.extract_strided_slice %558 {offsets = [0, 8], sizes = [16, 8], strides = [1, 1]} : vector<16x32xf32> to vector<16x8xf32>
    %cst_246 = arith.constant dense<0.000000e+00> : vector<8x8xf32>
    %566 = tpu.matmul %564, %565, %cst_246 {dimension_numbers = #tpu.dot_dimension_numbers<[1], [0], [0], [1], [0, 0, 1, 1], [], []>} : vector<8x16xf32>, vector<16x8xf32>, vector<8x8xf32> -> vector<8x8xf32>
    %567 = vector.extract_strided_slice %516 {offsets = [8, 0], sizes = [8, 32], strides = [1, 1]} : vector<32x32xf32> to vector<8x32xf32>
    %cst_247 = arith.constant dense<0.000000e+00> : vector<8x32xf32>
    %568 = tpu.matmul %566, %567, %cst_247 {dimension_numbers = #tpu.dot_dimension_numbers<[1], [0], [0], [1], [0, 0, 1, 1], [], []>} : vector<8x8xf32>, vector<8x32xf32>, vector<8x32xf32> -> vector<8x32xf32>
    %569 = arith.addf %563, %568 : vector<8x32xf32>
    %570 = vector.extract_strided_slice %557 {offsets = [16, 0], sizes = [8, 16], strides = [1, 1]} : vector<64x16xf32> to vector<8x16xf32>
    %571 = vector.extract_strided_slice %558 {offsets = [0, 16], sizes = [16, 8], strides = [1, 1]} : vector<16x32xf32> to vector<16x8xf32>
    %cst_248 = arith.constant dense<0.000000e+00> : vector<8x8xf32>
    %572 = tpu.matmul %570, %571, %cst_248 {dimension_numbers = #tpu.dot_dimension_numbers<[1], [0], [0], [1], [0, 0, 1, 1], [], []>} : vector<8x16xf32>, vector<16x8xf32>, vector<8x8xf32> -> vector<8x8xf32>
    %573 = vector.extract_strided_slice %516 {offsets = [16, 0], sizes = [8, 32], strides = [1, 1]} : vector<32x32xf32> to vector<8x32xf32>
    %cst_249 = arith.constant dense<0.000000e+00> : vector<8x32xf32>
    %574 = tpu.matmul %572, %573, %cst_249 {dimension_numbers = #tpu.dot_dimension_numbers<[1], [0], [0], [1], [0, 0, 1, 1], [], []>} : vector<8x8xf32>, vector<8x32xf32>, vector<8x32xf32> -> vector<8x32xf32>
    %575 = arith.addf %569, %574 : vector<8x32xf32>
    %576 = vector.extract_strided_slice %557 {offsets = [24, 0], sizes = [8, 16], strides = [1, 1]} : vector<64x16xf32> to vector<8x16xf32>
    %577 = vector.extract_strided_slice %558 {offsets = [0, 24], sizes = [16, 8], strides = [1, 1]} : vector<16x32xf32> to vector<16x8xf32>
    %cst_250 = arith.constant dense<0.000000e+00> : vector<8x8xf32>
    %578 = tpu.matmul %576, %577, %cst_250 {dimension_numbers = #tpu.dot_dimension_numbers<[1], [0], [0], [1], [0, 0, 1, 1], [], []>} : vector<8x16xf32>, vector<16x8xf32>, vector<8x8xf32> -> vector<8x8xf32>
    %579 = vector.extract_strided_slice %516 {offsets = [24, 0], sizes = [8, 32], strides = [1, 1]} : vector<32x32xf32> to vector<8x32xf32>
    %cst_251 = arith.constant dense<0.000000e+00> : vector<8x32xf32>
    %580 = tpu.matmul %578, %579, %cst_251 {dimension_numbers = #tpu.dot_dimension_numbers<[1], [0], [0], [1], [0, 0, 1, 1], [], []>} : vector<8x8xf32>, vector<8x32xf32>, vector<8x32xf32> -> vector<8x32xf32>
    %581 = arith.addf %575, %580 : vector<8x32xf32>
    %582 = vector.extract_strided_slice %514 {offsets = [16, 0], sizes = [16, 32], strides = [1, 1]} : vector<32x32xf32> to vector<16x32xf32>
    %583 = vector.extract_strided_slice %557 {offsets = [32, 0], sizes = [8, 16], strides = [1, 1]} : vector<64x16xf32> to vector<8x16xf32>
    %584 = vector.extract_strided_slice %582 {offsets = [0, 0], sizes = [16, 8], strides = [1, 1]} : vector<16x32xf32> to vector<16x8xf32>
    %cst_252 = arith.constant dense<0.000000e+00> : vector<8x8xf32>
    %585 = tpu.matmul %583, %584, %cst_252 {dimension_numbers = #tpu.dot_dimension_numbers<[1], [0], [0], [1], [0, 0, 1, 1], [], []>} : vector<8x16xf32>, vector<16x8xf32>, vector<8x8xf32> -> vector<8x8xf32>
    %586 = vector.extract_strided_slice %516 {offsets = [0, 0], sizes = [8, 32], strides = [1, 1]} : vector<32x32xf32> to vector<8x32xf32>
    %cst_253 = arith.constant dense<0.000000e+00> : vector<8x32xf32>
    %587 = tpu.matmul %585, %586, %cst_253 {dimension_numbers = #tpu.dot_dimension_numbers<[1], [0], [0], [1], [0, 0, 1, 1], [], []>} : vector<8x8xf32>, vector<8x32xf32>, vector<8x32xf32> -> vector<8x32xf32>
    %588 = vector.extract_strided_slice %557 {offsets = [40, 0], sizes = [8, 16], strides = [1, 1]} : vector<64x16xf32> to vector<8x16xf32>
    %589 = vector.extract_strided_slice %582 {offsets = [0, 8], sizes = [16, 8], strides = [1, 1]} : vector<16x32xf32> to vector<16x8xf32>
    %cst_254 = arith.constant dense<0.000000e+00> : vector<8x8xf32>
    %590 = tpu.matmul %588, %589, %cst_254 {dimension_numbers = #tpu.dot_dimension_numbers<[1], [0], [0], [1], [0, 0, 1, 1], [], []>} : vector<8x16xf32>, vector<16x8xf32>, vector<8x8xf32> -> vector<8x8xf32>
    %591 = vector.extract_strided_slice %516 {offsets = [8, 0], sizes = [8, 32], strides = [1, 1]} : vector<32x32xf32> to vector<8x32xf32>
    %cst_255 = arith.constant dense<0.000000e+00> : vector<8x32xf32>
    %592 = tpu.matmul %590, %591, %cst_255 {dimension_numbers = #tpu.dot_dimension_numbers<[1], [0], [0], [1], [0, 0, 1, 1], [], []>} : vector<8x8xf32>, vector<8x32xf32>, vector<8x32xf32> -> vector<8x32xf32>
    %593 = arith.addf %587, %592 : vector<8x32xf32>
    %594 = vector.extract_strided_slice %557 {offsets = [48, 0], sizes = [8, 16], strides = [1, 1]} : vector<64x16xf32> to vector<8x16xf32>
    %595 = vector.extract_strided_slice %582 {offsets = [0, 16], sizes = [16, 8], strides = [1, 1]} : vector<16x32xf32> to vector<16x8xf32>
    %cst_256 = arith.constant dense<0.000000e+00> : vector<8x8xf32>
    %596 = tpu.matmul %594, %595, %cst_256 {dimension_numbers = #tpu.dot_dimension_numbers<[1], [0], [0], [1], [0, 0, 1, 1], [], []>} : vector<8x16xf32>, vector<16x8xf32>, vector<8x8xf32> -> vector<8x8xf32>
    %597 = vector.extract_strided_slice %516 {offsets = [16, 0], sizes = [8, 32], strides = [1, 1]} : vector<32x32xf32> to vector<8x32xf32>
    %cst_257 = arith.constant dense<0.000000e+00> : vector<8x32xf32>
    %598 = tpu.matmul %596, %597, %cst_257 {dimension_numbers = #tpu.dot_dimension_numbers<[1], [0], [0], [1], [0, 0, 1, 1], [], []>} : vector<8x8xf32>, vector<8x32xf32>, vector<8x32xf32> -> vector<8x32xf32>
    %599 = arith.addf %593, %598 : vector<8x32xf32>
    %600 = vector.extract_strided_slice %557 {offsets = [56, 0], sizes = [8, 16], strides = [1, 1]} : vector<64x16xf32> to vector<8x16xf32>
    %601 = vector.extract_strided_slice %582 {offsets = [0, 24], sizes = [16, 8], strides = [1, 1]} : vector<16x32xf32> to vector<16x8xf32>
    %cst_258 = arith.constant dense<0.000000e+00> : vector<8x8xf32>
    %602 = tpu.matmul %600, %601, %cst_258 {dimension_numbers = #tpu.dot_dimension_numbers<[1], [0], [0], [1], [0, 0, 1, 1], [], []>} : vector<8x16xf32>, vector<16x8xf32>, vector<8x8xf32> -> vector<8x8xf32>
    %603 = vector.extract_strided_slice %516 {offsets = [24, 0], sizes = [8, 32], strides = [1, 1]} : vector<32x32xf32> to vector<8x32xf32>
    %cst_259 = arith.constant dense<0.000000e+00> : vector<8x32xf32>
    %604 = tpu.matmul %602, %603, %cst_259 {dimension_numbers = #tpu.dot_dimension_numbers<[1], [0], [0], [1], [0, 0, 1, 1], [], []>} : vector<8x8xf32>, vector<8x32xf32>, vector<8x32xf32> -> vector<8x32xf32>
    %605 = arith.addf %599, %604 : vector<8x32xf32>
    %606 = tpu.concatenate %581, %605 in 0 : vector<8x32xf32>, vector<8x32xf32> -> vector<16x32xf32>
    %607 = vector.broadcast %518 : vector<1x32xf32> to vector<16x32xf32>
    %608 = arith.addf %606, %607 : vector<16x32xf32>
    %609 = arith.addf %492, %608 : vector<16x32xf32>
    %c1_260 = arith.constant 1 : index
    %c0_261 = arith.constant 0 : index
    %c1408_262 = arith.constant 1408 : index
    %610 = vector.load %arg6[%c1_260, %c0_261, %c1408_262] : memref<2x1x1920xf32, #tpu.memory_space<vmem>>, vector<1x1x32xf32>
    %611 = vector.shape_cast %610 : vector<1x1x32xf32> to vector<1x32xf32>
    %c1_263 = arith.constant 1 : index
    %c0_264 = arith.constant 0 : index
    %c1536_265 = arith.constant 1536 : index
    %612 = vector.load %arg6[%c1_263, %c0_264, %c1536_265] : memref<2x1x1920xf32, #tpu.memory_space<vmem>>, vector<1x1x32xf32>
    %613 = vector.shape_cast %612 : vector<1x1x32xf32> to vector<1x32xf32>
    %cst_266 = arith.constant dense<0.000000e+00> : vector<16xf32>
    %614 = vector.multi_reduction <add>, %609, %cst_266 [1] : vector<16x32xf32> to vector<16xf32>
    %615 = vector.shape_cast %614 : vector<16xf32> to vector<16x1xf32>
    %cst_267 = arith.constant 3.200000e+01 : f32
    %616 = vector.broadcast %cst_267 : f32 to vector<16x1xf32>
    %617 = arith.divf %615, %616 : vector<16x1xf32>
    %618 = vector.broadcast %617 : vector<16x1xf32> to vector<16x32xf32>
    %619 = arith.subf %609, %618 : vector<16x32xf32>
    %620 = arith.mulf %619, %619 : vector<16x32xf32>
    %cst_268 = arith.constant dense<0.000000e+00> : vector<16xf32>
    %621 = vector.multi_reduction <add>, %620, %cst_268 [1] : vector<16x32xf32> to vector<16xf32>
    %622 = vector.shape_cast %621 : vector<16xf32> to vector<16x1xf32>
    %cst_269 = arith.constant 3.200000e+01 : f32
    %623 = vector.broadcast %cst_269 : f32 to vector<16x1xf32>
    %624 = arith.divf %622, %623 : vector<16x1xf32>
    %625 = vector.broadcast %617 : vector<16x1xf32> to vector<16x32xf32>
    %626 = arith.subf %609, %625 : vector<16x32xf32>
    %cst_270 = arith.constant 9.99999974E-6 : f32
    %627 = vector.broadcast %cst_270 : f32 to vector<16x1xf32>
    %628 = arith.addf %624, %627 : vector<16x1xf32>
    %629 = math.rsqrt %628 : vector<16x1xf32>
    %630 = vector.broadcast %629 : vector<16x1xf32> to vector<16x32xf32>
    %631 = arith.mulf %626, %630 : vector<16x32xf32>
    %632 = vector.broadcast %611 : vector<1x32xf32> to vector<16x32xf32>
    %633 = arith.mulf %631, %632 : vector<16x32xf32>
    %634 = vector.broadcast %613 : vector<1x32xf32> to vector<16x32xf32>
    %635 = arith.addf %633, %634 : vector<16x32xf32>
    %c1_271 = arith.constant 1 : index
    %c0_272 = arith.constant 0 : index
    %c896_273 = arith.constant 896 : index
    %636 = vector.load %arg4[%c1_271, %c0_272, %c896_273] : memref<2x32x1024xf32, #tpu.memory_space<vmem>>, vector<1x32x64xf32>
    %637 = vector.shape_cast %636 : vector<1x32x64xf32> to vector<32x64xf32>
    %cst_274 = arith.constant dense<0.000000e+00> : vector<16x64xf32>
    %638 = tpu.matmul %635, %637, %cst_274 {dimension_numbers = #tpu.dot_dimension_numbers<[1], [0], [0], [1], [0, 0, 1, 1], [], []>} : vector<16x32xf32>, vector<32x64xf32>, vector<16x64xf32> -> vector<16x64xf32>
    %c1_275 = arith.constant 1 : index
    %c0_276 = arith.constant 0 : index
    %c896_277 = arith.constant 896 : index
    %639 = vector.load %arg6[%c1_275, %c0_276, %c896_277] : memref<2x1x1920xf32, #tpu.memory_space<vmem>>, vector<1x1x64xf32>
    %640 = vector.shape_cast %639 : vector<1x1x64xf32> to vector<1x64xf32>
    %641 = vector.broadcast %640 : vector<1x64xf32> to vector<16x64xf32>
    %642 = arith.addf %638, %641 : vector<16x64xf32>
    %cst_278 = arith.constant 0.000000e+00 : f32
    %643 = vector.broadcast %cst_278 : f32 to vector<16x64xf32>
    %644 = arith.maximumf %642, %643 : vector<16x64xf32>
    %c1_279 = arith.constant 1 : index
    %c0_280 = arith.constant 0 : index
    %c0_281 = arith.constant 0 : index
    %645 = vector.load %arg5[%c1_279, %c0_280, %c0_281] : memref<2x64x32xf32, #tpu.memory_space<vmem>>, vector<1x64x32xf32>
    %646 = vector.shape_cast %645 : vector<1x64x32xf32> to vector<64x32xf32>
    %cst_282 = arith.constant dense<0.000000e+00> : vector<16x32xf32>
    %647 = tpu.matmul %644, %646, %cst_282 {dimension_numbers = #tpu.dot_dimension_numbers<[1], [0], [0], [1], [0, 0, 1, 1], [], []>} : vector<16x64xf32>, vector<64x32xf32>, vector<16x32xf32> -> vector<16x32xf32>
    %c1_283 = arith.constant 1 : index
    %c0_284 = arith.constant 0 : index
    %c1024_285 = arith.constant 1024 : index
    %648 = vector.load %arg6[%c1_283, %c0_284, %c1024_285] : memref<2x1x1920xf32, #tpu.memory_space<vmem>>, vector<1x1x32xf32>
    %649 = vector.shape_cast %648 : vector<1x1x32xf32> to vector<1x32xf32>
    %650 = vector.broadcast %649 : vector<1x32xf32> to vector<16x32xf32>
    %651 = arith.addf %647, %650 : vector<16x32xf32>
    %652 = arith.addf %635, %651 : vector<16x32xf32>
    %c1_286 = arith.constant 1 : index
    %c0_287 = arith.constant 0 : index
    %c1664_288 = arith.constant 1664 : index
    %653 = vector.load %arg6[%c1_286, %c0_287, %c1664_288] : memref<2x1x1920xf32, #tpu.memory_space<vmem>>, vector<1x1x32xf32>
    %654 = vector.shape_cast %653 : vector<1x1x32xf32> to vector<1x32xf32>
    %c1_289 = arith.constant 1 : index
    %c0_290 = arith.constant 0 : index
    %c1792_291 = arith.constant 1792 : index
    %655 = vector.load %arg6[%c1_289, %c0_290, %c1792_291] : memref<2x1x1920xf32, #tpu.memory_space<vmem>>, vector<1x1x32xf32>
    %656 = vector.shape_cast %655 : vector<1x1x32xf32> to vector<1x32xf32>
    %cst_292 = arith.constant dense<0.000000e+00> : vector<16xf32>
    %657 = vector.multi_reduction <add>, %652, %cst_292 [1] : vector<16x32xf32> to vector<16xf32>
    %658 = vector.shape_cast %657 : vector<16xf32> to vector<16x1xf32>
    %cst_293 = arith.constant 3.200000e+01 : f32
    %659 = vector.broadcast %cst_293 : f32 to vector<16x1xf32>
    %660 = arith.divf %658, %659 : vector<16x1xf32>
    %661 = vector.broadcast %660 : vector<16x1xf32> to vector<16x32xf32>
    %662 = arith.subf %652, %661 : vector<16x32xf32>
    %663 = arith.mulf %662, %662 : vector<16x32xf32>
    %cst_294 = arith.constant dense<0.000000e+00> : vector<16xf32>
    %664 = vector.multi_reduction <add>, %663, %cst_294 [1] : vector<16x32xf32> to vector<16xf32>
    %665 = vector.shape_cast %664 : vector<16xf32> to vector<16x1xf32>
    %cst_295 = arith.constant 3.200000e+01 : f32
    %666 = vector.broadcast %cst_295 : f32 to vector<16x1xf32>
    %667 = arith.divf %665, %666 : vector<16x1xf32>
    %668 = vector.broadcast %660 : vector<16x1xf32> to vector<16x32xf32>
    %669 = arith.subf %652, %668 : vector<16x32xf32>
    %cst_296 = arith.constant 9.99999974E-6 : f32
    %670 = vector.broadcast %cst_296 : f32 to vector<16x1xf32>
    %671 = arith.addf %667, %670 : vector<16x1xf32>
    %672 = math.rsqrt %671 : vector<16x1xf32>
    %673 = vector.broadcast %672 : vector<16x1xf32> to vector<16x32xf32>
    %674 = arith.mulf %669, %673 : vector<16x32xf32>
    %675 = vector.broadcast %654 : vector<1x32xf32> to vector<16x32xf32>
    %676 = arith.mulf %674, %675 : vector<16x32xf32>
    %677 = vector.broadcast %656 : vector<1x32xf32> to vector<16x32xf32>
    %678 = arith.addf %676, %677 : vector<16x32xf32>
    %cst_297 = arith.constant dense<0.000000e+00> : vector<16xf32>
    %679 = vector.multi_reduction <add>, %678, %cst_297 [1] : vector<16x32xf32> to vector<16xf32>
    %680 = vector.shape_cast %679 : vector<16xf32> to vector<16x1xf32>
    %cst_298 = arith.constant 3.200000e+01 : f32
    %681 = vector.broadcast %cst_298 : f32 to vector<16x1xf32>
    %682 = arith.divf %680, %681 : vector<16x1xf32>
    %683 = vector.broadcast %682 : vector<16x1xf32> to vector<16x32xf32>
    %684 = arith.subf %678, %683 : vector<16x32xf32>
    %685 = arith.mulf %684, %684 : vector<16x32xf32>
    %cst_299 = arith.constant dense<0.000000e+00> : vector<16xf32>
    %686 = vector.multi_reduction <add>, %685, %cst_299 [1] : vector<16x32xf32> to vector<16xf32>
    %687 = vector.shape_cast %686 : vector<16xf32> to vector<16x1xf32>
    %cst_300 = arith.constant 3.200000e+01 : f32
    %688 = vector.broadcast %cst_300 : f32 to vector<16x1xf32>
    %689 = arith.divf %687, %688 : vector<16x1xf32>
    %690 = vector.broadcast %682 : vector<16x1xf32> to vector<16x32xf32>
    %691 = arith.subf %678, %690 : vector<16x32xf32>
    %cst_301 = arith.constant 9.99999974E-6 : f32
    %692 = vector.broadcast %cst_301 : f32 to vector<16x1xf32>
    %693 = arith.addf %689, %692 : vector<16x1xf32>
    %694 = math.rsqrt %693 : vector<16x1xf32>
    %695 = vector.broadcast %694 : vector<16x1xf32> to vector<16x32xf32>
    %696 = arith.mulf %691, %695 : vector<16x32xf32>
    %697 = vector.broadcast %4 : vector<1x32xf32> to vector<16x32xf32>
    %698 = arith.mulf %696, %697 : vector<16x32xf32>
    %699 = vector.broadcast %5 : vector<1x32xf32> to vector<16x32xf32>
    %700 = arith.addf %698, %699 : vector<16x32xf32>
    %c1_302 = arith.constant 1 : index
    %c0_303 = arith.constant 0 : index
    %c0_304 = arith.constant 0 : index
    %701 = vector.load %arg8[%c1_302, %c0_303, %c0_304] : memref<2x16x32xf32, #tpu.memory_space<vmem>>, vector<1x16x32xf32>
    %702 = vector.shape_cast %701 : vector<1x16x32xf32> to vector<16x32xf32>
    %703 = vector.shape_cast %700 : vector<16x32xf32> to vector<1x16x32xf32>
    tpu.vector_store %arg8[%c1_302, %c0_303, %c0_304], %703 {strides = array<i32>} : memref<2x16x32xf32, #tpu.memory_space<vmem>>, vector<1x16x32xf32>,
    return
  }
}

</mosaic_0001>

<bundles_post_ra>
// kernel: tpu_custom_call.1
= control target key start
LH: loop header
LB: loop body
LE: loop exit
PB: predicated region body
PF: predicated region fallthrough
CT: control target
= control target key end

     0   :  { %13 = vsyncpa [#allocation3], 0  ;;  %s12726_s0 = inlined_call_operand.vmem [shape: f32[16,32], index: 0, kind: input, shape index: {}]   ;;  %s12727_s1 = inlined_call_operand.vmem [shape: f32[32,32], index: 1, kind: input, shape index: {}]   ;;  %s12728_s2 = inlined_call_operand.vmem [shape: f32[32,32], index: 2, kind: input, shape index: {}]   ;;  %s12729_s3 = inlined_call_operand.vmem [shape: f32[16,32], index: 3, kind: input, shape index: {}]   ;;  %s12730_s4 = inlined_call_operand.hbm [shape: f32[2,32,1024], index: 4, kind: input, shape index: {}]   ;;  %s12731_s5 = inlined_call_operand.vmem [shape: f32[2,64,32], index: 5, kind: input, shape index: {}]   ;;  %s12732_s6 = inlined_call_operand.vmem [shape: f32[2,1,1920], index: 6, kind: input, shape index: {}]   ;;  %s12733_s7 = inlined_call_operand.vmem [shape: f32[1,256], index: 7, kind: input, shape index: {}]   ;;  %s12734_s8 = inlined_call_operand.hbm [shape: f32[2,16,32], index: 8, kind: output, shape index: {}]  }
   0x1   :  { %14 = vsyncpa [#allocation4], 0  ;;  %s11419_s27 = smov [#allocation2]   ;;  %s11371_s9 = scalar_lea.hbm %s12730_s4, 8192 }
   0x2   :  { %s28_s28 = sshll.u32 %s11419_s27, 4  ;;  %p11372_p0 = scmp.ne.s32.totalorder %s12730_s4, %s11371_s9  ;;  %s29_s28 = int_to_ptr.vmem [resolvable:$true] %s28_s28 }
   0x3   :  { %p11375_p1 = scmp.lt.u32.totalorder %s11371_s9, %s12730_s4 }
   0x5   :  { %p11377_p2 = pnand %p11375_p1, %p11372_p0 }
   0x7   :  { %11380 = shalt.err (!%p11377_p2)
}
   0x8   :  { %s11381_s14 = scalar_lea.vmem %s29_s28, 8192  ;;  %p11386_p4 = scmp.lt.s32.totalorder %s29_s28, %s29_s28 }
   0x9   :  { %p11382_p3 = scmp.ne.s32.totalorder %s29_s28, %s11381_s14  ;;  %p11387_p5 = scmp.lt.s32.totalorder %s11381_s14, %s11381_s14 }
   0xb   :  { %p11388_p6 = por %p11387_p5, %p11386_p4 }
   0xd   :  { %p11389_p7 = pnand %p11388_p6, %p11382_p3 }
   0xf   :  { %11392 = shalt.err (!%p11389_p7)
}
  0x10   :  { %s11420_s15 = smov 1024   ;;  %s11421_s16 = smov 64  }
  0x11   :  { %34 = dma.hbm_to_vmem [thread:$0]  %s12730_s4, 8192, %s29_s28, [#allocation3], %s11420_s15, %s11420_s15, %s11421_s16  }
  0x12   :  { %11415 = dma.done.wait [#allocation3], 8192  }
  0x13   :  { %11416 = vsyncadd [#allocation3], 4294959104  ;;  %v60_v0 = vld [vmem:[#allocation2] sm:$0xff]  ;;  %vm71_vm0 = vcmask 261120   ;;  %v11510_v9 = vld [vmem:[%s12726_s0 + $0x8] sm:$0xff]  ;;  %v11422_v17 = vmov 0.0  }
  0x14   :  { %v61_v1 = vld [vmem:[#allocation2 + $0x40] sm:$0xff]  ;;  %v11515_v10 = vld [vmem:[%s12729_s3 + $0x8] sm:$0xff]  ;;  %vm11423_vm1 = vmmov 0   ;;  %s11424_s27 = smov 120   ;;  %s11425_s28 = smov 96   ;;  %vm253_vm2 = vcmask 64512  }
  0x15   :  { %v62_v2 = vld [vmem:[#allocation2 + $0x80] sm:$0xff]  ;;  %v10825_v3 = vpack.c.bf16 %v61_v1, %v60_v0  ;;  %v59_v11 = vadd.f32 %v11515_v10, %v11510_v9  ;;  %v153_v12 = vld [vmem:[#allocation2 + $0x8] sm:$0xff]  ;;  %s11426_s29 = smov 80   ;;  %s11427_s30 = smov 88   ;;  %vm11783_vm3 = vmpackc.low %vm253_vm2, %vm253_vm2  ;;  %vm3173_vm4 = vcmask 130048   ;;  %vm4637_vm5 = vcmask 523264  }
  0x16   :  { %v63_v4 = vld [vmem:[#allocation2 + $0xc0] sm:$0xff]  ;;  %v154_v13 = vld [vmem:[#allocation2 + $0x48] sm:$0xff]  ;;  %s11428_s9 = smov 72   ;;  %s11429_s10 = smov 112  }
  0x17   :  { %v11495_v5 = vld [vmem:[%s12726_s0] sm:$0xff]  ;;  %v10829_v7 = vpack.c.bf16 %v63_v4, %v62_v2  ;;  %10826 = vmatprep.subr.bf16.mxu0 %v10825_v3  ;;  %v155_v14 = vld [vmem:[#allocation2 + $0x88] sm:$0xff]  ;;  %v10833_v15 = vpack.c.bf16 %v154_v13, %v153_v12  ;;  %s11430_s11 = smov 104  }
  0x18   :  { %v11500_v6 = vld [vmem:[%s12729_s3] sm:$0xff]  ;;  %10118 = vmatprep.mubr.msk.f32.mxu1 %vm71_vm0, %v11495_v5  ;;  %10828 = vmatpush3.bf16.msra.mxu0 %v10825_v3  ;;  %v156_v16 = vld [vmem:[#allocation2 + $0xc8] sm:$0xff] }
  0x19   :  { %v58_v8 = vadd.f32 %v11500_v6, %v11495_v5  ;;  %10830 = vmatprep.subr.bf16.mxu0 %v10829_v7  ;;  %v10837_v18 = vpack.c.bf16 %v156_v16, %v155_v14  ;;  %10834 = vmatprep.subr.bf16.mxu1 %v10833_v15  ;;  %v9540_v19 = vld [vmem:[%s12732_s6] ss:$0 sm:$0xff]  ;;  %v9543_v33 = vld [vmem:[%s12732_s6 + $0x1] ss:$0 sm:$0xff] }
  0x1a   :  { %10836 = vmatpush3.bf16.msra.mxu1 %v10833_v15 }
  0x1b   :  { %10107 = vmatprep.mubr.msk.f32.mxu0 %vm71_vm0, %v58_v8  ;;  %10838 = vmatprep.subr.bf16.mxu1 %v10837_v18 }
  0x1c   :  { %10832 = vmatpush3.bf16.msra.mxu0 %v10829_v7 }
  0x1d   :  { %10121 = vmatprep.subr.mxu0 %v11422_v17 }
  0x1e   :  { %10840 = vmatpush3.bf16.msra.mxu1 %v10837_v18 }
  0x1f   :  { %10108 = vmatmul.mubr.msk.f32.vlgmr.msra.gmra.mrb[0].mxu0 %vm71_vm0, %v59_v11  ;;  %10136 = vmatprep.subr.mxu1 %v11422_v17 }
  0x20   :  { %10123 = vmatprep.mubr.msk.f32.mxu0 %vm11423_vm1, %v11422_v17 }
  0x21   :  { %10119 = vmatmul.mubr.msk.f32.vlgmr.msra.gmra.mrb[0].mxu1 %vm71_vm0, %v11510_v9 }
  0x22   :  { %10138 = vmatprep.mubr.msk.f32.mxu1 %vm11423_vm1, %v11422_v17 }
  0xf2   :  { %v10109_v20 = vpop.f32.mrb[0].mxu0 }
  0xf3   :  { %v144_v21 = vpop.f32.mrb[1].mxu0  ;;  %v11538_v23 = vadd.f32 %v10109_v20, %v9540_v19 }
  0xf4   :  { %v145_v22 = vadd.f32 %v9540_v19, %v144_v21  ;;  %v10120_v32 = vpop.f32.mrb[0].mxu1 }
  0xf5   :  { %v11567_v34 = vadd.f32 %v10120_v32, %v9543_v33  ;;  %v236_v35 = vpop.f32.mrb[1].mxu1 }
  0xf6   :  { %328 = vrot.lane.b32.xlu1 %v145_v22, %s11424_s27  ;;  %251 = vrot.lane.b32.xlu0 %v145_v22, %s11425_s28  ;;  %v11574_v45 = vadd.f32 %v9543_v33, %v236_v35 }
  0xfa   :  { %408 = vrot.lane.b32.xlu1 %v145_v22, %s11426_s29  ;;  %330 = vrot.lane.b32.xlu0 %v145_v22, %s11427_s30 }
  0xfe   :  { %486 = vrot.lane.b32.xlu1 %v145_v22, %s11428_s9  ;;  %406 = vrot.lane.b32.xlu0 %v145_v22, %s11429_s10 }
 0x102   :  { %484 = vrot.lane.b32.xlu0 %v145_v22, %s11430_s11 }
 0x106   :  { %641 = vrot.lane.b32.xlu0 %v11538_v23, %s11427_s30 }
 0x168   :  { %v329_v24 = vpop.permute.xlu1 %328  ;;  %v252_v25 = vpop.permute.xlu0 %251 }
 0x169   :  { %10122 = vmatpush3.xpose.msk.msra.mxu0 %vm253_vm2, %v252_v25 }
 0x16a   :  { %10126 = vmatprep.subr.mxu0 %v11422_v17 }
 0x16c   :  { %v409_v26 = vpop.permute.xlu1 %408  ;;  %10124 = vmatmul.mubr.msk.f32.vlgmr.msra.gmra.mrb[2].mxu0 %vm253_vm2, %v145_v22  ;;  %v331_v27 = vpop.permute.xlu0 %330 }
 0x16d   :  { %10127 = vmatpush3.xpose.msk.msra.mxu0 %vm253_vm2, %v331_v27  ;;  %10128 = vmatprep.mubr.msk.f32.mxu0 %vm11423_vm1, %v11422_v17 }
 0x16e   :  { %10131 = vmatprep.subr.mxu0 %v11422_v17 }
 0x170   :  { %v487_v28 = vpop.permute.xlu1 %486  ;;  %10129 = vmatmul.mubr.msk.f32.vlgmr.msra.gmra.mrb[4].mxu0 %vm253_vm2, %v329_v24  ;;  %v407_v29 = vpop.permute.xlu0 %406 }
 0x171   :  { %10132 = vmatpush3.xpose.msk.msra.mxu0 %vm253_vm2, %v409_v26  ;;  %10137 = vmatpush3.xpose.msk.msra.mxu1 %vm253_vm2, %v487_v28 }
 0x172   :  { %10133 = vmatprep.mubr.msk.f32.mxu0 %vm11423_vm1, %v11422_v17  ;;  %10146 = vmatprep.subr.mxu1 %v11422_v17 }
 0x173   :  { %10141 = vmatprep.subr.mxu0 %v11422_v17 }
 0x174   :  { %10134 = vmatmul.mubr.msk.f32.vlgmr.msra.gmra.mrb[6].mxu0 %vm253_vm2, %v407_v29  ;;  %v485_v30 = vpop.permute.xlu0 %484 }
 0x175   :  { %10139 = vmatmul.mubr.msk.f32.vlgmr.msra.gmra.mrb[2].mxu1 %vm253_vm2, %v485_v30  ;;  %10143 = vmatprep.mubr.msk.f32.mxu0 %vm11423_vm1, %v11422_v17 }
 0x176   :  { %10148 = vmatprep.mubr.msk.f32.mxu1 %vm11423_vm1, %v11422_v17 }
 0x178   :  { %v642_v31 = vpop.permute.xlu0 %641 }
 0x179   :  { %10147 = vmatpush3.xpose.msk.msra.mxu1 %vm253_vm2, %v642_v31 }
 0x17a   :  { %10156 = vmatprep.subr.mxu1 %v11422_v17 }
 0x23f   :  { %v11569_v36 = vpop.f32.mrb[2].mxu0 }
 0x240   :  { %v10125_v37 = vpop.f32.mrb[3].mxu0  ;;  %v873_v59 = vsel %vm253_vm2, %v11569_v36, -inf }
 0x243   :  { %v402_v38 = vpop.f32.mrb[4].mxu0 }
 0x244   :  { %v10130_v39 = vpop.f32.mrb[5].mxu0  ;;  %v876_v40 = vsel %vm253_vm2, %v402_v38, -inf }
 0x245   :  { %877 = vmax.xlane.f32.xlu1 %v876_v40 }
 0x247   :  { %v480_v41 = vpop.f32.mrb[6].mxu0 }
 0x248   :  { %v10135_v42 = vpop.f32.mrb[7].mxu0  ;;  %v558_v43 = vpop.f32.mrb[2].mxu1  ;;  %v879_v46 = vsel %vm253_vm2, %v480_v41, -inf }
 0x249   :  { %v10140_v44 = vpop.f32.mrb[3].mxu1  ;;  %v882_v60 = vsel %vm253_vm2, %v558_v43, -inf }
 0x256   :  { %639 = vrot.lane.b32.xlu1 %v11538_v23, %s11424_s27 }
 0x25a   :  { %797 = vrot.lane.b32.xlu1 %v11538_v23, %s11428_s9 }
 0x25e   :  { %1035 = vrot.lane.b32.xlu1 %v11574_v45, %s11424_s27 }
 0x282   :  { %880 = vmax.xlane.f32.xlu1 %v879_v46 }
 0x293   :  { %563 = vrot.lane.b32.xlu1 %v11538_v23, %s11425_s28 }
 0x297   :  { %717 = vrot.lane.b32.xlu1 %v11538_v23, %s11429_s10 }
 0x2d2   :  { %v878_v47 = vpop.xlane.xlu1 %877 }
 0x2d3   :  { %v898_v48 = vsub.f32 %v402_v38, %v878_v47 }
 0x2d5   :  { %v907_v49 = vmul.f32 1.442695, %v898_v48  ;;  %v245_v48 = vld [vmem:[#allocation2 + $0x10] sm:$0xff] }
 0x2d6   :  { %v640_v50 = vpop.permute.xlu1 %639 }
 0x2d7   :  { %11201 = vpow2.f32 %v907_v49  ;;  %10149 = vmatmul.mubr.msk.f32.vlgmr.msra.gmra.mrb[4].mxu1 %vm253_vm2, %v640_v50 }
 0x2d8   :  { %10158 = vmatprep.mubr.msk.f32.mxu1 %vm11423_vm1, %v11422_v17 }
 0x2da   :  { %v798_v51 = vpop.permute.xlu1 %797 }
 0x2db   :  { %10157 = vmatpush3.xpose.msk.msra.mxu1 %vm253_vm2, %v798_v51 }
 0x2dc   :  { %10166 = vmatprep.subr.mxu1 %v11422_v17 }
 0x2de   :  { %v1036_v54 = vpop.permute.xlu1 %1035 }
 0x2e1   :  { %v11202_v52 = vpop.eup %11201 }
 0x2e2   :  { %v924_v53 = vsel %vm253_vm2, %v11202_v52, 0.0 }
 0x2e3   :  { %925 = vadd.xlane.f32.xlu0 %v924_v53  ;;  %v11667_v53 = vld [vmem:[#allocation2 + $0x90] sm:$0xff] }
 0x2f9   :  { %795 = vrot.lane.b32.xlu0 %v11538_v23, %s11430_s11 }
 0x30f   :  { %v881_v55 = vpop.xlane.xlu1 %880 }
 0x310   :  { %v899_v56 = vsub.f32 %v480_v41, %v881_v55  ;;  %v11640_v41 = vld [vmem:[#allocation2 + $0x50] sm:$0xff] }
 0x312   :  { %v909_v57 = vmul.f32 1.442695, %v899_v56 }
 0x313   :  { %v564_v58 = vpop.permute.xlu1 %563 }
 0x314   :  { %11203 = vpow2.f32 %v909_v57  ;;  %10142 = vmatpush3.xpose.msk.msra.mxu0 %vm253_vm2, %v564_v58 }
 0x315   :  { %10151 = vmatprep.subr.mxu0 %v11422_v17 }
 0x317   :  { %10144 = vmatmul.mubr.msk.f32.vlgmr.msra.gmra.mrb[8].mxu0 %vm253_vm2, %v11538_v23  ;;  %v718_v25 = vpop.permute.xlu1 %717 }
 0x318   :  { %874 = vmax.xlane.f32.xlu0 %v873_v59  ;;  %10153 = vmatprep.mubr.msk.f32.mxu0 %vm11423_vm1, %v11422_v17  ;;  %v11676_v59 = vld [vmem:[#allocation2 + $0xd0] sm:$0xff] }
 0x31c   :  { %883 = vmax.xlane.f32.xlu0 %v882_v60 }
 0x31e   :  { %v11602_v61 = vpop.eup %11203 }
 0x31f   :  { %v927_v62 = vsel %vm253_vm2, %v11602_v61, 0.0 }
 0x320   :  { %928 = vadd.xlane.f32.xlu1 %v927_v62 }
 0x331   :  { %1257 = vrot.lane.b32.xlu1 %v11574_v45, %s11429_s10 }
 0x370   :  { %v926_v63 = vpop.xlane.xlu0 %925 }
 0x371   :  { %11205 = vrcp.f32 %v926_v63 }
 0x374   :  { %v796_v0 = vpop.permute.xlu0 %795 }
 0x375   :  { %10159 = vmatmul.mubr.msk.f32.vlgmr.msra.gmra.mrb[6].mxu1 %vm253_vm2, %v796_v0 }
 0x376   :  { %10167 = vmatpush3.msra.mxu1 %v1036_v54  ;;  %10168 = vmatprep.mubr.msk.f32.mxu1 %vm11423_vm1, %v11422_v17 }
 0x377   :  { %10176 = vmatprep.subr.mxu1 %v11422_v17 }
 0x37b   :  { %v11206_v1 = vpop.eup %11205 }
 0x37c   :  { %v954_v2 = vmul.f32 %v11206_v1, %v11202_v52 }
 0x37e   :  { %10169 = vmatmul.mubr.msk.f32.vlgmr.msra.gmra.mrb[8].mxu1 %vm253_vm2, %v954_v2 }
 0x37f   :  { %10178 = vmatprep.mubr.msk.f32.mxu1 %vm11423_vm1, %v11422_v17  ;;  %10177 = vmatpush3.msra.mxu1 %v245_v48 }
 0x380   :  { %10186 = vmatprep.subr.mxu1 %v11422_v17 }
 0x3a5   :  { %v875_v3 = vpop.xlane.xlu0 %874 }
 0x3a6   :  { %v897_v4 = vsub.f32 %v11569_v36, %v875_v3 }
 0x3a8   :  { %v905_v7 = vmul.f32 1.442695, %v897_v4 }
 0x3a9   :  { %v884_v8 = vpop.xlane.xlu0 %883 }
 0x3aa   :  { %11207 = vpow2.f32 %v905_v7  ;;  %v900_v11 = vsub.f32 %v558_v43, %v884_v8  ;;  %v713_v12 = vpop.f32.mrb[4].mxu1 }
 0x3ab   :  { %v10150_v13 = vpop.f32.mrb[5].mxu1  ;;  %v888_v14 = vsel %vm253_vm2, %v713_v12, -inf }
 0x3ac   :  { %v911_v15 = vmul.f32 1.442695, %v900_v11  ;;  %889 = vmax.xlane.f32.xlu1 %v888_v14 }
 0x3ad   :  { %v929_v26 = vpop.xlane.xlu1 %928 }
 0x3ae   :  { %11209 = vpow2.f32 %v911_v15 }
 0x3b1   :  { %v1258_v27 = vpop.permute.xlu1 %1257 }
 0x3b4   :  { %v11208_v16 = vpop.eup %11207 }
 0x3b5   :  { %v921_v18 = vsel %vm253_vm2, %v11208_v16, 0.0 }
 0x3b6   :  { %922 = vadd.xlane.f32.xlu0 %v921_v18 }
 0x3b8   :  { %v11210_v19 = vpop.eup %11209 }
 0x3b9   :  { %v930_v20 = vsel %vm253_vm2, %v11210_v19, 0.0 }
 0x3ba   :  { %931 = vadd.xlane.f32.xlu0 %v930_v20 }
 0x3d0   :  { %719 = vrot.lane.b32.xlu0 %v11538_v23, %s11426_s29 }
 0x3d4   :  { %1407 = vrot.lane.b32.xlu0 %v11574_v45, %s11430_s11 }
 0x3ea   :  { %v11623_v21 = vpop.f32.mrb[8].mxu0 }
 0x3eb   :  { %v10145_v22 = vpop.f32.mrb[9].mxu0  ;;  %v885_v24 = vsel %vm253_vm2, %v11623_v21, -inf }
 0x3ec   :  { %886 = vmax.xlane.f32.xlu1 %v885_v24 }
 0x439   :  { %v890_v28 = vpop.xlane.xlu1 %889 }
 0x43a   :  { %v902_v29 = vsub.f32 %v713_v12, %v890_v28 }
 0x43c   :  { %v915_v30 = vmul.f32 1.442695, %v902_v29 }
 0x43e   :  { %11211 = vpow2.f32 %v915_v30  ;;  %v11702_v30 = vld [vmem:[%s12732_s6 + $0x2] ss:$0 sm:$0xff] }
 0x443   :  { %v923_v31 = vpop.xlane.xlu0 %922 }
 0x444   :  { %11213 = vrcp.f32 %v923_v31 }
 0x445   :  { %11215 = vrcp.f32 %v929_v26 }
 0x447   :  { %v932_v23 = vpop.xlane.xlu0 %931 }
 0x448   :  { %v11627_v32 = vpop.eup %11211  ;;  %v11629_v33 = vpop.f32.mrb[6].mxu1  ;;  %11217 = vrcp.f32 %v932_v23 }
 0x449   :  { %v10160_v35 = vpop.f32.mrb[7].mxu1  ;;  %v936_v36 = vsel %vm253_vm2, %v11627_v32, 0.0  ;;  %v894_v56 = vsel %vm253_vm2, %v11629_v33, -inf }
 0x44a   :  { %937 = vadd.xlane.f32.xlu0 %v936_v36 }
 0x44b   :  { %v720_v37 = vpop.permute.xlu0 %719 }
 0x44c   :  { %10152 = vmatpush3.xpose.msk.msra.mxu0 %vm253_vm2, %v720_v37 }
 0x44d   :  { %10161 = vmatprep.subr.mxu0 %v11422_v17 }
 0x44e   :  { %v11214_v38 = vpop.eup %11213 }
 0x44f   :  { %10154 = vmatmul.mubr.msk.f32.vlgmr.msra.gmra.mrb[10].mxu0 %vm253_vm2, %v718_v25  ;;  %v953_v40 = vmul.f32 %v11214_v38, %v11208_v16  ;;  %v11216_v43 = vpop.eup %11215  ;;  %v1408_v46 = vpop.permute.xlu0 %1407 }
 0x450   :  { %10162 = vmatpush3.msra.mxu0 %v11574_v45  ;;  %10163 = vmatprep.mubr.msk.f32.mxu0 %vm11423_vm1, %v11422_v17  ;;  %v955_v44 = vmul.f32 %v11216_v43, %v11602_v61 }
 0x451   :  { %v1107_v39 = vpop.f32.mrb[8].mxu1  ;;  %10171 = vmatprep.subr.mxu0 %v11422_v17 }
 0x452   :  { %v10170_v42 = vpop.f32.mrb[9].mxu1  ;;  %v11218_v45 = vpop.eup %11217 }
 0x453   :  { %10164 = vmatmul.mubr.msk.f32.vlgmr.msra.gmra.mrb[12].mxu0 %vm253_vm2, %v953_v40  ;;  %v956_v47 = vmul.f32 %v11218_v45, %v11210_v19 }
 0x454   :  { %10172 = vmatpush3.msra.mxu0 %v11640_v41  ;;  %10173 = vmatprep.mubr.msk.f32.mxu0 %vm11423_vm1, %v11422_v17 }
 0x455   :  { %10181 = vmatprep.subr.mxu0 %v11422_v17 }
 0x457   :  { %10174 = vmatmul.mubr.msk.f32.vlgmr.msra.gmra.mrb[14].mxu0 %vm253_vm2, %v1107_v39 }
 0x458   :  { %10182 = vmatpush3.msra.mxu0 %v1258_v27  ;;  %10183 = vmatprep.mubr.msk.f32.mxu0 %vm11423_vm1, %v11422_v17 }
 0x459   :  { %10191 = vmatprep.subr.mxu0 %v11422_v17 }
 0x45b   :  { %10184 = vmatmul.mubr.msk.f32.vlgmr.msra.gmra.mrb[16].mxu0 %vm253_vm2, %v955_v44 }
 0x45c   :  { %10192 = vmatpush3.msra.mxu0 %v1408_v46  ;;  %10193 = vmatprep.mubr.msk.f32.mxu0 %vm11423_vm1, %v11422_v17 }
 0x45d   :  { %10201 = vmatprep.subr.mxu0 %v11422_v17 }
 0x45f   :  { %10194 = vmatmul.mubr.msk.f32.vlgmr.msra.gmra.mrb[18].mxu0 %vm253_vm2, %v956_v47 }
 0x460   :  { %10202 = vmatpush3.msra.mxu0 %v11567_v34  ;;  %1631 = vrot.lane.b32.xlu0 %v11567_v34, %s11424_s27 }
 0x461   :  { %10203 = vmatprep.mubr.msk.f32.mxu0 %vm11423_vm1, %v11422_v17  ;;  %10211 = vmatprep.subr.mxu0 %v11422_v17 }
 0x464   :  { %1853 = vrot.lane.b32.xlu0 %v11567_v34, %s11429_s10 }
 0x479   :  { %v887_v3 = vpop.xlane.xlu1 %886 }
 0x47a   :  { %v901_v7 = vsub.f32 %v11623_v21, %v887_v3 }
 0x47c   :  { %v913_v12 = vmul.f32 1.442695, %v901_v7 }
 0x4d7   :  { %v938_v52 = vpop.xlane.xlu0 %937 }
 0x4d8   :  { %11219 = vrcp.f32 %v938_v52 }
 0x4db   :  { %v1632_v0 = vpop.permute.xlu0 %1631 }
 0x4df   :  { %v1854_v44 = vpop.permute.xlu0 %1853 }
 0x4e2   :  { %v11220_v62 = vpop.eup %11219 }
 0x4e3   :  { %v958_v2 = vmul.f32 %v11220_v62, %v11627_v32 }
 0x522   :  { %v791_v49 = vpop.f32.mrb[10].mxu0 }
 0x523   :  { %v10155_v50 = vpop.f32.mrb[11].mxu0  ;;  %v891_v51 = vsel %vm253_vm2, %v791_v49, -inf }
 0x524   :  { %892 = vmax.xlane.f32.xlu1 %v891_v51 }
 0x526   :  { %v1030_v54 = vpop.f32.mrb[12].mxu0 }
 0x527   :  { %v10165_v55 = vpop.f32.mrb[13].mxu0  ;;  %10179 = vmatmul.mubr.msk.f32.vlgmr.msra.gmra.mrb[10].mxu1 %vm253_vm2, %v1030_v54 }
 0x528   :  { %895 = vmax.xlane.f32.xlu1 %v894_v56  ;;  %10187 = vmatpush3.msra.mxu1 %v11667_v53 }
 0x529   :  { %10188 = vmatprep.mubr.msk.f32.mxu1 %vm11423_vm1, %v11422_v17  ;;  %10196 = vmatprep.subr.mxu1 %v11422_v17 }
 0x52a   :  { %v1180_v57 = vpop.f32.mrb[14].mxu0 }
 0x52b   :  { %v10175_v58 = vpop.f32.mrb[15].mxu0 }
 0x52e   :  { %v1329_v60 = vpop.f32.mrb[16].mxu0 }
 0x52f   :  { %v10185_v61 = vpop.f32.mrb[17].mxu0  ;;  %10189 = vmatmul.mubr.msk.f32.vlgmr.msra.gmra.mrb[12].mxu1 %vm253_vm2, %v1329_v60 }
 0x530   :  { %10197 = vmatpush3.msra.mxu1 %v11676_v59  ;;  %10198 = vmatprep.mubr.msk.f32.mxu1 %vm11423_vm1, %v11422_v17 }
 0x531   :  { %10206 = vmatprep.subr.mxu1 %v11422_v17 }
 0x532   :  { %v1479_v63 = vpop.f32.mrb[18].mxu0 }
 0x533   :  { %v10195_v1 = vpop.f32.mrb[19].mxu0  ;;  %10199 = vmatmul.mubr.msk.f32.vlgmr.msra.gmra.mrb[14].mxu1 %vm253_vm2, %v1479_v63  ;;  %v11729_v63 = vld [vmem:[%s12732_s6 + $0x9] ss:$0 sm:$0xff] }
 0x534   :  { %10207 = vmatpush3.msra.mxu1 %v1632_v0  ;;  %10208 = vmatprep.mubr.msk.f32.mxu1 %vm11423_vm1, %v11422_v17 }
 0x535   :  { %10216 = vmatprep.subr.mxu1 %v11422_v17 }
 0x537   :  { %10209 = vmatmul.mubr.msk.f32.vlgmr.msra.gmra.mrb[16].mxu1 %vm253_vm2, %v958_v2 }
 0x538   :  { %10217 = vmatpush3.msra.mxu1 %v245_v48  ;;  %10218 = vmatprep.mubr.msk.f32.mxu1 %vm11423_vm1, %v11422_v17 }
 0x539   :  { %10226 = vmatprep.subr.mxu1 %v11422_v17 }
 0x5b1   :  { %v893_v4 = vpop.xlane.xlu1 %892 }
 0x5b2   :  { %v903_v13 = vsub.f32 %v791_v49, %v893_v4 }
 0x5b4   :  { %v917_v15 = vmul.f32 1.442695, %v903_v13 }
 0x5b5   :  { %v896_v8 = vpop.xlane.xlu1 %895 }
 0x5b6   :  { %v904_v11 = vsub.f32 %v11629_v33, %v896_v8 }
 0x5b8   :  { %v919_v14 = vmul.f32 1.442695, %v904_v11 }
 0x5ba   :  { %11221 = vpow2.f32 %v919_v14 }
 0x5bb   :  { %11223 = vpow2.f32 %v913_v12 }
 0x5bc   :  { %11225 = vpow2.f32 %v917_v15 }
 0x5c4   :  { %v11222_v16 = vpop.eup %11221 }
 0x5c5   :  { %v942_v18 = vsel %vm253_vm2, %v11222_v16, 0.0  ;;  %v11224_v19 = vpop.eup %11223 }
 0x5c6   :  { %943 = vadd.xlane.f32.xlu1 %v942_v18  ;;  %v933_v20 = vsel %vm253_vm2, %v11224_v19, 0.0  ;;  %v11226_v22 = vpop.eup %11225 }
 0x5c7   :  { %v939_v21 = vsel %vm253_vm2, %v11226_v22, 0.0 }
 0x5ca   :  { %934 = vadd.xlane.f32.xlu1 %v933_v20 }
 0x5ce   :  { %940 = vadd.xlane.f32.xlu1 %v939_v21 }
 0x5df   :  { %2003 = vrot.lane.b32.xlu1 %v11567_v34, %s11430_s11 }
 0x5fa   :  { %v1253_v24 = vpop.f32.mrb[10].mxu1 }
 0x5fb   :  { %v1254_v25 = vadd.f32 %v1253_v24, %v1180_v57  ;;  %v10180_v26 = vpop.f32.mrb[11].mxu1 }
 0x5fc   :  { %v2304_v26 = vld [vmem:[#allocation2 + $0xa0] sm:$0xff] }
 0x602   :  { %v1402_v27 = vpop.f32.mrb[12].mxu1 }
 0x603   :  { %v1406_v28 = vadd.f32 %v1402_v27, %v1254_v25  ;;  %v10190_v29 = vpop.f32.mrb[13].mxu1  ;;  %v2302_v25 = vld [vmem:[#allocation2 + $0x20] sm:$0xff] }
 0x606   :  { %v1552_v31 = vpop.f32.mrb[14].mxu1 }
 0x607   :  { %v1556_v23 = vadd.f32 %v1552_v31, %v1406_v28  ;;  %v10200_v32 = vpop.f32.mrb[15].mxu1  ;;  %v2305_v28 = vld [vmem:[#allocation2 + $0xe0] sm:$0xff] }
 0x608   :  { %v10853_v29 = vpack.c.bf16 %v2305_v28, %v2304_v26 }
 0x609   :  { %v2159_v33 = vadd.f32 %v11702_v30, %v1556_v23 }
 0x60a   :  { %v1703_v35 = vpop.f32.mrb[16].mxu1 }
 0x60b   :  { %v10210_v36 = vpop.f32.mrb[17].mxu1  ;;  %v2161_v34 = vadd.f32 %v2159_v33, %v11495_v5 }
 0x60c   :  { %v2210_v36 = vld [vmem:[#allocation2 + $0x18] sm:$0xff] }
 0x60d   :  { %v2165_v37 = vsel %vm71_vm0, %v2161_v34, 0.0 }
 0x60e   :  { %2166 = vadd.xlane.f32.xlu0 %v2165_v37 }
 0x653   :  { %v944_v38 = vpop.xlane.xlu1 %943 }
 0x657   :  { %v935_v39 = vpop.xlane.xlu1 %934 }
 0x658   :  { %11227 = vrcp.f32 %v935_v39  ;;  %v2213_v39 = vld [vmem:[#allocation2 + $0xd8] sm:$0xff] }
 0x65b   :  { %v941_v40 = vpop.xlane.xlu1 %940 }
 0x65c   :  { %11229 = vrcp.f32 %v941_v40 }
 0x65d   :  { %11231 = vrcp.f32 %v944_v38  ;;  %v2212_v38 = vld [vmem:[#allocation2 + $0x98] sm:$0xff] }
 0x65e   :  { %v10845_v40 = vpack.c.bf16 %v2213_v39, %v2212_v38 }
 0x65f   :  { %v2004_v47 = vpop.permute.xlu1 %2003 }
 0x662   :  { %v11228_v42 = vpop.eup %11227 }
 0x663   :  { %v957_v43 = vmul.f32 %v11228_v42, %v11224_v19  ;;  %v54_v42 = vld [vmem:[%s12728_s2 + $0x10] sm:$0xff] }
 0x665   :  { %10204 = vmatmul.mubr.msk.f32.vlgmr.msra.gmra.mrb[20].mxu0 %vm253_vm2, %v957_v43  ;;  %v55_v43 = vld [vmem:[%s12728_s2 + $0x18] sm:$0xff] }
 0x666   :  { %10212 = vmatpush3.msra.mxu0 %v11640_v41  ;;  %10213 = vmatprep.mubr.msk.f32.mxu0 %vm11423_vm1, %v11422_v17  ;;  %v11230_v5 = vpop.eup %11229 }
 0x667   :  { %10221 = vmatprep.subr.mxu0 %v11422_v17  ;;  %v959_v45 = vmul.f32 %v11230_v5, %v11226_v22  ;;  %v11232_v46 = vpop.eup %11231  ;;  %v11431_v5 = vmov 0.0|0.0  }
 0x668   :  { %v960_v41 = vmul.f32 %v11232_v46, %v11222_v16 }
 0x669   :  { %10214 = vmatmul.mubr.msk.f32.vlgmr.msra.gmra.mrb[22].mxu0 %vm253_vm2, %v1703_v35  ;;  %v53_v35 = vld [vmem:[%s12728_s2 + $0x8] sm:$0xff] }
 0x66a   :  { %10222 = vmatpush3.msra.mxu0 %v1854_v44  ;;  %10223 = vmatprep.mubr.msk.f32.mxu0 %vm11423_vm1, %v11422_v17 }
 0x66b   :  { %10231 = vmatprep.subr.mxu0 %v11422_v17 }
 0x66d   :  { %10224 = vmatmul.mubr.msk.f32.vlgmr.msra.gmra.mrb[24].mxu0 %vm253_vm2, %v959_v45 }
 0x66e   :  { %10232 = vmatpush3.msra.mxu0 %v2004_v47  ;;  %10233 = vmatprep.mubr.msk.f32.mxu0 %vm11423_vm1, %v11422_v17 }
 0x671   :  { %10234 = vmatmul.mubr.msk.f32.vlgmr.msra.gmra.mrb[26].mxu0 %vm253_vm2, %v960_v41 }
 0x69b   :  { %v2167_v48 = vpop.xlane.xlu0 %2166 }
 0x69c   :  { %v2172_v49 = vmul.f32 0.03125, %v2167_v48 }
 0x69e   :  { %v2174_v50 = vsub.f32 %v2161_v34, %v2172_v49  ;;  %v2211_v34 = vld [vmem:[#allocation2 + $0x58] sm:$0xff] }
 0x69f   :  { %v10841_v37 = vpack.c.bf16 %v2211_v34, %v2210_v36 }
 0x6a0   :  { %v2176_v51 = vmul.f32 %v2174_v50, %v2174_v50 }
 0x6a1   :  { %10842 = vmatprep.subr.bf16.mxu0 %v10841_v37 }
 0x6a2   :  { %v2178_v52 = vsel %vm71_vm0, %v2176_v51, 0.0  ;;  %10844 = vmatpush3.bf16.msra.mxu0 %v10841_v37  ;;  %v9584_v51 = vld [vmem:[%s12732_s6 + $0x4] ss:$0 sm:$0xff] }
 0x6a3   :  { %2179 = vadd.xlane.f32.xlu0 %v2178_v52  ;;  %10846 = vmatprep.subr.bf16.mxu0 %v10845_v40 }
 0x6a6   :  { %10848 = vmatpush3.bf16.msra.mxu0 %v10845_v40 }
 0x730   :  { %v2180_v54 = vpop.xlane.xlu0 %2179 }
 0x731   :  { %v2184_v55 = vmul.f32 0.03125, %v2180_v54 }
 0x733   :  { %v2186_v56 = vadd.f32 1e-05, %v2184_v55 }
 0x735   :  { %11233 = vrsqrt.f32 %v2186_v56 }
 0x738   :  { %v1626_v57 = vpop.f32.mrb[20].mxu0 }
 0x739   :  { %v10205_v58 = vpop.f32.mrb[21].mxu0  ;;  %10219 = vmatmul.mubr.msk.f32.vlgmr.msra.gmra.mrb[18].mxu1 %vm253_vm2, %v1626_v57  ;;  %v12535_v57 = vld [vmem:[#allocation2 + $0x170] sm:$0xff] }
 0x73a   :  { %10227 = vmatpush3.msra.mxu1 %v11667_v53  ;;  %10228 = vmatprep.mubr.msk.f32.mxu1 %vm11423_vm1, %v11422_v17  ;;  %v11735_v53 = vld [vmem:[%s12732_s6 + $0xa] ss:$0 sm:$0xff] }
 0x73b   :  { %10236 = vmatprep.subr.mxu1 %v11422_v17 }
 0x73c   :  { %v1776_v60 = vpop.f32.mrb[22].mxu0 }
 0x73d   :  { %v10215_v61 = vpop.f32.mrb[23].mxu0 }
 0x73e   :  { %v2411_v61 = vld [vmem:[#allocation2 + $0x68] sm:$0xff] }
 0x73f   :  { %v11234_v62 = vpop.eup %11233 }
 0x740   :  { %v1925_v0 = vpop.f32.mrb[24].mxu0  ;;  %v2190_v1 = vmul.f32 %v11234_v62, %v2174_v50  ;;  %v2412_v62 = vld [vmem:[#allocation2 + $0xa8] sm:$0xff] }
 0x741   :  { %v10225_v2 = vpop.f32.mrb[25].mxu0  ;;  %10229 = vmatmul.mubr.msk.f32.vlgmr.msra.gmra.mrb[20].mxu1 %vm253_vm2, %v1925_v0 }
 0x742   :  { %10237 = vmatpush3.msra.mxu1 %v11676_v59  ;;  %10238 = vmatprep.mubr.msk.f32.mxu1 %vm11423_vm1, %v11422_v17  ;;  %v2198_v3 = vmul.f32 %v11729_v63, %v2190_v1  ;;  %v2413_v1 = vld [vmem:[#allocation2 + $0xe8] sm:$0xff]  ;;  %v48_v2 = vld [vmem:[%s12727_s1] sm:$0xff] }
 0x744   :  { %v2075_v4 = vpop.f32.mrb[26].mxu0  ;;  %v11742_v7 = vadd.f32 %v11735_v53, %v2198_v3 }
 0x745   :  { %v10235_v8 = vpop.f32.mrb[27].mxu0  ;;  %10239 = vmatmul.mubr.msk.f32.vlgmr.msra.gmra.mrb[22].mxu1 %vm253_vm2, %v2075_v4  ;;  %v10861_v4 = vpack.c.bf16 %v2413_v1, %v2412_v62 }
 0x746   :  { %v2208_v11 = vadd.f32 %v11742_v7, %v11500_v6  ;;  %v2303_v6 = vld [vmem:[#allocation2 + $0x60] sm:$0xff] }
 0x747   :  { %v10849_v27 = vpack.c.bf16 %v2303_v6, %v2302_v25 }
 0x748   :  { %10249 = vmatprep.mubr.msk.f32.mxu0 %vm71_vm0, %v2208_v11  ;;  %v49_v11 = vld [vmem:[%s12727_s1 + $0x8] sm:$0xff] }
 0x749   :  { %10850 = vmatprep.subr.bf16.mxu1 %v10849_v27 }
 0x74a   :  { %10852 = vmatpush3.bf16.msra.mxu1 %v10849_v27 }
 0x74b   :  { %10854 = vmatprep.subr.bf16.mxu1 %v10853_v29 }
 0x74e   :  { %10856 = vmatpush3.bf16.msra.mxu1 %v10853_v29  ;;  %v9589_v29 = vld [vmem:[%s12732_s6 + $0x5] ss:$0 sm:$0xff] }
 0x74f   :  { %10865 = vmatprep.subr.bf16.mxu1 %v11431_v5 }
 0x80c   :  { %v1849_v12 = vpop.f32.mrb[18].mxu1 }
 0x80d   :  { %v1850_v13 = vadd.f32 %v1849_v12, %v1776_v60  ;;  %v10220_v59 = vpop.f32.mrb[19].mxu1  ;;  %v50_v12 = vld [vmem:[%s12727_s1 + $0x10] sm:$0xff] }
 0x814   :  { %v1998_v14 = vpop.f32.mrb[20].mxu1 }
 0x815   :  { %v2002_v15 = vadd.f32 %v1998_v14, %v1850_v13  ;;  %v10230_v16 = vpop.f32.mrb[21].mxu1  ;;  %v51_v13 = vld [vmem:[%s12727_s1 + $0x18] sm:$0xff] }
 0x818   :  { %v2148_v18 = vpop.f32.mrb[22].mxu1 }
 0x819   :  { %v2152_v19 = vadd.f32 %v2148_v18, %v2002_v15  ;;  %v10240_v20 = vpop.f32.mrb[23].mxu1 }
 0x81b   :  { %v2160_v22 = vadd.f32 %v11702_v30, %v2152_v19  ;;  %v9581_v19 = vld [vmem:[%s12732_s6 + $0x3] ss:$0 sm:$0xff] }
 0x81d   :  { %v2162_v21 = vadd.f32 %v2160_v22, %v11510_v9  ;;  %v52_v9 = vld [vmem:[%s12728_s2] sm:$0xff] }
 0x81e   :  { %10260 = vmatprep.mubr.msk.f32.mxu1 %vm71_vm0, %v52_v9 }
 0x81f   :  { %v2168_v24 = vsel %vm71_vm0, %v2162_v21, 0.0  ;;  %10261 = vmatmul.mubr.msk.f32.vlgmr.msra.gmra.mrb[24].mxu1 %vm71_vm0, %v53_v35 }
 0x820   :  { %2169 = vadd.xlane.f32.xlu1 %v2168_v24  ;;  %10263 = vmatprep.mubr.msk.f32.mxu1 %vm71_vm0, %v54_v42 }
 0x823   :  { %10264 = vmatmul.mubr.msk.f32.gmra.mrb[26].mxu1 %vm71_vm0, %v55_v43 }
 0x824   :  { %10284 = vmatprep.mubr.msk.f32.mxu1 %vm11423_vm1, %v11422_v17 }
 0x8ad   :  { %v2170_v31 = vpop.xlane.xlu1 %2169 }
 0x8ae   :  { %v2173_v23 = vmul.f32 0.03125, %v2170_v31 }
 0x8b0   :  { %v2175_v32 = vsub.f32 %v2162_v21, %v2173_v23 }
 0x8b2   :  { %v2177_v33 = vmul.f32 %v2175_v32, %v2175_v32 }
 0x8b4   :  { %v2181_v30 = vsel %vm71_vm0, %v2177_v33, 0.0 }
 0x8b5   :  { %2182 = vadd.xlane.f32.xlu0 %v2181_v30 }
 0x8f2   :  { %v10262_v52 = vpop.f32.mrb[24].mxu1 }
 0x8f3   :  { %v2397_v54 = vadd.f32 %v10262_v52, %v9584_v51  ;;  %v2391_v55 = vpop.f32.mrb[25].mxu1 }
 0x8f4   :  { %v2392_v56 = vadd.f32 %v9584_v51, %v2391_v55 }
 0x8f6   :  { %v10866_v58 = vpack.c.bf16 %v2397_v54, %v2392_v56  ;;  %v11081_v60 = vpack.i.bf16 %v2397_v54, %v2392_v56 }
 0x8f8   :  { %11082 = vrot.lane.b32.xlu0 %v11081_v60, %s11424_s27  ;;  %10868 = vmatpush3.bf16.xpose.msk.msra.mxu1 %vm11783_vm3, %v10866_v58 }
 0x8f9   :  { %10873 = vmatprep.subr.bf16.mxu1 %v11431_v5 }
 0x8fc   :  { %11087 = vrot.lane.b32.xlu0 %v11081_v60, %s11429_s10 }
 0x900   :  { %11092 = vrot.lane.b32.xlu0 %v11081_v60, %s11430_s11 }
 0x942   :  { %v2183_v44 = vpop.xlane.xlu0 %2182 }
 0x943   :  { %v2185_v45 = vmul.f32 0.03125, %v2183_v44 }
 0x945   :  { %v2187_v46 = vadd.f32 1e-05, %v2185_v45 }
 0x947   :  { %11235 = vrsqrt.f32 %v2187_v46 }
 0x951   :  { %v11236_v47 = vpop.eup %11235 }
 0x952   :  { %v2191_v41 = vmul.f32 %v11236_v47, %v2175_v32 }
 0x954   :  { %v2199_v48 = vmul.f32 %v11729_v63, %v2191_v41  ;;  %v10265_v63 = vpop.f32.mrb[26].mxu1 }
 0x955   :  { %v2401_v3 = vpop.f32.mrb[27].mxu1 }
 0x956   :  { %v11773_v49 = vadd.f32 %v11735_v53, %v2199_v48  ;;  %v11796_v53 = vadd.f32 %v10265_v63, %v9584_v51  ;;  %v11799_v8 = vadd.f32 %v9584_v51, %v2401_v3 }
 0x958   :  { %v2209_v50 = vadd.f32 %v11773_v49, %v11515_v10  ;;  %v2410_v10 = vld [vmem:[#allocation2 + $0x28] sm:$0xff]  ;;  %v10882_v36 = vpack.c.bf16 %v11796_v53, %v11799_v8 }
 0x959   :  { %v10857_v0 = vpack.c.bf16 %v2411_v61, %v2410_v10  ;;  %v11096_v61 = vpack.i.bf16 %v11796_v53, %v11799_v8 }
 0x95a   :  { %10250 = vmatmul.mubr.msk.f32.vlgmr.msra.gmra.mrb[28].mxu0 %vm71_vm0, %v2209_v50 }
 0x95b   :  { %10274 = vmatprep.mubr.msk.f32.mxu0 %vm71_vm0, %v48_v2  ;;  %10858 = vmatprep.subr.bf16.mxu0 %v10857_v0 }
 0x95c   :  { %10860 = vmatpush3.bf16.msra.mxu0 %v10857_v0 }
 0x95d   :  { %10862 = vmatprep.subr.bf16.mxu0 %v10861_v4 }
 0x960   :  { %10864 = vmatpush3.bf16.msra.mxu0 %v10861_v4 }
 0x961   :  { %10869 = vmatprep.subr.bf16.mxu0 %v11431_v5 }
 0x963   :  { %10275 = vmatmul.mubr.msk.f32.vlgmr.msra.gmra.mrb[30].mxu0 %vm71_vm0, %v49_v11 }
 0x964   :  { %10277 = vmatprep.mubr.msk.f32.mxu0 %vm71_vm0, %v50_v12 }
 0x967   :  { %10278 = vmatmul.mubr.msk.f32.gmra.mrb[32].mxu0 %vm71_vm0, %v51_v13 }
 0x968   :  { %10291 = vmatprep.mubr.msk.f32.mxu0 %vm11423_vm1, %v11422_v17 }
 0x96a   :  { %v11083_v59 = vpop.permute.xlu0 %11082 }
 0x96b   :  { %v11085_v14 = vunpack.i.h.bf16 %v11083_v59  ;;  %v11084_v15 = vunpack.i.l.bf16 %v11083_v59 }
 0x96d   :  { %v10870_v16 = vpack.c.bf16 %v11085_v14, %v11084_v15 }
 0x96e   :  { %v11088_v18 = vpop.permute.xlu0 %11087 }
 0x96f   :  { %10872 = vmatpush3.bf16.xpose.msk.msra.mxu0 %vm11783_vm3, %v10870_v16  ;;  %v11090_v20 = vunpack.i.h.bf16 %v11088_v18  ;;  %v11089_v22 = vunpack.i.l.bf16 %v11088_v18 }
 0x970   :  { %10877 = vmatprep.subr.bf16.mxu0 %v11431_v5 }
 0x971   :  { %v10874_v26 = vpack.c.bf16 %v11090_v20, %v11089_v22 }
 0x972   :  { %v11093_v30 = vpop.permute.xlu0 %11092 }
 0x973   :  { %v11095_v9 = vunpack.i.h.bf16 %v11093_v30  ;;  %v11094_v35 = vunpack.i.l.bf16 %v11093_v30 }
 0x975   :  { %v10878_v34 = vpack.c.bf16 %v11095_v9, %v11094_v35 }
 0xa2d   :  { %v10251_v21 = vpop.f32.mrb[28].mxu0 }
 0xa2e   :  { %v11822_v24 = vadd.f32 %v10251_v21, %v9581_v19  ;;  %v2293_v25 = vpop.f32.mrb[29].mxu0 }
 0xa2f   :  { %v2294_v6 = vadd.f32 %v9581_v19, %v2293_v25 }
 0xa31   :  { %2684 = vrot.lane.b32.xlu0 %v2294_v6, %s11429_s10  ;;  %2602 = vrot.lane.b32.xlu1 %v2294_v6, %s11424_s27 }
 0xa32   :  { %10285 = vmatmul.mubr.msk.f32.vlgmr.msra.gmra.mrb[28].mxu1 %vm253_vm2, %v2294_v6 }
 0xa33   :  { %10876 = vmatpush3.bf16.xpose.msk.msra.mxu1 %vm11783_vm3, %v10874_v26  ;;  %10298 = vmatprep.mubr.msk.f32.mxu1 %vm11423_vm1, %v11422_v17 }
 0xa34   :  { %10881 = vmatprep.subr.bf16.mxu1 %v11431_v5 }
 0xa35   :  { %2766 = vrot.lane.b32.xlu1 %v2294_v6, %s11430_s11 }
 0xa36   :  { %v10276_v27 = vpop.f32.mrb[30].mxu0 }
 0xa37   :  { %v2499_v28 = vpop.f32.mrb[31].mxu0  ;;  %v11861_v40 = vadd.f32 %v10276_v27, %v9589_v29 }
 0xa38   :  { %v11863_v42 = vadd.f32 %v9589_v29, %v2499_v28 }
 0xa3a   :  { %v10279_v31 = vpop.f32.mrb[32].mxu0  ;;  %v11867_v43 = vpack.i.bf16 %v11861_v40, %v11863_v42  ;;  %v10898_v44 = vpack.c.bf16 %v11861_v40, %v11863_v42 }
 0xa3b   :  { %v11836_v23 = vadd.f32 %v10279_v31, %v9589_v29  ;;  %v2509_v32 = vpop.f32.mrb[33].mxu0 }
 0xa3c   :  { %v11838_v33 = vadd.f32 %v9589_v29, %v2509_v32 }
 0xa3e   :  { %v10910_v45 = vpack.c.bf16 %v11836_v23, %v11838_v33  ;;  %v11875_v46 = vpack.i.bf16 %v11836_v23, %v11838_v33 }
 0xaa3   :  { %v2603_v37 = vpop.permute.xlu1 %2602  ;;  %v2685_v38 = vpop.permute.xlu0 %2684 }
 0xaa4   :  { %10292 = vmatmul.mubr.msk.f32.vlgmr.msra.gmra.mrb[34].mxu0 %vm253_vm2, %v2603_v37  ;;  %10299 = vmatmul.mubr.msk.f32.vlgmr.msra.gmra.mrb[30].mxu1 %vm253_vm2, %v2685_v38 }
 0xaa5   :  { %10880 = vmatpush3.bf16.xpose.msk.msra.mxu0 %vm11783_vm3, %v10878_v34  ;;  %10884 = vmatpush3.bf16.xpose.msk.msra.mxu1 %vm11783_vm3, %v10882_v36 }
 0xaa6   :  { %10305 = vmatprep.mubr.msk.f32.mxu0 %vm11423_vm1, %v11422_v17  ;;  %10312 = vmatprep.mubr.msk.f32.mxu1 %vm11423_vm1, %v11422_v17 }
 0xaa7   :  { %10889 = vmatprep.subr.bf16.mxu1 %v11431_v5  ;;  %10885 = vmatprep.subr.bf16.mxu0 %v11431_v5  ;;  %v2767_v39 = vpop.permute.xlu1 %2766 }
 0xaac   :  { %10306 = vmatmul.mubr.msk.f32.vlgmr.msra.gmra.mrb[36].mxu0 %vm253_vm2, %v2767_v39  ;;  %10313 = vmatmul.mubr.msk.f32.vlgmr.msra.gmra.mrb[32].mxu1 %vm253_vm2, %v11822_v24 }
 0xaad   :  { %10326 = vmatprep.mubr.msk.f32.mxu1 %vm11423_vm1, %v11422_v17  ;;  %10319 = vmatprep.mubr.msk.f32.mxu0 %vm11423_vm1, %v11422_v17 }
 0xb05   :  { %v2598_v47 = vpop.f32.mrb[28].mxu1 }
 0xb06   :  { %v10286_v41 = vpop.f32.mrb[29].mxu1  ;;  %v3174_v48 = vsel %vm3173_vm4, %v2598_v47, -inf }
 0xb07   :  { %3175 = vmax.xlane.f32.xlu0 %v3174_v48 }
 0xb77   :  { %v2680_v50 = vpop.f32.mrb[34].mxu0  ;;  %v2762_v51 = vpop.f32.mrb[30].mxu1 }
 0xb78   :  { %v10293_v52 = vpop.f32.mrb[35].mxu0  ;;  %v10300_v54 = vpop.f32.mrb[31].mxu1  ;;  %v3177_v55 = vsel %vm3173_vm4, %v2680_v50, -inf  ;;  %v3180_v3 = vsel %vm3173_vm4, %v2762_v51, -inf }
 0xb79   :  { %3178 = vmax.xlane.f32.xlu1 %v3177_v55  ;;  %v11940_v54 = vld [vmem:[#allocation2 + $0x30] sm:$0xff] }
 0xb7a   :  { %v11943_v55 = vld [vmem:[#allocation2 + $0x70] sm:$0xff] }
 0xb7f   :  { %v11879_v56 = vpop.f32.mrb[36].mxu0  ;;  %v11881_v58 = vpop.f32.mrb[32].mxu1 }
 0xb80   :  { %v10307_v60 = vpop.f32.mrb[37].mxu0  ;;  %v10314_v10 = vpop.f32.mrb[33].mxu1  ;;  %v3183_v21 = vsel %vm3173_vm4, %v11879_v56, -inf }
 0xb8a   :  { %11097 = vrot.lane.b32.xlu1 %v11096_v61, %s11429_s10 }
 0xb8e   :  { %11102 = vrot.lane.b32.xlu1 %v11867_v43, %s11424_s27 }
 0xb92   :  { %11107 = vrot.lane.b32.xlu1 %v11096_v61, %s11424_s27 }
 0xb94   :  { %v3176_v62 = vpop.xlane.xlu0 %3175 }
 0xb95   :  { %v3198_v63 = vsub.f32 %v2598_v47, %v3176_v62 }
 0xb97   :  { %v3206_v0 = vmul.f32 1.442695, %v3198_v63 }
 0xb99   :  { %11237 = vpow2.f32 %v3206_v0 }
 0xba3   :  { %v11238_v1 = vpop.eup %11237 }
 0xba4   :  { %v3222_v2 = vsel %vm3173_vm4, %v11238_v1, 0.0 }
 0xba5   :  { %3223 = vadd.xlane.f32.xlu0 %v3222_v2 }
 0xbb6   :  { %3181 = vmax.xlane.f32.xlu1 %v3180_v3 }
 0xbc7   :  { %3091 = vrot.lane.b32.xlu1 %v11822_v24, %s11430_s11 }
 0xc06   :  { %v3179_v53 = vpop.xlane.xlu1 %3178 }
 0xc07   :  { %v3199_v4 = vsub.f32 %v2680_v50, %v3179_v53 }
 0xc09   :  { %v3208_v8 = vmul.f32 1.442695, %v3199_v4 }
 0xc0a   :  { %v11098_v11 = vpop.permute.xlu1 %11097 }
 0xc0b   :  { %11239 = vpow2.f32 %v3208_v8  ;;  %v11100_v12 = vunpack.i.h.bf16 %v11098_v11  ;;  %v11099_v13 = vunpack.i.l.bf16 %v11098_v11 }
 0xc0d   :  { %v10890_v59 = vpack.c.bf16 %v11100_v12, %v11099_v13 }
 0xc0e   :  { %v11103_v14 = vpop.permute.xlu1 %11102 }
 0xc0f   :  { %10892 = vmatpush3.bf16.xpose.msk.msra.mxu1 %vm11783_vm3, %v10890_v59  ;;  %v11105_v32 = vunpack.i.h.bf16 %v11103_v14  ;;  %v11104_v30 = vunpack.i.l.bf16 %v11103_v14  ;;  %v3186_v14 = vsel %vm3173_vm4, %v11881_v58, -inf }
 0xc10   :  { %10897 = vmatprep.subr.bf16.mxu1 %v11431_v5 }
 0xc11   :  { %v10901_v36 = vpack.c.bf16 %v11105_v32, %v11104_v30 }
 0xc12   :  { %v11108_v15 = vpop.permute.xlu1 %11107 }
 0xc13   :  { %v11110_v16 = vunpack.i.h.bf16 %v11108_v15  ;;  %v11109_v18 = vunpack.i.l.bf16 %v11108_v15 }
 0xc15   :  { %v11240_v19 = vpop.eup %11239  ;;  %v10886_v20 = vpack.c.bf16 %v11110_v16, %v11109_v18 }
 0xc16   :  { %v3225_v22 = vsel %vm3173_vm4, %v11240_v19, 0.0 }
 0xc17   :  { %3226 = vadd.xlane.f32.xlu0 %v3225_v22  ;;  %10888 = vmatpush3.bf16.xpose.msk.msra.mxu0 %vm11783_vm3, %v10886_v20 }
 0xc18   :  { %10893 = vmatprep.subr.bf16.mxu0 %v11431_v5 }
 0xc2d   :  { %3009 = vrot.lane.b32.xlu0 %v11822_v24, %s11429_s10 }
 0xc31   :  { %2927 = vrot.lane.b32.xlu0 %v11822_v24, %s11424_s27 }
 0xc32   :  { %v3224_v29 = vpop.xlane.xlu0 %3223 }
 0xc43   :  { %v3182_v25 = vpop.xlane.xlu1 %3181 }
 0xc44   :  { %v3200_v6 = vsub.f32 %v2762_v51, %v3182_v25 }
 0xc46   :  { %v3210_v26 = vmul.f32 1.442695, %v3200_v6 }
 0xc47   :  { %v3092_v51 = vpop.permute.xlu1 %3091 }
 0xc48   :  { %11241 = vpow2.f32 %v3210_v26  ;;  %v11972_v26 = vld [vmem:[#allocation2 + $0xb0] sm:$0xff] }
 0xc49   :  { %11243 = vrcp.f32 %v3224_v29 }
 0xc50   :  { %3184 = vmax.xlane.f32.xlu0 %v3183_v21 }
 0xc52   :  { %v11907_v27 = vpop.eup %11241 }
 0xc53   :  { %v3228_v28 = vsel %vm3173_vm4, %v11907_v27, 0.0  ;;  %v11244_v31 = vpop.eup %11243 }
 0xc54   :  { %v3254_v35 = vmul.f32 %v11244_v31, %v11238_v1 }
 0xc66   :  { %11112 = vrot.lane.b32.xlu0 %v11096_v61, %s11430_s11 }
 0xc85   :  { %3229 = vadd.xlane.f32.xlu0 %v3228_v28 }
 0xc9b   :  { %11122 = vrot.lane.b32.xlu0 %v11867_v43, %s11430_s11 }
 0xca4   :  { %v3227_v24 = vpop.xlane.xlu0 %3226 }
 0xca5   :  { %11245 = vrcp.f32 %v3227_v24 }
 0xca8   :  { %v3010_v9 = vpop.permute.xlu0 %3009 }
 0xca9   :  { %10327 = vmatmul.mubr.msk.f32.vlgmr.msra.gmra.mrb[34].mxu1 %vm253_vm2, %v3010_v9 }
 0xcaa   :  { %10899 = vmatpush3.bf16.msra.mxu1 %v10898_v44  ;;  %10340 = vmatprep.mubr.msk.f32.mxu1 %vm11423_vm1, %v11422_v17 }
 0xcab   :  { %10900 = vmatprep.subr.bf16.mxu1 %v11431_v5 }
 0xcac   :  { %v2928_v34 = vpop.permute.xlu0 %2927 }
 0xcad   :  { %10320 = vmatmul.mubr.msk.f32.vlgmr.msra.gmra.mrb[38].mxu0 %vm253_vm2, %v2928_v34  ;;  %10341 = vmatmul.mubr.msk.f32.vlgmr.msra.gmra.mrb[36].mxu1 %vm3173_vm4, %v3254_v35 }
 0xcae   :  { %10902 = vmatpush3.bf16.msra.mxu1 %v10901_v36  ;;  %10347 = vmatprep.mubr.msk.f32.mxu1 %vm11423_vm1, %v11422_v17 }
 0xcaf   :  { %v11246_v37 = vpop.eup %11245  ;;  %10333 = vmatprep.mubr.msk.f32.mxu0 %vm11423_vm1, %v11422_v17  ;;  %10355 = vmatprep.subr.mxu1 %v11422_v17 }
 0xcb0   :  { %v3255_v38 = vmul.f32 %v11246_v37, %v11240_v19 }
 0xcb2   :  { %10348 = vmatmul.mubr.msk.f32.vlgmr.msra.gmra.mrb[38].mxu1 %vm3173_vm4, %v3255_v38 }
 0xcb3   :  { %10357 = vmatprep.mubr.msk.f32.mxu1 %vm11423_vm1, %v11422_v17  ;;  %10356 = vmatpush3.msra.mxu1 %v11940_v54 }
 0xcb4   :  { %10367 = vmatprep.subr.mxu1 %v11422_v17 }
 0xcdd   :  { %v3185_v39 = vpop.xlane.xlu0 %3184 }
 0xcde   :  { %v3201_v40 = vsub.f32 %v11879_v56, %v3185_v39 }
 0xce0   :  { %v3212_v42 = vmul.f32 1.442695, %v3201_v40 }
 0xce1   :  { %v11113_v44 = vpop.permute.xlu0 %11112 }
 0xce2   :  { %11247 = vpow2.f32 %v3212_v42  ;;  %v11115_v47 = vunpack.i.h.bf16 %v11113_v44  ;;  %v11114_v41 = vunpack.i.l.bf16 %v11113_v44 }
 0xce4   :  { %v10894_v48 = vpack.c.bf16 %v11115_v47, %v11114_v41 }
 0xce6   :  { %10896 = vmatpush3.bf16.xpose.msk.msra.mxu0 %vm11783_vm3, %v10894_v48  ;;  %v11987_v48 = vld [vmem:[#allocation2 + $0xf0] sm:$0xff] }
 0xce7   :  { %10350 = vmatprep.subr.mxu0 %v11422_v17 }
 0xcec   :  { %v11248_v50 = vpop.eup %11247 }
 0xced   :  { %10334 = vmatmul.mubr.msk.f32.vlgmr.msra.gmra.mrb[40].mxu0 %vm253_vm2, %v3092_v51  ;;  %v3231_v52 = vsel %vm3173_vm4, %v11248_v50, 0.0 }
 0xcee   :  { %3232 = vadd.xlane.f32.xlu1 %v3231_v52  ;;  %10352 = vmatprep.mubr.msk.f32.mxu0 %vm11423_vm1, %v11422_v17 }
 0xcef   :  { %10351 = vmatpush3.msra.mxu0 %v11943_v55 }
 0xcf0   :  { %10903 = vmatprep.subr.bf16.mxu0 %v11431_v5 }
 0xcff   :  { %11117 = vrot.lane.b32.xlu1 %v11867_v43, %s11429_s10 }
 0xd12   :  { %v3230_v56 = vpop.xlane.xlu0 %3229 }
 0xd13   :  { %11249 = vrcp.f32 %v3230_v56 }
 0xd16   :  { %v11123_v4 = vpop.permute.xlu0 %11122 }
 0xd17   :  { %v11125_v11 = vunpack.i.h.bf16 %v11123_v4  ;;  %v11124_v12 = vunpack.i.l.bf16 %v11123_v4 }
 0xd19   :  { %v10907_v19 = vpack.c.bf16 %v11125_v11, %v11124_v12 }
 0xd1d   :  { %v11250_v8 = vpop.eup %11249 }
 0xd1e   :  { %v3256_v16 = vmul.f32 %v11250_v8, %v11907_v27 }
 0xd7b   :  { %v3233_v60 = vpop.xlane.xlu1 %3232 }
 0xd7c   :  { %v3087_v10 = vpop.f32.mrb[34].mxu1  ;;  %11251 = vrcp.f32 %v3233_v60 }
 0xd7d   :  { %v10328_v61 = vpop.f32.mrb[35].mxu1  ;;  %v3192_v20 = vsel %vm3173_vm4, %v3087_v10, -inf }
 0xd7f   :  { %v11118_v62 = vpop.permute.xlu1 %11117 }
 0xd80   :  { %v3005_v43 = vpop.f32.mrb[38].mxu0  ;;  %v3331_v63 = vpop.f32.mrb[36].mxu1  ;;  %v11120_v0 = vunpack.i.h.bf16 %v11118_v62  ;;  %v11119_v1 = vunpack.i.l.bf16 %v11118_v62 }
 0xd81   :  { %v10321_v2 = vpop.f32.mrb[39].mxu0  ;;  %v10342_v3 = vpop.f32.mrb[37].mxu1  ;;  %10358 = vmatmul.mubr.msk.f32.vlgmr.msra.gmra.mrb[40].mxu1 %vm253_vm2, %v3331_v63  ;;  %v3189_v53 = vsel %vm3173_vm4, %v3005_v43, -inf }
 0xd82   :  { %3190 = vmax.xlane.f32.xlu1 %v3189_v53  ;;  %10369 = vmatprep.mubr.msk.f32.mxu1 %vm11423_vm1, %v11422_v17  ;;  %v10904_v13 = vpack.c.bf16 %v11120_v0, %v11119_v1 }
 0xd83   :  { %10368 = vmatpush3.msra.mxu1 %v11972_v26 }
 0xd84   :  { %10379 = vmatprep.subr.mxu1 %v11422_v17 }
 0xd85   :  { %v3412_v59 = vpop.f32.mrb[38].mxu1 }
 0xd86   :  { %v10349_v15 = vpop.f32.mrb[39].mxu1  ;;  %10353 = vmatmul.mubr.msk.f32.vlgmr.msra.gmra.mrb[42].mxu0 %vm253_vm2, %v3412_v59  ;;  %3187 = vmax.xlane.f32.xlu1 %v3186_v14  ;;  %v11252_v18 = vpop.eup %11251 }
 0xd87   :  { %10905 = vmatpush3.bf16.msra.mxu0 %v10904_v13  ;;  %10364 = vmatprep.mubr.msk.f32.mxu0 %vm11423_vm1, %v11422_v17  ;;  %v3257_v22 = vmul.f32 %v11252_v18, %v11248_v50 }
 0xd88   :  { %10906 = vmatprep.subr.bf16.mxu0 %v11431_v5 }
 0xd8a   :  { %10365 = vmatmul.mubr.msk.f32.vlgmr.msra.gmra.mrb[44].mxu0 %vm3173_vm4, %v3256_v16  ;;  %3193 = vmax.xlane.f32.xlu1 %v3192_v20 }
 0xd8b   :  { %10908 = vmatpush3.bf16.msra.mxu0 %v10907_v19  ;;  %10376 = vmatprep.mubr.msk.f32.mxu0 %vm11423_vm1, %v11422_v17 }
 0xd8c   :  { %10909 = vmatprep.subr.bf16.mxu0 %v11431_v5 }
 0xd8e   :  { %10377 = vmatmul.mubr.msk.f32.vlgmr.msra.gmra.mrb[46].mxu0 %vm3173_vm4, %v3257_v22 }
 0xd8f   :  { %10911 = vmatpush3.bf16.msra.mxu0 %v10910_v45  ;;  %10388 = vmatprep.mubr.msk.f32.mxu0 %vm11423_vm1, %v11422_v17 }
 0xd90   :  { %10398 = vmatprep.subr.mxu0 %v11422_v17 }
 0xdc0   :  { %v3169_v21 = vpop.f32.mrb[40].mxu0 }
 0xdc1   :  { %v10335_v25 = vpop.f32.mrb[41].mxu0  ;;  %v3195_v6 = vsel %vm3173_vm4, %v3169_v21, -inf }
 0xdc2   :  { %3196 = vmax.xlane.f32.xlu1 %v3195_v6 }
 0xe0f   :  { %v3191_v27 = vpop.xlane.xlu1 %3190 }
 0xe10   :  { %v3203_v28 = vsub.f32 %v3005_v43, %v3191_v27 }
 0xe12   :  { %v3216_v23 = vmul.f32 1.442695, %v3203_v28 }
 0xe13   :  { %v3188_v33 = vpop.xlane.xlu1 %3187 }
 0xe14   :  { %11253 = vpow2.f32 %v3216_v23  ;;  %v3202_v45 = vsub.f32 %v11881_v58, %v3188_v33 }
 0xe16   :  { %v3214_v29 = vmul.f32 1.442695, %v3202_v45 }
 0xe17   :  { %v3194_v24 = vpop.xlane.xlu1 %3193 }
 0xe18   :  { %11255 = vpow2.f32 %v3214_v29  ;;  %v3204_v31 = vsub.f32 %v3087_v10, %v3194_v24 }
 0xe1a   :  { %v3218_v32 = vmul.f32 1.442695, %v3204_v31 }
 0xe1c   :  { %11257 = vpow2.f32 %v3218_v32 }
 0xe1e   :  { %v11254_v30 = vpop.eup %11253 }
 0xe1f   :  { %v3237_v9 = vsel %vm3173_vm4, %v11254_v30, 0.0 }
 0xe20   :  { %3238 = vadd.xlane.f32.xlu0 %v3237_v9 }
 0xe22   :  { %v11256_v35 = vpop.eup %11255 }
 0xe23   :  { %v3234_v36 = vsel %vm3173_vm4, %v11256_v35, 0.0 }
 0xe24   :  { %3235 = vadd.xlane.f32.xlu1 %v3234_v36 }
 0xe26   :  { %v11979_v34 = vpop.eup %11257 }
 0xe27   :  { %v3240_v37 = vsel %vm3173_vm4, %v11979_v34, 0.0 }
 0xe28   :  { %3241 = vadd.xlane.f32.xlu1 %v3240_v37 }
 0xe36   :  { %11127 = vrot.lane.b32.xlu0 %v11875_v46, %s11424_s27 }
 0xe3a   :  { %11132 = vrot.lane.b32.xlu0 %v11875_v46, %s11429_s10 }
 0xe4f   :  { %v3197_v58 = vpop.xlane.xlu1 %3196 }
 0xe50   :  { %v3205_v38 = vsub.f32 %v3169_v21, %v3197_v58 }
 0xe52   :  { %v3220_v39 = vmul.f32 1.442695, %v3205_v38 }
 0xe54   :  { %11259 = vpow2.f32 %v3220_v39  ;;  %v3558_v40 = vpop.f32.mrb[40].mxu1 }
 0xe55   :  { %v10359_v42 = vpop.f32.mrb[41].mxu1 }
 0xe59   :  { %v3485_v44 = vpop.f32.mrb[42].mxu0 }
 0xe5a   :  { %v3559_v47 = vadd.f32 %v3558_v40, %v3485_v44  ;;  %v10354_v41 = vpop.f32.mrb[43].mxu0 }
 0xe5d   :  { %v3637_v50 = vpop.f32.mrb[44].mxu0 }
 0xe5e   :  { %v11989_v51 = vpop.eup %11259  ;;  %v10366_v52 = vpop.f32.mrb[45].mxu0  ;;  %10370 = vmatmul.mubr.msk.f32.vlgmr.msra.gmra.mrb[42].mxu1 %vm253_vm2, %v3637_v50 }
 0xe5f   :  { %v3243_v56 = vsel %vm3173_vm4, %v11989_v51, 0.0  ;;  %10380 = vmatpush3.msra.mxu1 %v11987_v48  ;;  %10381 = vmatprep.mubr.msk.f32.mxu1 %vm11423_vm1, %v11422_v17 }
 0xe60   :  { %3244 = vadd.xlane.f32.xlu1 %v3243_v56  ;;  %10912 = vmatprep.subr.bf16.mxu1 %v11431_v5  ;;  %v9635_v56 = vld [vmem:[%s12732_s6 + $0xb] ss:$0 sm:$0xff] }
 0xe61   :  { %v3790_v60 = vpop.f32.mrb[46].mxu0 }
 0xe62   :  { %v10378_v10 = vpop.f32.mrb[47].mxu0  ;;  %10382 = vmatmul.mubr.msk.f32.vlgmr.msra.gmra.mrb[44].mxu1 %vm253_vm2, %v3790_v60 }
 0xe63   :  { %10395 = vmatprep.mubr.msk.f32.mxu1 %vm11423_vm1, %v11422_v17  ;;  %v9636_v10 = vld [vmem:[%s12732_s6 + $0xc] ss:$0 sm:$0xff] }
 0xe71   :  { %11137 = vrot.lane.b32.xlu1 %v11875_v46, %s11430_s11 }
 0xead   :  { %v3239_v61 = vpop.xlane.xlu0 %3238 }
 0xeae   :  { %11261 = vrcp.f32 %v3239_v61 }
 0xeb1   :  { %v11128_v62 = vpop.permute.xlu0 %11127  ;;  %v3236_v43 = vpop.xlane.xlu1 %3235 }
 0xeb2   :  { %v11130_v63 = vunpack.i.h.bf16 %v11128_v62  ;;  %v11129_v0 = vunpack.i.l.bf16 %v11128_v62  ;;  %11263 = vrcp.f32 %v3236_v43 }
 0xeb4   :  { %v10913_v1 = vpack.c.bf16 %v11130_v63, %v11129_v0 }
 0xeb5   :  { %v3242_v16 = vpop.xlane.xlu1 %3241  ;;  %v11133_v19 = vpop.permute.xlu0 %11132 }
 0xeb6   :  { %10914 = vmatpush3.bf16.msra.mxu1 %v10913_v1  ;;  %11265 = vrcp.f32 %v3242_v16  ;;  %v11135_v20 = vunpack.i.h.bf16 %v11133_v19  ;;  %v11134_v22 = vunpack.i.l.bf16 %v11133_v19  ;;  %v4531_v16 = vld [vmem:[#allocation2 + $0xf8] sm:$0xff]  ;;  %v4624_v19 = vld [vmem:[%s12731_s5 + $0x10] sm:$0xff] }
 0xeb7   :  { %10403 = vmatprep.subr.mxu1 %v11422_v17 }
 0xeb8   :  { %v11262_v2 = vpop.eup %11261  ;;  %v10916_v6 = vpack.c.bf16 %v11135_v20, %v11134_v22  ;;  %v4625_v22 = vld [vmem:[%s12731_s5 + $0x18] sm:$0xff] }
 0xeb9   :  { %v3259_v3 = vmul.f32 %v11262_v2, %v11254_v30 }
 0xebb   :  { %10396 = vmatmul.mubr.msk.f32.vlgmr.msra.gmra.mrb[46].mxu1 %vm3173_vm4, %v3259_v3 }
 0xebc   :  { %v11264_v53 = vpop.eup %11263  ;;  %10404 = vmatpush3.msra.mxu1 %v11940_v54  ;;  %10405 = vmatprep.mubr.msk.f32.mxu1 %vm11423_vm1, %v11422_v17  ;;  %v12017_v54 = vld [vmem:[%s12732_s6 + $0x6] ss:$0 sm:$0xff] }
 0xebd   :  { %v3258_v46 = vmul.f32 %v11264_v53, %v11256_v35  ;;  %10415 = vmatprep.subr.mxu1 %v11422_v17 }
 0xebf   :  { %10389 = vmatmul.mubr.msk.f32.vlgmr.msra.gmra.mrb[48].mxu0 %vm3173_vm4, %v3258_v46 }
 0xec0   :  { %10399 = vmatpush3.msra.mxu0 %v11943_v55  ;;  %10400 = vmatprep.mubr.msk.f32.mxu0 %vm11423_vm1, %v11422_v17  ;;  %v11266_v25 = vpop.eup %11265 }
 0xec1   :  { %10915 = vmatprep.subr.bf16.mxu0 %v11431_v5 }
 0xeed   :  { %v3245_v18 = vpop.xlane.xlu1 %3244 }
 0xeee   :  { %11267 = vrcp.f32 %v3245_v18  ;;  %v4623_v18 = vld [vmem:[%s12731_s5 + $0x8] sm:$0xff] }
 0xef1   :  { %v11138_v21 = vpop.permute.xlu1 %11137 }
 0xef2   :  { %v11140_v27 = vunpack.i.h.bf16 %v11138_v21  ;;  %v11139_v28 = vunpack.i.l.bf16 %v11138_v21  ;;  %v10933_v21 = vpack.c.bf16 %v4625_v22, %v4624_v19  ;;  %v9644_v19 = vld [vmem:[%s12732_s6 + $0xe] ss:$0 sm:$0xff] }
 0xef4   :  { %v10919_v29 = vpack.c.bf16 %v11140_v27, %v11139_v28 }
 0xef8   :  { %v11268_v45 = vpop.eup %11267 }
 0xef9   :  { %v3261_v32 = vmul.f32 %v11268_v45, %v11989_v51 }
 0xf31   :  { %v3710_v4 = vpop.f32.mrb[42].mxu1 }
 0xf32   :  { %v3714_v8 = vadd.f32 %v3710_v4, %v3559_v47  ;;  %v10371_v11 = vpop.f32.mrb[43].mxu1 }
 0xf35   :  { %v3863_v12 = vpop.f32.mrb[44].mxu1 }
 0xf36   :  { %v3867_v13 = vadd.f32 %v3863_v12, %v3714_v8  ;;  %v10383_v59 = vpop.f32.mrb[45].mxu1 }
 0xf37   :  { %v4528_v59 = vld [vmem:[#allocation2 + $0x38] sm:$0xff] }
 0xf38   :  { %v4480_v14 = vadd.f32 %v12017_v54, %v3867_v13 }
 0xf3a   :  { %v4482_v55 = vadd.f32 %v4480_v14, %v11742_v7  ;;  %v3260_v7 = vmul.f32 %v11266_v25, %v11979_v34  ;;  %v4529_v14 = vld [vmem:[#allocation2 + $0x78] sm:$0xff]  ;;  %v4626_v25 = vld [vmem:[%s12731_s5 + $0x20] sm:$0xff] }
 0xf3c   :  { %v4486_v15 = vsel %vm71_vm0, %v4482_v55, 0.0 }
 0xf3d   :  { %4487 = vadd.xlane.f32.xlu0 %v4486_v15  ;;  %v4530_v15 = vld [vmem:[#allocation2 + $0xb8] sm:$0xff] }
 0xf8e   :  { %v4018_v23 = vpop.f32.mrb[46].mxu1 }
 0xf8f   :  { %v10397_v33 = vpop.f32.mrb[47].mxu1  ;;  %10401 = vmatmul.mubr.msk.f32.vlgmr.msra.gmra.mrb[50].mxu0 %vm253_vm2, %v4018_v23 }
 0xf90   :  { %10917 = vmatpush3.bf16.msra.mxu0 %v10916_v6  ;;  %10412 = vmatprep.mubr.msk.f32.mxu0 %vm11423_vm1, %v11422_v17  ;;  %v4627_v6 = vld [vmem:[%s12731_s5 + $0x28] sm:$0xff] }
 0xf91   :  { %10918 = vmatprep.subr.bf16.mxu0 %v11431_v5  ;;  %v10937_v27 = vpack.c.bf16 %v4627_v6, %v4626_v25 }
 0xf92   :  { %v3937_v24 = vpop.f32.mrb[48].mxu0 }
 0xf93   :  { %v10390_v31 = vpop.f32.mrb[49].mxu0  ;;  %10406 = vmatmul.mubr.msk.f32.vlgmr.msra.gmra.mrb[48].mxu1 %vm253_vm2, %v3937_v24  ;;  %10413 = vmatmul.mubr.msk.f32.vlgmr.msra.gmra.mrb[52].mxu0 %vm3173_vm4, %v3260_v7 }
 0xf94   :  { %10920 = vmatpush3.bf16.msra.mxu0 %v10919_v29  ;;  %10424 = vmatprep.mubr.msk.f32.mxu0 %vm11423_vm1, %v11422_v17  ;;  %v4628_v31 = vld [vmem:[%s12731_s5 + $0x30] sm:$0xff] }
 0xf95   :  { %10416 = vmatpush3.msra.mxu1 %v11972_v26  ;;  %10417 = vmatprep.mubr.msk.f32.mxu1 %vm11423_vm1, %v11422_v17 }
 0xf96   :  { %10427 = vmatprep.subr.mxu1 %v11422_v17 }
 0xf97   :  { %10425 = vmatmul.mubr.msk.f32.vlgmr.msra.gmra.mrb[54].mxu0 %vm3173_vm4, %v3261_v32  ;;  %v4629_v32 = vld [vmem:[%s12731_s5 + $0x38] sm:$0xff] }
 0xfca   :  { %v4488_v30 = vpop.xlane.xlu0 %4487 }
 0xfcb   :  { %v4492_v9 = vmul.f32 0.03125, %v4488_v30  ;;  %v10941_v30 = vpack.c.bf16 %v4629_v32, %v4628_v31  ;;  %v9648_v31 = vld [vmem:[%s12732_s6 + $0xf] ss:$0 sm:$0xff] }
 0xfcd   :  { %v4494_v35 = vsub.f32 %v4482_v55, %v4492_v9  ;;  %v10921_v55 = vpack.c.bf16 %v4529_v14, %v4528_v59  ;;  %v9637_v9 = vld [vmem:[%s12732_s6 + $0x7] ss:$0 sm:$0xff] }
 0xfcf   :  { %v4496_v36 = vmul.f32 %v4494_v35, %v4494_v35  ;;  %10922 = vmatprep.subr.bf16.mxu0 %v10921_v55 }
 0xfd0   :  { %10924 = vmatpush3.bf16.msra.mxu0 %v10921_v55 }
 0xfd1   :  { %v4498_v34 = vsel %vm71_vm0, %v4496_v36, 0.0 }
 0xfd2   :  { %4499 = vadd.xlane.f32.xlu0 %v4498_v34 }
0x105f   :  { %v4500_v37 = vpop.xlane.xlu0 %4499 }
0x1060   :  { %v4504_v58 = vmul.f32 0.03125, %v4500_v37 }
0x1062   :  { %v4506_v38 = vadd.f32 1e-05, %v4504_v58  ;;  %v4091_v39 = vpop.f32.mrb[50].mxu0 }
0x1063   :  { %v10402_v40 = vpop.f32.mrb[51].mxu0 }
0x1064   :  { %11269 = vrsqrt.f32 %v4506_v38 }
0x1066   :  { %v4164_v26 = vpop.f32.mrb[48].mxu1  ;;  %v4243_v42 = vpop.f32.mrb[52].mxu0 }
0x1067   :  { %v4165_v44 = vadd.f32 %v4164_v26, %v4091_v39  ;;  %v10407_v47 = vpop.f32.mrb[49].mxu1  ;;  %v10414_v41 = vpop.f32.mrb[53].mxu0  ;;  %10418 = vmatmul.mubr.msk.f32.vlgmr.msra.gmra.mrb[50].mxu1 %vm253_vm2, %v4243_v42  ;;  %v9640_v39 = vld [vmem:[%s12732_s6 + $0x8] ss:$0 sm:$0xff] }
0x1068   :  { %10428 = vmatpush3.msra.mxu1 %v11987_v48  ;;  %10429 = vmatprep.mubr.msk.f32.mxu1 %vm11423_vm1, %v11422_v17 }
0x106a   :  { %v4396_v50 = vpop.f32.mrb[54].mxu0 }
0x106b   :  { %v10426_v51 = vpop.f32.mrb[55].mxu0  ;;  %10430 = vmatmul.mubr.msk.f32.vlgmr.msra.gmra.mrb[52].mxu1 %vm253_vm2, %v4396_v50 }
0x106e   :  { %v11270_v52 = vpop.eup %11269 }
0x106f   :  { %v4510_v60 = vmul.f32 %v11270_v52, %v4494_v35 }
0x1071   :  { %v4518_v61 = vmul.f32 %v9635_v56, %v4510_v60 }
0x1073   :  { %v12049_v62 = vadd.f32 %v9636_v10, %v4518_v61 }
0x1075   :  { %10440 = vmatprep.mubr.msk.f32.mxu0 %vm71_vm0, %v12049_v62 }
0x113a   :  { %v4316_v48 = vpop.f32.mrb[50].mxu1 }
0x113b   :  { %v4320_v43 = vadd.f32 %v4316_v48, %v4165_v44  ;;  %v10419_v63 = vpop.f32.mrb[51].mxu1 }
0x113e   :  { %v4469_v0 = vpop.f32.mrb[52].mxu1 }
0x113f   :  { %v4473_v1 = vadd.f32 %v4469_v0, %v4320_v43  ;;  %v10431_v2 = vpop.f32.mrb[53].mxu1 }
0x1140   :  { %v4813_v2 = vld [vmem:[#allocation2 + $0x140] sm:$0xff] }
0x1141   :  { %v4481_v3 = vadd.f32 %v12017_v54, %v4473_v1  ;;  %v10925_v54 = vpack.c.bf16 %v4531_v16, %v4530_v15  ;;  %v4812_v1 = vld [vmem:[#allocation2 + $0x100] sm:$0xff] }
0x1143   :  { %v4483_v53 = vadd.f32 %v4481_v3, %v11773_v49  ;;  %10926 = vmatprep.subr.bf16.mxu0 %v10925_v54  ;;  %v4622_v49 = vld [vmem:[%s12731_s5] sm:$0xff]  ;;  %v10945_v3 = vpack.c.bf16 %v4813_v2, %v4812_v1 }
0x1144   :  { %10928 = vmatpush3.bf16.msra.mxu0 %v10925_v54  ;;  %v10929_v20 = vpack.c.bf16 %v4623_v18, %v4622_v49  ;;  %v9643_v49 = vld [vmem:[%s12732_s6 + $0xd] ss:$0 sm:$0xff] }
0x1145   :  { %v4489_v46 = vsel %vm71_vm0, %v4483_v53, 0.0  ;;  %10946 = vmatprep.subr.bf16.mxu0 %v10945_v3 }
0x1146   :  { %4490 = vadd.xlane.f32.xlu1 %v4489_v46  ;;  %10930 = vmatprep.subr.bf16.mxu1 %v10929_v20  ;;  %v4815_v46 = vld [vmem:[#allocation2 + $0x1c0] sm:$0xff] }
0x1147   :  { %10932 = vmatpush3.bf16.msra.mxu1 %v10929_v20 }
0x1148   :  { %10934 = vmatprep.subr.bf16.mxu1 %v10933_v21 }
0x114b   :  { %10936 = vmatpush3.bf16.msra.mxu1 %v10933_v21 }
0x114c   :  { %10938 = vmatprep.subr.bf16.mxu1 %v10937_v27 }
0x114f   :  { %10940 = vmatpush3.bf16.msra.mxu1 %v10937_v27  ;;  %v12109_v27 = vld [vmem:[%s12729_s3] sm:$0xff] }
0x1150   :  { %10942 = vmatprep.subr.bf16.mxu1 %v10941_v30 }
0x1153   :  { %10944 = vmatpush3.bf16.msra.mxu1 %v10941_v30 }
0x1154   :  { %10484 = vmatprep.subr.mxu1 %v11422_v17 }
0x11d3   :  { %v4491_v4 = vpop.xlane.xlu1 %4490 }
0x11d4   :  { %v4493_v8 = vmul.f32 0.03125, %v4491_v4 }
0x11d6   :  { %v4495_v11 = vsub.f32 %v4483_v53, %v4493_v8  ;;  %v4814_v53 = vld [vmem:[#allocation2 + $0x180] sm:$0xff]  ;;  %v4905_v8 = vld [vmem:[#allocation2 + $0x108] sm:$0xff] }
0x11d7   :  { %v10949_v4 = vpack.c.bf16 %v4815_v46, %v4814_v53 }
0x11d8   :  { %v4497_v12 = vmul.f32 %v4495_v11, %v4495_v11 }
0x11da   :  { %v4501_v13 = vsel %vm71_vm0, %v4497_v12, 0.0 }
0x11db   :  { %4502 = vadd.xlane.f32.xlu0 %v4501_v13 }
0x1268   :  { %v4503_v28 = vpop.xlane.xlu0 %4502 }
0x1269   :  { %v4505_v23 = vmul.f32 0.03125, %v4503_v28 }
0x126b   :  { %v4507_v33 = vadd.f32 1e-05, %v4505_v23  ;;  %v4907_v23 = vld [vmem:[#allocation2 + $0x188] sm:$0xff] }
0x126d   :  { %11271 = vrsqrt.f32 %v4507_v33  ;;  %v4908_v33 = vld [vmem:[#allocation2 + $0x1c8] sm:$0xff] }
0x1277   :  { %v11272_v7 = vpop.eup %11271 }
0x1278   :  { %v4511_v45 = vmul.f32 %v11272_v7, %v4495_v11  ;;  %v4906_v11 = vld [vmem:[#allocation2 + $0x148] sm:$0xff] }
0x1279   :  { %v10953_v12 = vpack.c.bf16 %v4906_v11, %v4905_v8 }
0x127a   :  { %v4519_v29 = vmul.f32 %v9635_v56, %v4511_v45  ;;  %v12119_v45 = vld [vmem:[%s12729_s3 + $0x8] sm:$0xff] }
0x127c   :  { %v4527_v24 = vadd.f32 %v9636_v10, %v4519_v29 }
0x127e   :  { %10441 = vmatmul.mubr.msk.f32.vlgmr.msra.gmra.mrb[56].mxu0 %vm71_vm0, %v4527_v24 }
0x127f   :  { %10948 = vmatpush3.bf16.msra.mxu0 %v10945_v3 }
0x1280   :  { %10950 = vmatprep.subr.bf16.mxu0 %v10949_v4 }
0x1283   :  { %10952 = vmatpush3.bf16.msra.mxu0 %v10949_v4 }
0x1284   :  { %10954 = vmatprep.subr.bf16.mxu0 %v10953_v12 }
0x1351   :  { %v10442_v35 = vpop.f32.mrb[56].mxu0 }
0x1352   :  { %v4617_v36 = vadd.f32 %v10442_v35, %v9637_v9  ;;  %v4611_v34 = vpop.f32.mrb[57].mxu0  ;;  %v9652_v35 = vld [vmem:[%s12732_s6 + $0x10] ss:$0 sm:$0xff] }
0x1353   :  { %v4612_v37 = vadd.f32 %v9637_v9, %v4611_v34 }
0x1354   :  { %v4621_v38 = vmax.f32 %v4617_v36, 0.0 }
0x1355   :  { %v4620_v58 = vmax.f32 %v4612_v37, 0.0 }
0x1357   :  { %10459 = vmatprep.mubr.msk.f32.mxu1 %vm4637_vm5, %v4620_v58 }
0x1358   :  { %10460 = vmatmul.mubr.msk.f32.vlgmr.msra.gmra.mrb[54].mxu1 %vm4637_vm5, %v4621_v38 }
0x1359   :  { %10486 = vmatprep.mubr.msk.f32.mxu1 %vm11423_vm1, %v11422_v17 }
0x142b   :  { %v10461_v40 = vpop.f32.mrb[54].mxu1 }
0x142c   :  { %v4710_v26 = vpop.f32.mrb[55].mxu1  ;;  %v4716_v42 = vadd.f32 %v10461_v40, %v9640_v39 }
0x142d   :  { %v4711_v44 = vadd.f32 %v9640_v39, %v4710_v26 }
0x142e   :  { %v4720_v50 = vadd.f32 %v4716_v42, %v4527_v24  ;;  %v10957_v24 = vpack.c.bf16 %v4908_v33, %v4907_v23 }
0x142f   :  { %v4719_v47 = vadd.f32 %v4711_v44, %v12049_v62 }
0x1430   :  { %v4726_v51 = vsel %vm71_vm0, %v4720_v50, 0.0 }
0x1431   :  { %v4723_v41 = vsel %vm71_vm0, %v4719_v47, 0.0 }
0x1432   :  { %4724 = vadd.xlane.f32.xlu0 %v4723_v41 }
0x1436   :  { %4727 = vadd.xlane.f32.xlu0 %v4726_v51 }
0x14bf   :  { %v4725_v52 = vpop.xlane.xlu0 %4724 }
0x14c0   :  { %v4729_v56 = vmul.f32 0.03125, %v4725_v52 }
0x14c2   :  { %v4731_v60 = vsub.f32 %v4719_v47, %v4729_v56 }
0x14c3   :  { %v4728_v10 = vpop.xlane.xlu0 %4727 }
0x14c4   :  { %v4730_v61 = vmul.f32 0.03125, %v4728_v10  ;;  %v4733_v48 = vmul.f32 %v4731_v60, %v4731_v60 }
0x14c6   :  { %v4732_v43 = vsub.f32 %v4720_v50, %v4730_v61  ;;  %v4735_v63 = vsel %vm71_vm0, %v4733_v48, 0.0 }
0x14c7   :  { %4736 = vadd.xlane.f32.xlu0 %v4735_v63 }
0x14c8   :  { %v4734_v0 = vmul.f32 %v4732_v43, %v4732_v43 }
0x14ca   :  { %v4738_v62 = vsel %vm71_vm0, %v4734_v0, 0.0 }
0x14cb   :  { %4739 = vadd.xlane.f32.xlu0 %v4738_v62 }
0x1554   :  { %v4737_v13 = vpop.xlane.xlu0 %4736 }
0x1555   :  { %v4741_v59 = vmul.f32 0.03125, %v4737_v13 }
0x1557   :  { %v4743_v14 = vadd.f32 1e-05, %v4741_v59 }
0x1558   :  { %v4740_v55 = vpop.xlane.xlu0 %4739 }
0x1559   :  { %11273 = vrsqrt.f32 %v4743_v14  ;;  %v4742_v15 = vmul.f32 0.03125, %v4740_v55 }
0x155b   :  { %v4744_v16 = vadd.f32 1e-05, %v4742_v15 }
0x155d   :  { %11275 = vrsqrt.f32 %v4744_v16 }
0x1563   :  { %v11274_v54 = vpop.eup %11273 }
0x1564   :  { %v4747_v18 = vmul.f32 %v11274_v54, %v4731_v60 }
0x1566   :  { %v4755_v20 = vmul.f32 %v9643_v49, %v4747_v18 }
0x1567   :  { %v11276_v22 = vpop.eup %11275 }
0x1568   :  { %v12104_v21 = vadd.f32 %v9644_v19, %v4755_v20  ;;  %v4748_v25 = vmul.f32 %v11276_v22, %v4732_v43 }
0x156a   :  { %v4756_v6 = vmul.f32 %v9643_v49, %v4748_v25  ;;  %v4809_v28 = vadd.f32 %v12109_v27, %v12104_v21 }
0x156c   :  { %v12113_v7 = vadd.f32 %v9644_v19, %v4756_v6  ;;  %10470 = vmatprep.mubr.msk.f32.mxu0 %vm71_vm0, %v4809_v28 }
0x156e   :  { %v4810_v29 = vadd.f32 %v12119_v45, %v12113_v7 }
0x1570   :  { %10471 = vmatmul.mubr.msk.f32.vlgmr.msra.gmra.mrb[58].mxu0 %vm71_vm0, %v4810_v29 }
0x1571   :  { %10956 = vmatpush3.bf16.msra.mxu0 %v10953_v12  ;;  %10481 = vmatprep.mubr.msk.f32.mxu0 %vm71_vm0, %v12104_v21 }
0x1572   :  { %10958 = vmatprep.subr.bf16.mxu0 %v10957_v24 }
0x1575   :  { %10960 = vmatpush3.bf16.msra.mxu0 %v10957_v24 }
0x1576   :  { %10494 = vmatprep.subr.mxu0 %v11422_v17 }
0x1578   :  { %10482 = vmatmul.mubr.msk.f32.vlgmr.msra.gmra.mrb[60].mxu0 %vm71_vm0, %v12113_v7 }
0x1579   :  { %10496 = vmatprep.mubr.msk.f32.mxu0 %vm11423_vm1, %v11422_v17 }
0x1643   :  { %v10472_v32 = vpop.f32.mrb[58].mxu0 }
0x1644   :  { %v4896_v30 = vpop.f32.mrb[59].mxu0  ;;  %v12145_v58 = vadd.f32 %v10472_v32, %v9648_v31 }
0x1645   :  { %v4897_v9 = vadd.f32 %v9648_v31, %v4896_v30 }
0x1647   :  { %5081 = vrot.lane.b32.xlu0 %v4897_v9, %s11427_s30  ;;  %5003 = vrot.lane.b32.xlu1 %v4897_v9, %s11425_s28 }
0x164b   :  { %v10483_v36 = vpop.f32.mrb[60].mxu0  ;;  %5157 = vrot.lane.b32.xlu0 %v4897_v9, %s11429_s10  ;;  %5079 = vrot.lane.b32.xlu1 %v4897_v9, %s11424_s27 }
0x164c   :  { %v12141_v34 = vadd.f32 %v10483_v36, %v9652_v35  ;;  %v4988_v37 = vpop.f32.mrb[61].mxu0 }
0x164d   :  { %v12179_v63 = vadd.f32 %v9652_v35, %v4988_v37 }
0x164f   :  { %5235 = vrot.lane.b32.xlu0 %v4897_v9, %s11430_s11  ;;  %5159 = vrot.lane.b32.xlu1 %v4897_v9, %s11426_s29 }
0x1653   :  { %5392 = vrot.lane.b32.xlu0 %v12145_v58, %s11427_s30  ;;  %5237 = vrot.lane.b32.xlu1 %v4897_v9, %s11428_s9 }
0x16b9   :  { %v5082_v38 = vpop.permute.xlu0 %5081  ;;  %v5004_v39 = vpop.permute.xlu1 %5003 }
0x16ba   :  { %10485 = vmatpush3.xpose.msk.msra.mxu1 %vm253_vm2, %v5004_v39 }
0x16bb   :  { %10489 = vmatprep.subr.mxu1 %v11422_v17 }
0x16bd   :  { %v5158_v40 = vpop.permute.xlu0 %5157  ;;  %10487 = vmatmul.mubr.msk.f32.vlgmr.msra.gmra.mrb[56].mxu1 %vm253_vm2, %v4897_v9  ;;  %v5080_v26 = vpop.permute.xlu1 %5079 }
0x16be   :  { %10490 = vmatpush3.xpose.msk.msra.mxu1 %vm253_vm2, %v5082_v38  ;;  %10491 = vmatprep.mubr.msk.f32.mxu1 %vm11423_vm1, %v11422_v17 }
0x16bf   :  { %10499 = vmatprep.subr.mxu1 %v11422_v17 }
0x16c1   :  { %10492 = vmatmul.mubr.msk.f32.vlgmr.msra.gmra.mrb[58].mxu1 %vm253_vm2, %v5080_v26  ;;  %v5160_v42 = vpop.permute.xlu1 %5159  ;;  %v5236_v44 = vpop.permute.xlu0 %5235 }
0x16c2   :  { %10495 = vmatpush3.xpose.msk.msra.mxu0 %vm253_vm2, %v5160_v42  ;;  %10501 = vmatprep.mubr.msk.f32.mxu1 %vm11423_vm1, %v11422_v17 }
0x16c3   :  { %10504 = vmatprep.subr.mxu0 %v11422_v17 }
0x16c5   :  { %10497 = vmatmul.mubr.msk.f32.vlgmr.msra.gmra.mrb[62].mxu0 %vm253_vm2, %v5158_v40  ;;  %v5238_v47 = vpop.permute.xlu1 %5237  ;;  %v5393_v41 = vpop.permute.xlu0 %5392 }
0x16c6   :  { %10500 = vmatpush3.xpose.msk.msra.mxu1 %vm253_vm2, %v5238_v47  ;;  %10506 = vmatprep.mubr.msk.f32.mxu0 %vm11423_vm1, %v11422_v17 }
0x16c7   :  { %10509 = vmatprep.subr.mxu1 %v11422_v17 }
0x16c9   :  { %10502 = vmatmul.mubr.msk.f32.vlgmr.msra.gmra.mrb[60].mxu1 %vm253_vm2, %v5236_v44 }
0x16ca   :  { %10510 = vmatpush3.xpose.msk.msra.mxu1 %vm253_vm2, %v5393_v41  ;;  %10511 = vmatprep.mubr.msk.f32.mxu1 %vm11423_vm1, %v11422_v17 }
0x16cb   :  { %10519 = vmatprep.subr.mxu1 %v11422_v17 }
0x1790   :  { %v5075_v50 = vpop.f32.mrb[56].mxu1 }
0x1791   :  { %v10488_v51 = vpop.f32.mrb[57].mxu1  ;;  %v5624_v59 = vsel %vm253_vm2, %v5075_v50, -inf }
0x1794   :  { %v5153_v52 = vpop.f32.mrb[58].mxu1 }
0x1795   :  { %v10493_v56 = vpop.f32.mrb[59].mxu1  ;;  %v5627_v60 = vsel %vm253_vm2, %v5153_v52, -inf }
0x1796   :  { %5628 = vmax.xlane.f32.xlu1 %v5627_v60 }
0x1798   :  { %v5231_v10 = vpop.f32.mrb[62].mxu0 }
0x1799   :  { %v10498_v61 = vpop.f32.mrb[63].mxu0  ;;  %v5630_v0 = vsel %vm253_vm2, %v5231_v10, -inf }
0x179c   :  { %v12173_v48 = vpop.f32.mrb[60].mxu1 }
0x179d   :  { %v10503_v43 = vpop.f32.mrb[61].mxu1  ;;  %v5633_v14 = vsel %vm253_vm2, %v12173_v48, -inf }
0x17a7   :  { %5390 = vrot.lane.b32.xlu1 %v12145_v58, %s11424_s27 }
0x17ab   :  { %5548 = vrot.lane.b32.xlu1 %v12145_v58, %s11428_s9 }
0x17af   :  { %5786 = vrot.lane.b32.xlu1 %v12179_v63, %s11424_s27 }
0x17d3   :  { %5631 = vmax.xlane.f32.xlu1 %v5630_v0 }
0x1823   :  { %v5629_v62 = vpop.xlane.xlu1 %5628 }
0x1824   :  { %v5649_v1 = vsub.f32 %v5153_v52, %v5629_v62  ;;  %v12239_v52 = vld [vmem:[#allocation2 + $0x150] sm:$0xff] }
0x1826   :  { %v5658_v2 = vmul.f32 1.442695, %v5649_v1 }
0x1827   :  { %v5391_v3 = vpop.permute.xlu1 %5390 }
0x1828   :  { %11277 = vpow2.f32 %v5658_v2  ;;  %10512 = vmatmul.mubr.msk.f32.vlgmr.msra.gmra.mrb[62].mxu1 %vm253_vm2, %v5391_v3  ;;  %v4997_v3 = vld [vmem:[#allocation2 + $0x110] sm:$0xff] }
0x1829   :  { %10521 = vmatprep.mubr.msk.f32.mxu1 %vm11423_vm1, %v11422_v17 }
0x182b   :  { %v5549_v53 = vpop.permute.xlu1 %5548 }
0x182c   :  { %10520 = vmatpush3.xpose.msk.msra.mxu1 %vm253_vm2, %v5549_v53 }
0x182d   :  { %10529 = vmatprep.subr.mxu1 %v11422_v17 }
0x182f   :  { %v5787_v8 = vpop.permute.xlu1 %5786 }
0x1832   :  { %v11278_v46 = vpop.eup %11277 }
0x1833   :  { %v5675_v4 = vsel %vm253_vm2, %v11278_v46, 0.0 }
0x1834   :  { %5676 = vadd.xlane.f32.xlu0 %v5675_v4 }
0x184a   :  { %5546 = vrot.lane.b32.xlu0 %v12145_v58, %s11430_s11 }
0x1860   :  { %v5632_v11 = vpop.xlane.xlu1 %5631 }
0x1861   :  { %v5650_v12 = vsub.f32 %v5231_v10, %v5632_v11 }
0x1863   :  { %v5660_v13 = vmul.f32 1.442695, %v5650_v12 }
0x1865   :  { %11279 = vpow2.f32 %v5660_v13 }
0x1869   :  { %5625 = vmax.xlane.f32.xlu0 %v5624_v59  ;;  %v12269_v59 = vld [vmem:[#allocation2 + $0x190] sm:$0xff] }
0x186d   :  { %5634 = vmax.xlane.f32.xlu0 %v5633_v14 }
0x186f   :  { %v12195_v55 = vpop.eup %11279 }
0x1870   :  { %v5678_v15 = vsel %vm253_vm2, %v12195_v55, 0.0 }
0x1871   :  { %5679 = vadd.xlane.f32.xlu1 %v5678_v15 }
0x1882   :  { %5314 = vrot.lane.b32.xlu1 %v12145_v58, %s11425_s28 }
0x1886   :  { %5468 = vrot.lane.b32.xlu1 %v12145_v58, %s11429_s10 }
0x188a   :  { %6008 = vrot.lane.b32.xlu1 %v12179_v63, %s11429_s10 }
0x18c1   :  { %v5677_v16 = vpop.xlane.xlu0 %5676 }
0x18c2   :  { %11281 = vrcp.f32 %v5677_v16 }
0x18c5   :  { %v5547_v54 = vpop.permute.xlu0 %5546 }
0x18c6   :  { %10522 = vmatmul.mubr.msk.f32.vlgmr.msra.gmra.mrb[64].mxu1 %vm253_vm2, %v5547_v54 }
0x18c7   :  { %10530 = vmatpush3.msra.mxu1 %v5787_v8  ;;  %10531 = vmatprep.mubr.msk.f32.mxu1 %vm11423_vm1, %v11422_v17 }
0x18c8   :  { %10539 = vmatprep.subr.mxu1 %v11422_v17 }
0x18cc   :  { %v11282_v49 = vpop.eup %11281 }
0x18cd   :  { %v5705_v18 = vmul.f32 %v11282_v49, %v11278_v46 }
0x18cf   :  { %10532 = vmatmul.mubr.msk.f32.vlgmr.msra.gmra.mrb[66].mxu1 %vm253_vm2, %v5705_v18  ;;  %v12277_v18 = vld [vmem:[#allocation2 + $0x1d0] sm:$0xff] }
0x18d0   :  { %10541 = vmatprep.mubr.msk.f32.mxu1 %vm11423_vm1, %v11422_v17  ;;  %10540 = vmatpush3.msra.mxu1 %v4997_v3 }
0x18d1   :  { %10549 = vmatprep.subr.mxu1 %v11422_v17 }
0x18f6   :  { %v5626_v19 = vpop.xlane.xlu0 %5625 }
0x18f7   :  { %v5648_v20 = vsub.f32 %v5075_v50, %v5626_v19 }
0x18f9   :  { %v5656_v22 = vmul.f32 1.442695, %v5648_v20 }
0x18fa   :  { %v5635_v31 = vpop.xlane.xlu0 %5634 }
0x18fb   :  { %11283 = vpow2.f32 %v5656_v22  ;;  %v5464_v25 = vpop.f32.mrb[62].mxu1  ;;  %v5651_v32 = vsub.f32 %v12173_v48, %v5635_v31 }
0x18fc   :  { %v10513_v6 = vpop.f32.mrb[63].mxu1  ;;  %v5639_v28 = vsel %vm253_vm2, %v5464_v25, -inf }
0x18fd   :  { %5640 = vmax.xlane.f32.xlu1 %v5639_v28  ;;  %v5662_v30 = vmul.f32 1.442695, %v5651_v32 }
0x18fe   :  { %v5680_v23 = vpop.xlane.xlu1 %5679 }
0x18ff   :  { %11285 = vpow2.f32 %v5662_v30 }
0x1902   :  { %v5315_v33 = vpop.permute.xlu1 %5314 }
0x1903   :  { %10505 = vmatpush3.xpose.msk.msra.mxu0 %vm253_vm2, %v5315_v33 }
0x1904   :  { %10514 = vmatprep.subr.mxu0 %v11422_v17 }
0x1905   :  { %v11284_v29 = vpop.eup %11283 }
0x1906   :  { %10507 = vmatmul.mubr.msk.f32.vlgmr.msra.gmra.mrb[64].mxu0 %vm253_vm2, %v12145_v58  ;;  %v5672_v24 = vsel %vm253_vm2, %v11284_v29, 0.0  ;;  %v5469_v36 = vpop.permute.xlu1 %5468 }
0x1907   :  { %5673 = vadd.xlane.f32.xlu0 %v5672_v24  ;;  %10516 = vmatprep.mubr.msk.f32.mxu0 %vm11423_vm1, %v11422_v17 }
0x1909   :  { %v11286_v9 = vpop.eup %11285 }
0x190a   :  { %v5681_v35 = vsel %vm253_vm2, %v11286_v9, 0.0  ;;  %v6009_v37 = vpop.permute.xlu1 %6008 }
0x191d   :  { %5470 = vrot.lane.b32.xlu0 %v12145_v58, %s11426_s29 }
0x193c   :  { %5682 = vadd.xlane.f32.xlu0 %v5681_v35 }
0x1952   :  { %6158 = vrot.lane.b32.xlu0 %v12179_v63, %s11430_s11 }
0x198a   :  { %v5641_v38 = vpop.xlane.xlu1 %5640 }
0x198b   :  { %v5653_v39 = vsub.f32 %v5464_v25, %v5641_v38 }
0x198d   :  { %v5666_v40 = vmul.f32 1.442695, %v5653_v39 }
0x198f   :  { %11287 = vpow2.f32 %v5666_v40 }
0x1994   :  { %v5674_v26 = vpop.xlane.xlu0 %5673 }
0x1995   :  { %11289 = vrcp.f32 %v5674_v26 }
0x1996   :  { %11291 = vrcp.f32 %v5680_v23 }
0x1998   :  { %v5471_v58 = vpop.permute.xlu0 %5470 }
0x1999   :  { %v12226_v42 = vpop.eup %11287  ;;  %10515 = vmatpush3.xpose.msk.msra.mxu0 %vm253_vm2, %v5471_v58  ;;  %v12229_v44 = vpop.f32.mrb[64].mxu1 }
0x199a   :  { %v10523_v47 = vpop.f32.mrb[65].mxu1  ;;  %v5687_v41 = vsel %vm253_vm2, %v12226_v42, 0.0  ;;  %10524 = vmatprep.subr.mxu0 %v11422_v17  ;;  %v5645_v13 = vsel %vm253_vm2, %v12229_v44, -inf }
0x199b   :  { %5688 = vadd.xlane.f32.xlu0 %v5687_v41 }
0x199c   :  { %10517 = vmatmul.mubr.msk.f32.vlgmr.msra.gmra.mrb[66].mxu0 %vm253_vm2, %v5469_v36 }
0x199d   :  { %10525 = vmatpush3.msra.mxu0 %v12179_v63  ;;  %10526 = vmatprep.mubr.msk.f32.mxu0 %vm11423_vm1, %v11422_v17 }
0x199e   :  { %10534 = vmatprep.subr.mxu0 %v11422_v17 }
0x199f   :  { %v11290_v50 = vpop.eup %11289 }
0x19a0   :  { %v5704_v51 = vmul.f32 %v11290_v50, %v11284_v29  ;;  %v11292_v10 = vpop.eup %11291 }
0x19a1   :  { %v5706_v61 = vmul.f32 %v11292_v10, %v12195_v55 }
0x19a2   :  { %10527 = vmatmul.mubr.msk.f32.vlgmr.msra.gmra.mrb[68].mxu0 %vm253_vm2, %v5704_v51  ;;  %v5858_v56 = vpop.f32.mrb[66].mxu1  ;;  %v12306_v51 = vld [vmem:[%s12732_s6 + $0x11] ss:$0 sm:$0xff] }
0x19a3   :  { %v10533_v60 = vpop.f32.mrb[67].mxu1  ;;  %10535 = vmatpush3.msra.mxu0 %v12239_v52  ;;  %10536 = vmatprep.mubr.msk.f32.mxu0 %vm11423_vm1, %v11422_v17 }
0x19a4   :  { %10544 = vmatprep.subr.mxu0 %v11422_v17 }
0x19a6   :  { %10537 = vmatmul.mubr.msk.f32.vlgmr.msra.gmra.mrb[70].mxu0 %vm253_vm2, %v5858_v56 }
0x19a7   :  { %10545 = vmatpush3.msra.mxu0 %v6009_v37  ;;  %10546 = vmatprep.mubr.msk.f32.mxu0 %vm11423_vm1, %v11422_v17 }
0x19a8   :  { %10554 = vmatprep.subr.mxu0 %v11422_v17 }
0x19aa   :  { %10547 = vmatmul.mubr.msk.f32.vlgmr.msra.gmra.mrb[72].mxu0 %vm253_vm2, %v5706_v61 }
0x19ab   :  { %10556 = vmatprep.mubr.msk.f32.mxu0 %vm11423_vm1, %v11422_v17 }
0x19b1   :  { %6382 = vrot.lane.b32.xlu0 %v12141_v34, %s11424_s27 }
0x19b5   :  { %6604 = vrot.lane.b32.xlu0 %v12141_v34, %s11429_s10 }
0x19c9   :  { %v5683_v48 = vpop.xlane.xlu0 %5682 }
0x19ca   :  { %11293 = vrcp.f32 %v5683_v48 }
0x19cd   :  { %v6159_v43 = vpop.permute.xlu0 %6158 }
0x19ce   :  { %10555 = vmatpush3.msra.mxu0 %v6159_v43 }
0x19cf   :  { %10564 = vmatprep.subr.mxu0 %v11422_v17 }
0x19d4   :  { %v11294_v63 = vpop.eup %11293 }
0x19d5   :  { %v5707_v0 = vmul.f32 %v11294_v63, %v11286_v9 }
0x19d7   :  { %10557 = vmatmul.mubr.msk.f32.vlgmr.msra.gmra.mrb[74].mxu0 %vm253_vm2, %v5707_v0 }
0x19d8   :  { %10565 = vmatpush3.msra.mxu0 %v12141_v34  ;;  %10566 = vmatprep.mubr.msk.f32.mxu0 %vm11423_vm1, %v11422_v17 }
0x19d9   :  { %v5386_v62 = vpop.f32.mrb[64].mxu0  ;;  %10574 = vmatprep.subr.mxu0 %v11422_v17 }
0x19da   :  { %v10508_v1 = vpop.f32.mrb[65].mxu0  ;;  %v5636_v2 = vsel %vm253_vm2, %v5386_v62, -inf }
0x19db   :  { %5637 = vmax.xlane.f32.xlu1 %v5636_v2 }
0x1a28   :  { %v5689_v22 = vpop.xlane.xlu0 %5688 }
0x1a2c   :  { %v6383_v28 = vpop.permute.xlu0 %6382 }
0x1a30   :  { %v6605_v48 = vpop.permute.xlu0 %6604 }
0x1a68   :  { %v5638_v53 = vpop.xlane.xlu1 %5637 }
0x1a69   :  { %v5652_v46 = vsub.f32 %v5386_v62, %v5638_v53 }
0x1a6b   :  { %v5664_v4 = vmul.f32 1.442695, %v5652_v46 }
0x1a6d   :  { %11295 = vpow2.f32 %v5664_v4 }
0x1a6e   :  { %11297 = vrcp.f32 %v5689_v22 }
0x1a6f   :  { %v5542_v8 = vpop.f32.mrb[66].mxu0 }
0x1a70   :  { %v10518_v11 = vpop.f32.mrb[67].mxu0  ;;  %v5642_v12 = vsel %vm253_vm2, %v5542_v8, -inf }
0x1a71   :  { %5643 = vmax.xlane.f32.xlu1 %v5642_v12 }
0x1a75   :  { %5646 = vmax.xlane.f32.xlu1 %v5645_v13  ;;  %v5781_v14 = vpop.f32.mrb[68].mxu0 }
0x1a76   :  { %v10528_v55 = vpop.f32.mrb[69].mxu0  ;;  %10542 = vmatmul.mubr.msk.f32.vlgmr.msra.gmra.mrb[68].mxu1 %vm253_vm2, %v5781_v14 }
0x1a77   :  { %v11296_v15 = vpop.eup %11295  ;;  %10550 = vmatpush3.msra.mxu1 %v12269_v59  ;;  %10551 = vmatprep.mubr.msk.f32.mxu1 %vm11423_vm1, %v11422_v17 }
0x1a78   :  { %v5684_v16 = vsel %vm253_vm2, %v11296_v15, 0.0  ;;  %10559 = vmatprep.subr.mxu1 %v11422_v17  ;;  %v11298_v25 = vpop.eup %11297 }
0x1a79   :  { %v5931_v54 = vpop.f32.mrb[70].mxu0  ;;  %5685 = vadd.xlane.f32.xlu1 %v5684_v16  ;;  %v5709_v33 = vmul.f32 %v11298_v25, %v12226_v42 }
0x1a7a   :  { %v10538_v49 = vpop.f32.mrb[71].mxu0 }
0x1a7d   :  { %v6080_v19 = vpop.f32.mrb[72].mxu0 }
0x1a7e   :  { %v10548_v20 = vpop.f32.mrb[73].mxu0  ;;  %10552 = vmatmul.mubr.msk.f32.vlgmr.msra.gmra.mrb[70].mxu1 %vm253_vm2, %v6080_v19 }
0x1a7f   :  { %10560 = vmatpush3.msra.mxu1 %v12277_v18  ;;  %10561 = vmatprep.mubr.msk.f32.mxu1 %vm11423_vm1, %v11422_v17  ;;  %v11363_v20 = vld [vmem:[%s12728_s2] sm:$0xff] }
0x1a80   :  { %10569 = vmatprep.subr.mxu1 %v11422_v17 }
0x1aaa   :  { %v6230_v6 = vpop.f32.mrb[74].mxu0 }
0x1aab   :  { %v10558_v23 = vpop.f32.mrb[75].mxu0  ;;  %10562 = vmatmul.mubr.msk.f32.vlgmr.msra.gmra.mrb[72].mxu1 %vm253_vm2, %v6230_v6 }
0x1aac   :  { %10570 = vmatpush3.msra.mxu1 %v6383_v28  ;;  %10571 = vmatprep.mubr.msk.f32.mxu1 %vm11423_vm1, %v11422_v17 }
0x1aad   :  { %10579 = vmatprep.subr.mxu1 %v11422_v17 }
0x1aaf   :  { %10572 = vmatmul.mubr.msk.f32.vlgmr.msra.gmra.mrb[74].mxu1 %vm253_vm2, %v5709_v33  ;;  %v12342_v33 = vld [vmem:[%s12732_s6 + $0x19] ss:$0 sm:$0xff] }
0x1ab0   :  { %10580 = vmatpush3.msra.mxu1 %v4997_v3  ;;  %10581 = vmatprep.mubr.msk.f32.mxu1 %vm11423_vm1, %v11422_v17 }
0x1ab1   :  { %10589 = vmatprep.subr.mxu1 %v11422_v17 }
0x1afe   :  { %v5644_v29 = vpop.xlane.xlu1 %5643 }
0x1aff   :  { %v5654_v24 = vsub.f32 %v5542_v8, %v5644_v29 }
0x1b01   :  { %v5668_v31 = vmul.f32 1.442695, %v5654_v24 }
0x1b02   :  { %v5647_v32 = vpop.xlane.xlu1 %5646 }
0x1b03   :  { %11299 = vpow2.f32 %v5668_v31  ;;  %v5655_v30 = vsub.f32 %v12229_v44, %v5647_v32 }
0x1b05   :  { %v5670_v9 = vmul.f32 1.442695, %v5655_v30 }
0x1b06   :  { %v5686_v35 = vpop.xlane.xlu1 %5685 }
0x1b07   :  { %11301 = vpow2.f32 %v5670_v9 }
0x1b08   :  { %11303 = vrcp.f32 %v5686_v35 }
0x1b0d   :  { %v11300_v36 = vpop.eup %11299 }
0x1b0e   :  { %v5690_v37 = vsel %vm253_vm2, %v11300_v36, 0.0 }
0x1b0f   :  { %5691 = vadd.xlane.f32.xlu1 %v5690_v37 }
0x1b11   :  { %v11302_v38 = vpop.eup %11301 }
0x1b12   :  { %v11304_v39 = vpop.eup %11303  ;;  %v5693_v40 = vsel %vm253_vm2, %v11302_v38, 0.0 }
0x1b13   :  { %v5708_v26 = vmul.f32 %v11304_v39, %v11296_v15  ;;  %5694 = vadd.xlane.f32.xlu1 %v5693_v40 }
0x1b15   :  { %10567 = vmatmul.mubr.msk.f32.vlgmr.msra.gmra.mrb[76].mxu0 %vm253_vm2, %v5708_v26 }
0x1b16   :  { %10575 = vmatpush3.msra.mxu0 %v12239_v52  ;;  %10576 = vmatprep.mubr.msk.f32.mxu0 %vm11423_vm1, %v11422_v17 }
0x1b17   :  { %10584 = vmatprep.subr.mxu0 %v11422_v17 }
0x1b24   :  { %6754 = vrot.lane.b32.xlu1 %v12141_v34, %s11430_s11 }
0x1b49   :  { %v6004_v58 = vpop.f32.mrb[68].mxu1 }
0x1b4a   :  { %v6005_v42 = vadd.f32 %v6004_v58, %v5931_v54  ;;  %v10543_v44 = vpop.f32.mrb[69].mxu1 }
0x1b4b   :  { %v7052_v44 = vld [vmem:[#allocation2 + $0x120] sm:$0xff] }
0x1b51   :  { %v6153_v47 = vpop.f32.mrb[70].mxu1 }
0x1b52   :  { %v6157_v41 = vadd.f32 %v6153_v47, %v6005_v42  ;;  %v10553_v50 = vpop.f32.mrb[71].mxu1  ;;  %v7053_v47 = vld [vmem:[#allocation2 + $0x160] sm:$0xff] }
0x1b53   :  { %v10969_v50 = vpack.c.bf16 %v7053_v47, %v7052_v44 }
0x1b7e   :  { %v6303_v52 = vpop.f32.mrb[72].mxu1 }
0x1b7f   :  { %v6307_v56 = vadd.f32 %v6303_v52, %v6157_v41  ;;  %v10563_v60 = vpop.f32.mrb[73].mxu1  ;;  %v7054_v41 = vld [vmem:[#allocation2 + $0x1a0] sm:$0xff] }
0x1b80   :  { %v11366_v60 = vld [vmem:[%s12728_s2 + $0x18] sm:$0xff] }
0x1b81   :  { %v6910_v10 = vadd.f32 %v12306_v51, %v6307_v56  ;;  %v11365_v56 = vld [vmem:[%s12728_s2 + $0x10] sm:$0xff] }
0x1b82   :  { %v6454_v61 = vpop.f32.mrb[74].mxu1 }
0x1b83   :  { %v10573_v43 = vpop.f32.mrb[75].mxu1  ;;  %10577 = vmatmul.mubr.msk.f32.vlgmr.msra.gmra.mrb[78].mxu0 %vm253_vm2, %v6454_v61  ;;  %v6912_v34 = vadd.f32 %v6910_v10, %v12104_v21 }
0x1b84   :  { %10585 = vmatpush3.msra.mxu0 %v6605_v48  ;;  %10586 = vmatprep.mubr.msk.f32.mxu0 %vm11423_vm1, %v11422_v17 }
0x1b85   :  { %v6916_v63 = vsel %vm71_vm0, %v6912_v34, 0.0  ;;  %10594 = vmatprep.subr.mxu0 %v11422_v17 }
0x1b86   :  { %6917 = vadd.xlane.f32.xlu0 %v6916_v63  ;;  %v6960_v63 = vld [vmem:[#allocation2 + $0x118] sm:$0xff] }
0x1b9c   :  { %v5692_v0 = vpop.xlane.xlu1 %5691 }
0x1b9d   :  { %11305 = vrcp.f32 %v5692_v0  ;;  %v6961_v0 = vld [vmem:[#allocation2 + $0x158] sm:$0xff] }
0x1ba0   :  { %v5695_v62 = vpop.xlane.xlu1 %5694 }
0x1ba1   :  { %11307 = vrcp.f32 %v5695_v62  ;;  %v10961_v62 = vpack.c.bf16 %v6961_v0, %v6960_v63 }
0x1ba4   :  { %v6755_v3 = vpop.permute.xlu1 %6754 }
0x1ba7   :  { %v11306_v1 = vpop.eup %11305 }
0x1ba8   :  { %v5710_v2 = vmul.f32 %v11306_v1, %v11300_v36  ;;  %v6962_v1 = vld [vmem:[#allocation2 + $0x198] sm:$0xff] }
0x1baa   :  { %10587 = vmatmul.mubr.msk.f32.vlgmr.msra.gmra.mrb[80].mxu0 %vm253_vm2, %v5710_v2  ;;  %v6963_v2 = vld [vmem:[#allocation2 + $0x1d8] sm:$0xff] }
0x1bab   :  { %v11308_v53 = vpop.eup %11307  ;;  %10595 = vmatpush3.msra.mxu0 %v6755_v3  ;;  %10596 = vmatprep.mubr.msk.f32.mxu0 %vm11423_vm1, %v11422_v17  ;;  %v10965_v3 = vpack.c.bf16 %v6963_v2, %v6962_v1 }
0x1bac   :  { %v5711_v46 = vmul.f32 %v11308_v53, %v11302_v38  ;;  %10962 = vmatprep.subr.bf16.mxu0 %v10961_v62  ;;  %v12373_v53 = vld [vmem:[%s12732_s6 + $0x13] ss:$0 sm:$0xff] }
0x1bae   :  { %10597 = vmatmul.mubr.msk.f32.vlgmr.msra.gmra.mrb[82].mxu0 %vm253_vm2, %v5711_v46 }
0x1baf   :  { %10964 = vmatpush3.bf16.msra.mxu0 %v10961_v62 }
0x1bb0   :  { %10966 = vmatprep.subr.bf16.mxu0 %v10965_v3 }
0x1bb3   :  { %10968 = vmatpush3.bf16.msra.mxu0 %v10965_v3 }
0x1be8   :  { %v6377_v4 = vpop.f32.mrb[76].mxu0 }
0x1be9   :  { %v10568_v8 = vpop.f32.mrb[77].mxu0  ;;  %10582 = vmatmul.mubr.msk.f32.vlgmr.msra.gmra.mrb[76].mxu1 %vm253_vm2, %v6377_v4 }
0x1bea   :  { %10590 = vmatpush3.msra.mxu1 %v12269_v59  ;;  %10591 = vmatprep.mubr.msk.f32.mxu1 %vm11423_vm1, %v11422_v17 }
0x1beb   :  { %10599 = vmatprep.subr.mxu1 %v11422_v17 }
0x1c13   :  { %v6918_v11 = vpop.xlane.xlu0 %6917 }
0x1c14   :  { %v6922_v12 = vmul.f32 0.03125, %v6918_v11 }
0x1c16   :  { %v6924_v13 = vsub.f32 %v6912_v34, %v6922_v12 }
0x1c18   :  { %v6926_v14 = vmul.f32 %v6924_v13, %v6924_v13 }
0x1c1a   :  { %v6928_v55 = vsel %vm71_vm0, %v6926_v14, 0.0 }
0x1c1b   :  { %6929 = vadd.xlane.f32.xlu0 %v6928_v55 }
0x1c56   :  { %v6527_v15 = vpop.f32.mrb[78].mxu0 }
0x1c57   :  { %v10578_v16 = vpop.f32.mrb[79].mxu0 }
0x1c7d   :  { %v6676_v54 = vpop.f32.mrb[80].mxu0 }
0x1c7e   :  { %v10588_v49 = vpop.f32.mrb[81].mxu0  ;;  %10592 = vmatmul.mubr.msk.f32.vlgmr.msra.gmra.mrb[78].mxu1 %vm253_vm2, %v6676_v54 }
0x1c7f   :  { %10600 = vmatpush3.msra.mxu1 %v12277_v18  ;;  %10601 = vmatprep.mubr.msk.f32.mxu1 %vm11423_vm1, %v11422_v17  ;;  %v12337_v18 = vld [vmem:[%s12732_s6 + $0x18] ss:$0 sm:$0xff] }
0x1c80   :  { %10970 = vmatprep.subr.bf16.mxu1 %v10969_v50 }
0x1c81   :  { %v6826_v59 = vpop.f32.mrb[82].mxu0 }
0x1c82   :  { %v10598_v19 = vpop.f32.mrb[83].mxu0  ;;  %10602 = vmatmul.mubr.msk.f32.vlgmr.msra.gmra.mrb[80].mxu1 %vm253_vm2, %v6826_v59 }
0x1c83   :  { %10623 = vmatprep.mubr.msk.f32.mxu1 %vm71_vm0, %v11363_v20  ;;  %10972 = vmatpush3.bf16.msra.mxu1 %v10969_v50  ;;  %v11367_v20 = vld [vmem:[%s12727_s1] sm:$0xff] }
0x1ca8   :  { %v6930_v22 = vpop.xlane.xlu0 %6929 }
0x1ca9   :  { %v6934_v25 = vmul.f32 0.03125, %v6930_v22  ;;  %v7148_v22 = vld [vmem:[#allocation2 + $0x128] sm:$0xff] }
0x1cab   :  { %v6936_v6 = vadd.f32 1e-05, %v6934_v25  ;;  %v7149_v25 = vld [vmem:[#allocation2 + $0x168] sm:$0xff] }
0x1cad   :  { %11309 = vrsqrt.f32 %v6936_v6  ;;  %v7150_v6 = vld [vmem:[#allocation2 + $0x1a8] sm:$0xff] }
0x1cb7   :  { %v11310_v28 = vpop.eup %11309 }
0x1cb8   :  { %v6940_v23 = vmul.f32 %v11310_v28, %v6924_v13 }
0x1cba   :  { %v6948_v29 = vmul.f32 %v12337_v18, %v6940_v23  ;;  %v10977_v23 = vpack.c.bf16 %v7149_v25, %v7148_v22 }
0x1cbc   :  { %v6600_v24 = vpop.f32.mrb[76].mxu1  ;;  %v12346_v31 = vadd.f32 %v12342_v33, %v6948_v29  ;;  %10978 = vmatprep.subr.bf16.mxu0 %v10977_v23 }
0x1cbd   :  { %v6601_v32 = vadd.f32 %v6600_v24, %v6527_v15  ;;  %v10583_v30 = vpop.f32.mrb[77].mxu1 }
0x1cbe   :  { %v6958_v9 = vadd.f32 %v12109_v27, %v12346_v31  ;;  %v7055_v27 = vld [vmem:[#allocation2 + $0x1e0] sm:$0xff]  ;;  %v11368_v30 = vld [vmem:[%s12727_s1 + $0x8] sm:$0xff] }
0x1cbf   :  { %v10973_v52 = vpack.c.bf16 %v7055_v27, %v7054_v41  ;;  %v9704_v27 = vld [vmem:[%s12732_s6 + $0x14] ss:$0 sm:$0xff] }
0x1cc0   :  { %10612 = vmatprep.mubr.msk.f32.mxu0 %vm71_vm0, %v6958_v9  ;;  %v11369_v9 = vld [vmem:[%s12727_s1 + $0x10] sm:$0xff] }
0x1cc1   :  { %10974 = vmatprep.subr.bf16.mxu1 %v10973_v52 }
0x1cc2   :  { %10976 = vmatpush3.bf16.msra.mxu1 %v10973_v52 }
0x1cc3   :  { %10985 = vmatprep.subr.bf16.mxu1 %v11431_v5 }
0x1d51   :  { %v6749_v35 = vpop.f32.mrb[78].mxu1 }
0x1d52   :  { %v6753_v36 = vadd.f32 %v6749_v35, %v6601_v32  ;;  %v10593_v37 = vpop.f32.mrb[79].mxu1 }
0x1d55   :  { %v6899_v38 = vpop.f32.mrb[80].mxu1 }
0x1d56   :  { %v6903_v39 = vadd.f32 %v6899_v38, %v6753_v36  ;;  %v10603_v40 = vpop.f32.mrb[81].mxu1  ;;  %v11370_v36 = vld [vmem:[%s12727_s1 + $0x18] sm:$0xff]  ;;  %v9694_v38 = vld [vmem:[%s12732_s6 + $0x12] ss:$0 sm:$0xff] }
0x1d58   :  { %v6911_v26 = vadd.f32 %v12306_v51, %v6903_v39  ;;  %v11364_v51 = vld [vmem:[%s12728_s2 + $0x8] sm:$0xff] }
0x1d59   :  { %10624 = vmatmul.mubr.msk.f32.vlgmr.msra.gmra.mrb[82].mxu1 %vm71_vm0, %v11364_v51 }
0x1d5a   :  { %v6913_v58 = vadd.f32 %v6911_v26, %v12113_v7  ;;  %10626 = vmatprep.mubr.msk.f32.mxu1 %vm71_vm0, %v11365_v56 }
0x1d5c   :  { %v6919_v42 = vsel %vm71_vm0, %v6913_v58, 0.0 }
0x1d5d   :  { %6920 = vadd.xlane.f32.xlu1 %v6919_v42  ;;  %10627 = vmatmul.mubr.msk.f32.gmra.mrb[84].mxu1 %vm71_vm0, %v11366_v60 }
0x1d5e   :  { %10647 = vmatprep.mubr.msk.f32.mxu1 %vm11423_vm1, %v11422_v17 }
0x1dea   :  { %v6921_v10 = vpop.xlane.xlu1 %6920 }
0x1deb   :  { %v6923_v61 = vmul.f32 0.03125, %v6921_v10 }
0x1ded   :  { %v6925_v48 = vsub.f32 %v6913_v58, %v6923_v61 }
0x1def   :  { %v6927_v43 = vmul.f32 %v6925_v48, %v6925_v48 }
0x1df1   :  { %v6931_v34 = vsel %vm71_vm0, %v6927_v43, 0.0 }
0x1df2   :  { %6932 = vadd.xlane.f32.xlu0 %v6931_v34 }
0x1e2c   :  { %v10625_v46 = vpop.f32.mrb[82].mxu1 }
0x1e2d   :  { %v7135_v4 = vadd.f32 %v10625_v46, %v12373_v53  ;;  %v7129_v8 = vpop.f32.mrb[83].mxu1 }
0x1e2e   :  { %v7130_v11 = vadd.f32 %v12373_v53, %v7129_v8 }
0x1e30   :  { %v10986_v12 = vpack.c.bf16 %v7135_v4, %v7130_v11  ;;  %v11141_v13 = vpack.i.bf16 %v7135_v4, %v7130_v11  ;;  %v10628_v28 = vpop.f32.mrb[84].mxu1 }
0x1e31   :  { %v7139_v29 = vpop.f32.mrb[85].mxu1  ;;  %v7145_v61 = vadd.f32 %v10628_v28, %v12373_v53 }
0x1e32   :  { %11142 = vrot.lane.b32.xlu0 %v11141_v13, %s11424_s27  ;;  %10988 = vmatpush3.bf16.xpose.msk.msra.mxu1 %vm11783_vm3, %v10986_v12 }
0x1e33   :  { %10993 = vmatprep.subr.bf16.mxu1 %v11431_v5 }
0x1e36   :  { %11147 = vrot.lane.b32.xlu0 %v11141_v13, %s11429_s10 }
0x1e3a   :  { %11152 = vrot.lane.b32.xlu0 %v11141_v13, %s11430_s11 }
0x1e7f   :  { %v6933_v14 = vpop.xlane.xlu0 %6932 }
0x1e80   :  { %v6935_v55 = vmul.f32 0.03125, %v6933_v14 }
0x1e82   :  { %v6937_v15 = vadd.f32 1e-05, %v6935_v55 }
0x1e84   :  { %11311 = vrsqrt.f32 %v6937_v15 }
0x1e8e   :  { %v11312_v16 = vpop.eup %11311 }
0x1e8f   :  { %v6941_v54 = vmul.f32 %v11312_v16, %v6925_v48  ;;  %v7140_v48 = vadd.f32 %v12373_v53, %v7139_v29 }
0x1e91   :  { %v6949_v49 = vmul.f32 %v12337_v18, %v6941_v54  ;;  %v7151_v18 = vld [vmem:[#allocation2 + $0x1e8] sm:$0xff]  ;;  %v11002_v63 = vpack.c.bf16 %v7145_v61, %v7140_v48 }
0x1e93   :  { %v12385_v59 = vadd.f32 %v12342_v33, %v6949_v49  ;;  %v10981_v33 = vpack.c.bf16 %v7151_v18, %v7150_v6  ;;  %v11156_v6 = vpack.i.bf16 %v7145_v61, %v7140_v48 }
0x1e95   :  { %v6959_v19 = vadd.f32 %v12119_v45, %v12385_v59 }
0x1e97   :  { %10613 = vmatmul.mubr.msk.f32.vlgmr.msra.gmra.mrb[84].mxu0 %vm71_vm0, %v6959_v19 }
0x1e98   :  { %10637 = vmatprep.mubr.msk.f32.mxu0 %vm71_vm0, %v11367_v20  ;;  %10980 = vmatpush3.bf16.msra.mxu0 %v10977_v23 }
0x1e99   :  { %10982 = vmatprep.subr.bf16.mxu0 %v10981_v33 }
0x1e9c   :  { %10984 = vmatpush3.bf16.msra.mxu0 %v10981_v33 }
0x1e9d   :  { %10989 = vmatprep.subr.bf16.mxu0 %v11431_v5 }
0x1e9f   :  { %10638 = vmatmul.mubr.msk.f32.vlgmr.msra.gmra.mrb[86].mxu0 %vm71_vm0, %v11368_v30 }
0x1ea0   :  { %10640 = vmatprep.mubr.msk.f32.mxu0 %vm71_vm0, %v11369_v9 }
0x1ea3   :  { %10641 = vmatmul.mubr.msk.f32.gmra.mrb[88].mxu0 %vm71_vm0, %v11370_v36 }
0x1ea4   :  { %v11143_v45 = vpop.permute.xlu0 %11142  ;;  %10654 = vmatprep.mubr.msk.f32.mxu0 %vm11423_vm1, %v11422_v17 }
0x1ea5   :  { %v11145_v24 = vunpack.i.h.bf16 %v11143_v45  ;;  %v11144_v32 = vunpack.i.l.bf16 %v11143_v45 }
0x1ea7   :  { %v10990_v35 = vpack.c.bf16 %v11145_v24, %v11144_v32 }
0x1ea8   :  { %v11148_v37 = vpop.permute.xlu0 %11147 }
0x1ea9   :  { %10992 = vmatpush3.bf16.xpose.msk.msra.mxu0 %vm11783_vm3, %v10990_v35  ;;  %v11150_v39 = vunpack.i.h.bf16 %v11148_v37  ;;  %v11149_v40 = vunpack.i.l.bf16 %v11148_v37 }
0x1eaa   :  { %10997 = vmatprep.subr.bf16.mxu0 %v11431_v5 }
0x1eab   :  { %v10994_v47 = vpack.c.bf16 %v11150_v39, %v11149_v40 }
0x1eac   :  { %v11153_v10 = vpop.permute.xlu0 %11152 }
0x1ead   :  { %v11155_v43 = vunpack.i.h.bf16 %v11153_v10  ;;  %v11154_v34 = vunpack.i.l.bf16 %v11153_v10 }
0x1eaf   :  { %v10998_v0 = vpack.c.bf16 %v11155_v43, %v11154_v34 }
0x1f6a   :  { %v10614_v26 = vpop.f32.mrb[84].mxu0 }
0x1f6b   :  { %v12415_v58 = vadd.f32 %v10614_v26, %v9694_v38  ;;  %v7043_v42 = vpop.f32.mrb[85].mxu0 }
0x1f6c   :  { %v7044_v44 = vadd.f32 %v9694_v38, %v7043_v42 }
0x1f6e   :  { %7410 = vrot.lane.b32.xlu0 %v7044_v44, %s11429_s10  ;;  %7328 = vrot.lane.b32.xlu1 %v7044_v44, %s11424_s27 }
0x1f6f   :  { %10648 = vmatmul.mubr.msk.f32.vlgmr.msra.gmra.mrb[86].mxu1 %vm253_vm2, %v7044_v44 }
0x1f70   :  { %10996 = vmatpush3.bf16.xpose.msk.msra.mxu1 %vm11783_vm3, %v10994_v47  ;;  %10661 = vmatprep.mubr.msk.f32.mxu1 %vm11423_vm1, %v11422_v17 }
0x1f71   :  { %11001 = vmatprep.subr.bf16.mxu1 %v11431_v5 }
0x1f72   :  { %7492 = vrot.lane.b32.xlu1 %v7044_v44, %s11430_s11  ;;  %v10639_v41 = vpop.f32.mrb[86].mxu0 }
0x1f73   :  { %v7225_v50 = vpop.f32.mrb[87].mxu0  ;;  %v12454_v3 = vadd.f32 %v10639_v41, %v9704_v27 }
0x1f74   :  { %v12456_v53 = vadd.f32 %v9704_v27, %v7225_v50 }
0x1f76   :  { %v10642_v52 = vpop.f32.mrb[88].mxu0  ;;  %v12460_v46 = vpack.i.bf16 %v12454_v3, %v12456_v53  ;;  %v11018_v4 = vpack.c.bf16 %v12454_v3, %v12456_v53 }
0x1f77   :  { %v12429_v51 = vadd.f32 %v10642_v52, %v9704_v27  ;;  %v7235_v56 = vpop.f32.mrb[89].mxu0 }
0x1f78   :  { %v12431_v60 = vadd.f32 %v9704_v27, %v7235_v56 }
0x1f7a   :  { %v11030_v8 = vpack.c.bf16 %v12429_v51, %v12431_v60  ;;  %v12468_v11 = vpack.i.bf16 %v12429_v51, %v12431_v60 }
0x1fe0   :  { %v7411_v62 = vpop.permute.xlu0 %7410  ;;  %v7329_v1 = vpop.permute.xlu1 %7328 }
0x1fe1   :  { %10655 = vmatmul.mubr.msk.f32.vlgmr.msra.gmra.mrb[90].mxu0 %vm253_vm2, %v7329_v1  ;;  %10662 = vmatmul.mubr.msk.f32.vlgmr.msra.gmra.mrb[88].mxu1 %vm253_vm2, %v7411_v62 }
0x1fe2   :  { %11000 = vmatpush3.bf16.xpose.msk.msra.mxu0 %vm11783_vm3, %v10998_v0  ;;  %11004 = vmatpush3.bf16.xpose.msk.msra.mxu1 %vm11783_vm3, %v11002_v63 }
0x1fe3   :  { %10668 = vmatprep.mubr.msk.f32.mxu0 %vm11423_vm1, %v11422_v17  ;;  %10675 = vmatprep.mubr.msk.f32.mxu1 %vm11423_vm1, %v11422_v17 }
0x1fe4   :  { %11009 = vmatprep.subr.bf16.mxu1 %v11431_v5  ;;  %11005 = vmatprep.subr.bf16.mxu0 %v11431_v5  ;;  %v7493_v2 = vpop.permute.xlu1 %7492 }
0x1fe9   :  { %10669 = vmatmul.mubr.msk.f32.vlgmr.msra.gmra.mrb[92].mxu0 %vm253_vm2, %v7493_v2  ;;  %10676 = vmatmul.mubr.msk.f32.vlgmr.msra.gmra.mrb[90].mxu1 %vm253_vm2, %v12415_v58 }
0x1fea   :  { %10689 = vmatprep.mubr.msk.f32.mxu1 %vm11423_vm1, %v11422_v17  ;;  %10682 = vmatprep.mubr.msk.f32.mxu0 %vm11423_vm1, %v11422_v17 }
0x2042   :  { %v7324_v12 = vpop.f32.mrb[86].mxu1 }
0x2043   :  { %v10649_v13 = vpop.f32.mrb[87].mxu1  ;;  %v7899_v14 = vsel %vm3173_vm4, %v7324_v12, -inf }
0x2044   :  { %7900 = vmax.xlane.f32.xlu0 %v7899_v14 }
0x20b4   :  { %v7406_v55 = vpop.f32.mrb[90].mxu0  ;;  %v7488_v15 = vpop.f32.mrb[88].mxu1 }
0x20b5   :  { %v10656_v16 = vpop.f32.mrb[91].mxu0  ;;  %v10663_v54 = vpop.f32.mrb[89].mxu1  ;;  %v7902_v49 = vsel %vm3173_vm4, %v7406_v55, -inf  ;;  %v7905_v45 = vsel %vm3173_vm4, %v7488_v15, -inf }
0x20b6   :  { %7903 = vmax.xlane.f32.xlu1 %v7902_v49 }
0x20bc   :  { %v12472_v19 = vpop.f32.mrb[92].mxu0  ;;  %v12474_v20 = vpop.f32.mrb[90].mxu1 }
0x20bd   :  { %v10670_v22 = vpop.f32.mrb[93].mxu0  ;;  %v10677_v25 = vpop.f32.mrb[91].mxu1  ;;  %v7908_v41 = vsel %vm3173_vm4, %v12472_v19, -inf }
0x20c7   :  { %11157 = vrot.lane.b32.xlu1 %v11156_v6, %s11429_s10 }
0x20cb   :  { %11162 = vrot.lane.b32.xlu1 %v12460_v46, %s11424_s27 }
0x20cf   :  { %11167 = vrot.lane.b32.xlu1 %v11156_v6, %s11424_s27 }
0x20d1   :  { %v7901_v28 = vpop.xlane.xlu0 %7900 }
0x20d2   :  { %v7923_v23 = vsub.f32 %v7324_v12, %v7901_v28 }
0x20d4   :  { %v7931_v18 = vmul.f32 1.442695, %v7923_v23 }
0x20d6   :  { %11313 = vpow2.f32 %v7931_v18 }
0x20e0   :  { %v11314_v29 = vpop.eup %11313 }
0x20e1   :  { %v7947_v33 = vsel %vm3173_vm4, %v11314_v29, 0.0 }
0x20e2   :  { %7948 = vadd.xlane.f32.xlu0 %v7947_v33 }
0x20f3   :  { %7906 = vmax.xlane.f32.xlu1 %v7905_v45 }
0x2104   :  { %7817 = vrot.lane.b32.xlu1 %v12415_v58, %s11430_s11 }
0x2143   :  { %v7904_v24 = vpop.xlane.xlu1 %7903 }
0x2144   :  { %v7924_v32 = vsub.f32 %v7406_v55, %v7904_v24 }
0x2146   :  { %v7933_v30 = vmul.f32 1.442695, %v7924_v32 }
0x2147   :  { %v11158_v9 = vpop.permute.xlu1 %11157 }
0x2148   :  { %11315 = vpow2.f32 %v7933_v30  ;;  %v11160_v35 = vunpack.i.h.bf16 %v11158_v9  ;;  %v11159_v36 = vunpack.i.l.bf16 %v11158_v9 }
0x214a   :  { %v11010_v37 = vpack.c.bf16 %v11160_v35, %v11159_v36 }
0x214b   :  { %v11163_v38 = vpop.permute.xlu1 %11162 }
0x214c   :  { %11012 = vmatpush3.bf16.xpose.msk.msra.mxu1 %vm11783_vm3, %v11010_v37  ;;  %v11165_v43 = vunpack.i.h.bf16 %v11163_v38  ;;  %v11164_v34 = vunpack.i.l.bf16 %v11163_v38 }
0x214d   :  { %11017 = vmatprep.subr.bf16.mxu1 %v11431_v5 }
0x214e   :  { %v11021_v62 = vpack.c.bf16 %v11165_v43, %v11164_v34 }
0x214f   :  { %v11168_v39 = vpop.permute.xlu1 %11167 }
0x2150   :  { %v11170_v40 = vunpack.i.h.bf16 %v11168_v39  ;;  %v11169_v26 = vunpack.i.l.bf16 %v11168_v39  ;;  %v7911_v39 = vsel %vm3173_vm4, %v12474_v20, -inf }
0x2152   :  { %v11316_v42 = vpop.eup %11315  ;;  %v11006_v44 = vpack.c.bf16 %v11170_v40, %v11169_v26 }
0x2153   :  { %v7950_v47 = vsel %vm3173_vm4, %v11316_v42, 0.0 }
0x2154   :  { %11008 = vmatpush3.bf16.xpose.msk.msra.mxu0 %vm11783_vm3, %v11006_v44  ;;  %7951 = vadd.xlane.f32.xlu0 %v7950_v47 }
0x2155   :  { %11013 = vmatprep.subr.bf16.mxu0 %v11431_v5 }
0x216a   :  { %7735 = vrot.lane.b32.xlu0 %v12415_v58, %s11429_s10 }
0x216e   :  { %7653 = vrot.lane.b32.xlu0 %v12415_v58, %s11424_s27 }
0x216f   :  { %v7949_v61 = vpop.xlane.xlu0 %7948 }
0x2180   :  { %v7907_v50 = vpop.xlane.xlu1 %7906 }
0x2181   :  { %v7925_v27 = vsub.f32 %v7488_v15, %v7907_v50 }
0x2183   :  { %v7935_v52 = vmul.f32 1.442695, %v7925_v27 }
0x2184   :  { %v7818_v54 = vpop.permute.xlu1 %7817 }
0x2185   :  { %11317 = vpow2.f32 %v7935_v52 }
0x2186   :  { %11319 = vrcp.f32 %v7949_v61 }
0x218d   :  { %7909 = vmax.xlane.f32.xlu0 %v7908_v41 }
0x218f   :  { %v12498_v56 = vpop.eup %11317 }
0x2190   :  { %v7953_v10 = vsel %vm3173_vm4, %v12498_v56, 0.0  ;;  %v11320_v48 = vpop.eup %11319 }
0x2191   :  { %v7979_v0 = vmul.f32 %v11320_v48, %v11314_v29 }
0x21a3   :  { %11172 = vrot.lane.b32.xlu0 %v11156_v6, %s11430_s11 }
0x21c2   :  { %7954 = vadd.xlane.f32.xlu0 %v7953_v10 }
0x21d8   :  { %11182 = vrot.lane.b32.xlu0 %v12460_v46, %s11430_s11 }
0x21e1   :  { %v7952_v58 = vpop.xlane.xlu0 %7951 }
0x21e2   :  { %11321 = vrcp.f32 %v7952_v58 }
0x21e5   :  { %v7736_v63 = vpop.permute.xlu0 %7735 }
0x21e6   :  { %10690 = vmatmul.mubr.msk.f32.vlgmr.msra.gmra.mrb[92].mxu1 %vm253_vm2, %v7736_v63 }
0x21e7   :  { %11019 = vmatpush3.bf16.msra.mxu1 %v11018_v4  ;;  %10703 = vmatprep.mubr.msk.f32.mxu1 %vm11423_vm1, %v11422_v17 }
0x21e8   :  { %11020 = vmatprep.subr.bf16.mxu1 %v11431_v5 }
0x21e9   :  { %v7654_v1 = vpop.permute.xlu0 %7653 }
0x21ea   :  { %10683 = vmatmul.mubr.msk.f32.vlgmr.msra.gmra.mrb[94].mxu0 %vm253_vm2, %v7654_v1  ;;  %10704 = vmatmul.mubr.msk.f32.vlgmr.msra.gmra.mrb[94].mxu1 %vm3173_vm4, %v7979_v0 }
0x21eb   :  { %11022 = vmatpush3.bf16.msra.mxu1 %v11021_v62  ;;  %10710 = vmatprep.mubr.msk.f32.mxu1 %vm11423_vm1, %v11422_v17 }
0x21ec   :  { %v11322_v2 = vpop.eup %11321  ;;  %10696 = vmatprep.mubr.msk.f32.mxu0 %vm11423_vm1, %v11422_v17  ;;  %10718 = vmatprep.subr.mxu1 %v11422_v17 }
0x21ed   :  { %v7980_v3 = vmul.f32 %v11322_v2, %v11316_v42 }
0x21ef   :  { %10711 = vmatmul.mubr.msk.f32.vlgmr.msra.gmra.mrb[96].mxu1 %vm3173_vm4, %v7980_v3 }
0x21f0   :  { %10720 = vmatprep.mubr.msk.f32.mxu1 %vm11423_vm1, %v11422_v17 }
0x221a   :  { %v7910_v53 = vpop.xlane.xlu0 %7909 }
0x221b   :  { %v7926_v4 = vsub.f32 %v12472_v19, %v7910_v53  ;;  %v12531_v19 = vld [vmem:[#allocation2 + $0x130] sm:$0xff] }
0x221c   :  { %10719 = vmatpush3.msra.mxu1 %v12531_v19 }
0x221d   :  { %v7937_v12 = vmul.f32 1.442695, %v7926_v4  ;;  %10730 = vmatprep.subr.mxu1 %v11422_v17 }
0x221e   :  { %v11173_v13 = vpop.permute.xlu0 %11172 }
0x221f   :  { %11323 = vpow2.f32 %v7937_v12  ;;  %v11175_v14 = vunpack.i.h.bf16 %v11173_v13  ;;  %v11174_v55 = vunpack.i.l.bf16 %v11173_v13 }
0x2221   :  { %v11014_v15 = vpack.c.bf16 %v11175_v14, %v11174_v55 }
0x2223   :  { %11016 = vmatpush3.bf16.xpose.msk.msra.mxu0 %vm11783_vm3, %v11014_v15 }
0x2224   :  { %10713 = vmatprep.subr.mxu0 %v11422_v17 }
0x2229   :  { %v11324_v16 = vpop.eup %11323 }
0x222a   :  { %10697 = vmatmul.mubr.msk.f32.vlgmr.msra.gmra.mrb[96].mxu0 %vm253_vm2, %v7818_v54  ;;  %v7956_v49 = vsel %vm3173_vm4, %v11324_v16, 0.0 }
0x222b   :  { %7957 = vadd.xlane.f32.xlu1 %v7956_v49  ;;  %10715 = vmatprep.mubr.msk.f32.mxu0 %vm11423_vm1, %v11422_v17 }
0x222c   :  { %10714 = vmatpush3.msra.mxu0 %v12535_v57 }
0x222d   :  { %11023 = vmatprep.subr.bf16.mxu0 %v11431_v5 }
0x223c   :  { %11177 = vrot.lane.b32.xlu1 %v12460_v46, %s11429_s10 }
0x224f   :  { %v7955_v22 = vpop.xlane.xlu0 %7954 }
0x2250   :  { %11325 = vrcp.f32 %v7955_v22 }
0x2253   :  { %v11183_v30 = vpop.permute.xlu0 %11182 }
0x2254   :  { %v11185_v35 = vunpack.i.h.bf16 %v11183_v30  ;;  %v11184_v36 = vunpack.i.l.bf16 %v11183_v30 }
0x2256   :  { %v11027_v44 = vpack.c.bf16 %v11185_v35, %v11184_v36 }
0x225a   :  { %v11326_v9 = vpop.eup %11325 }
0x225b   :  { %v7981_v26 = vmul.f32 %v11326_v9, %v12498_v56  ;;  %v12563_v56 = vld [vmem:[#allocation2 + $0x1b0] sm:$0xff] }
0x22b8   :  { %v7958_v25 = vpop.xlane.xlu1 %7957 }
0x22b9   :  { %v7813_v6 = vpop.f32.mrb[92].mxu1  ;;  %11327 = vrcp.f32 %v7958_v25 }
0x22ba   :  { %v10691_v28 = vpop.f32.mrb[93].mxu1  ;;  %v7917_v47 = vsel %vm3173_vm4, %v7813_v6, -inf }
0x22bc   :  { %v11178_v23 = vpop.permute.xlu1 %11177 }
0x22bd   :  { %v7731_v46 = vpop.f32.mrb[94].mxu0  ;;  %v8056_v18 = vpop.f32.mrb[94].mxu1  ;;  %v11180_v29 = vunpack.i.h.bf16 %v11178_v23  ;;  %v11179_v33 = vunpack.i.l.bf16 %v11178_v23 }
0x22be   :  { %v10684_v45 = vpop.f32.mrb[95].mxu0  ;;  %v10705_v24 = vpop.f32.mrb[95].mxu1  ;;  %10721 = vmatmul.mubr.msk.f32.vlgmr.msra.gmra.mrb[98].mxu1 %vm253_vm2, %v8056_v18  ;;  %v7914_v32 = vsel %vm3173_vm4, %v7731_v46, -inf }
0x22bf   :  { %7915 = vmax.xlane.f32.xlu1 %v7914_v32  ;;  %10732 = vmatprep.mubr.msk.f32.mxu1 %vm11423_vm1, %v11422_v17  ;;  %v11024_v37 = vpack.c.bf16 %v11180_v29, %v11179_v33 }
0x22c0   :  { %10731 = vmatpush3.msra.mxu1 %v12563_v56 }
0x22c1   :  { %10742 = vmatprep.subr.mxu1 %v11422_v17 }
0x22c2   :  { %v8137_v38 = vpop.f32.mrb[96].mxu1 }
0x22c3   :  { %7912 = vmax.xlane.f32.xlu1 %v7911_v39  ;;  %v10712_v40 = vpop.f32.mrb[97].mxu1  ;;  %10716 = vmatmul.mubr.msk.f32.vlgmr.msra.gmra.mrb[98].mxu0 %vm253_vm2, %v8137_v38  ;;  %v11328_v42 = vpop.eup %11327 }
0x22c4   :  { %11025 = vmatpush3.bf16.msra.mxu0 %v11024_v37  ;;  %10727 = vmatprep.mubr.msk.f32.mxu0 %vm11423_vm1, %v11422_v17  ;;  %v7982_v41 = vmul.f32 %v11328_v42, %v11324_v16  ;;  %v12578_v16 = vld [vmem:[#allocation2 + $0x1f0] sm:$0xff] }
0x22c5   :  { %11026 = vmatprep.subr.bf16.mxu0 %v11431_v5 }
0x22c7   :  { %7918 = vmax.xlane.f32.xlu1 %v7917_v47  ;;  %10728 = vmatmul.mubr.msk.f32.vlgmr.msra.gmra.mrb[100].mxu0 %vm3173_vm4, %v7981_v26 }
0x22c8   :  { %11028 = vmatpush3.bf16.msra.mxu0 %v11027_v44  ;;  %10739 = vmatprep.mubr.msk.f32.mxu0 %vm11423_vm1, %v11422_v17 }
0x22c9   :  { %11029 = vmatprep.subr.bf16.mxu0 %v11431_v5 }
0x22cb   :  { %10740 = vmatmul.mubr.msk.f32.vlgmr.msra.gmra.mrb[102].mxu0 %vm3173_vm4, %v7982_v41 }
0x22cc   :  { %11031 = vmatpush3.bf16.msra.mxu0 %v11030_v8  ;;  %10751 = vmatprep.mubr.msk.f32.mxu0 %vm11423_vm1, %v11422_v17 }
0x22cd   :  { %10761 = vmatprep.subr.mxu0 %v11422_v17 }
0x22fd   :  { %v7895_v50 = vpop.f32.mrb[96].mxu0 }
0x22fe   :  { %v10698_v27 = vpop.f32.mrb[97].mxu0  ;;  %v7920_v52 = vsel %vm3173_vm4, %v7895_v50, -inf }
0x22ff   :  { %7921 = vmax.xlane.f32.xlu1 %v7920_v52 }
0x234c   :  { %v7916_v10 = vpop.xlane.xlu1 %7915 }
0x234d   :  { %v7928_v61 = vsub.f32 %v7731_v46, %v7916_v10 }
0x234f   :  { %v7941_v51 = vmul.f32 1.442695, %v7928_v61 }
0x2350   :  { %v7913_v60 = vpop.xlane.xlu1 %7912 }
0x2351   :  { %11329 = vpow2.f32 %v7941_v51  ;;  %v7927_v8 = vsub.f32 %v12474_v20, %v7913_v60 }
0x2353   :  { %v7939_v58 = vmul.f32 1.442695, %v7927_v8 }
0x2354   :  { %v7919_v48 = vpop.xlane.xlu1 %7918 }
0x2355   :  { %11331 = vpow2.f32 %v7939_v58  ;;  %v7929_v43 = vsub.f32 %v7813_v6, %v7919_v48 }
0x2357   :  { %v7943_v34 = vmul.f32 1.442695, %v7929_v43 }
0x2359   :  { %11333 = vpow2.f32 %v7943_v34 }
0x235b   :  { %v11330_v63 = vpop.eup %11329 }
0x235c   :  { %v7962_v0 = vsel %vm3173_vm4, %v11330_v63, 0.0 }
0x235d   :  { %7963 = vadd.xlane.f32.xlu0 %v7962_v0 }
0x235f   :  { %v11332_v62 = vpop.eup %11331 }
0x2360   :  { %v7959_v1 = vsel %vm3173_vm4, %v11332_v62, 0.0 }
0x2361   :  { %7960 = vadd.xlane.f32.xlu1 %v7959_v1 }
0x2363   :  { %v12570_v2 = vpop.eup %11333 }
0x2364   :  { %v7965_v3 = vsel %vm3173_vm4, %v12570_v2, 0.0 }
0x2365   :  { %7966 = vadd.xlane.f32.xlu1 %v7965_v3 }
0x2373   :  { %11187 = vrot.lane.b32.xlu0 %v12468_v11, %s11424_s27 }
0x2377   :  { %11192 = vrot.lane.b32.xlu0 %v12468_v11, %s11429_s10 }
0x238c   :  { %v7922_v20 = vpop.xlane.xlu1 %7921 }
0x238d   :  { %v7930_v53 = vsub.f32 %v7895_v50, %v7922_v20 }
0x238f   :  { %v7945_v4 = vmul.f32 1.442695, %v7930_v53 }
0x2391   :  { %11335 = vpow2.f32 %v7945_v4  ;;  %v8283_v12 = vpop.f32.mrb[98].mxu1 }
0x2392   :  { %v10722_v13 = vpop.f32.mrb[99].mxu1 }
0x2396   :  { %v8210_v14 = vpop.f32.mrb[98].mxu0 }
0x2397   :  { %v8284_v55 = vadd.f32 %v8283_v12, %v8210_v14  ;;  %v10717_v15 = vpop.f32.mrb[99].mxu0 }
0x239a   :  { %v8362_v54 = vpop.f32.mrb[100].mxu0 }
0x239b   :  { %v12580_v49 = vpop.eup %11335  ;;  %v10729_v22 = vpop.f32.mrb[101].mxu0  ;;  %10733 = vmatmul.mubr.msk.f32.vlgmr.msra.gmra.mrb[100].mxu1 %vm253_vm2, %v8362_v54 }
0x239c   :  { %v7968_v25 = vsel %vm3173_vm4, %v12580_v49, 0.0  ;;  %10743 = vmatpush3.msra.mxu1 %v12578_v16  ;;  %10744 = vmatprep.mubr.msk.f32.mxu1 %vm11423_vm1, %v11422_v17 }
0x239d   :  { %7969 = vadd.xlane.f32.xlu1 %v7968_v25  ;;  %11032 = vmatprep.subr.bf16.mxu1 %v11431_v5  ;;  %v9753_v25 = vld [vmem:[%s12732_s6 + $0x1a] ss:$0 sm:$0xff] }
0x239e   :  { %v8515_v6 = vpop.f32.mrb[102].mxu0 }
0x239f   :  { %v10741_v28 = vpop.f32.mrb[103].mxu0  ;;  %10745 = vmatmul.mubr.msk.f32.vlgmr.msra.gmra.mrb[102].mxu1 %vm253_vm2, %v8515_v6 }
0x23a0   :  { %10758 = vmatprep.mubr.msk.f32.mxu1 %vm11423_vm1, %v11422_v17  ;;  %v9754_v28 = vld [vmem:[%s12732_s6 + $0x1b] ss:$0 sm:$0xff] }
0x23ae   :  { %11197 = vrot.lane.b32.xlu1 %v12468_v11, %s11430_s11 }
0x23ea   :  { %v7964_v23 = vpop.xlane.xlu0 %7963 }
0x23eb   :  { %11337 = vrcp.f32 %v7964_v23 }
0x23ee   :  { %v11188_v46 = vpop.permute.xlu0 %11187  ;;  %v7961_v18 = vpop.xlane.xlu1 %7960 }
0x23ef   :  { %v11190_v29 = vunpack.i.h.bf16 %v11188_v46  ;;  %v11189_v33 = vunpack.i.l.bf16 %v11188_v46  ;;  %11339 = vrcp.f32 %v7961_v18 }
0x23f1   :  { %v11033_v45 = vpack.c.bf16 %v11190_v29, %v11189_v33 }
0x23f2   :  { %v7967_v42 = vpop.xlane.xlu1 %7966  ;;  %v11193_v47 = vpop.permute.xlu0 %11192 }
0x23f3   :  { %11034 = vmatpush3.bf16.msra.mxu1 %v11033_v45  ;;  %11341 = vrcp.f32 %v7967_v42  ;;  %v11195_v41 = vunpack.i.h.bf16 %v11193_v47  ;;  %v11194_v50 = vunpack.i.l.bf16 %v11193_v47  ;;  %v9759_v42 = vld [vmem:[%s12731_s5 + $0x40] sm:$0xff]  ;;  %v9761_v47 = vld [vmem:[%s12731_s5 + $0x50] sm:$0xff] }
0x23f4   :  { %10766 = vmatprep.subr.mxu1 %v11422_v17 }
0x23f5   :  { %v11338_v24 = vpop.eup %11337  ;;  %v11036_v10 = vpack.c.bf16 %v11195_v41, %v11194_v50  ;;  %v9762_v50 = vld [vmem:[%s12731_s5 + $0x58] sm:$0xff] }
0x23f6   :  { %v7984_v32 = vmul.f32 %v11338_v24, %v11330_v63 }
0x23f8   :  { %10759 = vmatmul.mubr.msk.f32.vlgmr.msra.gmra.mrb[104].mxu1 %vm3173_vm4, %v7984_v32 }
0x23f9   :  { %v11340_v30 = vpop.eup %11339  ;;  %10767 = vmatpush3.msra.mxu1 %v12531_v19  ;;  %10768 = vmatprep.mubr.msk.f32.mxu1 %vm11423_vm1, %v11422_v17  ;;  %v12608_v19 = vld [vmem:[%s12732_s6 + $0x15] ss:$0 sm:$0xff] }
0x23fa   :  { %v7983_v11 = vmul.f32 %v11340_v30, %v11332_v62  ;;  %10778 = vmatprep.subr.mxu1 %v11422_v17 }
0x23fc   :  { %10752 = vmatmul.mubr.msk.f32.vlgmr.msra.gmra.mrb[104].mxu0 %vm3173_vm4, %v7983_v11  ;;  %v4765_v11 = vsel %vm71_vm0, %v12104_v21, 0.0 }
0x23fd   :  { %10762 = vmatpush3.msra.mxu0 %v12535_v57  ;;  %10763 = vmatprep.mubr.msk.f32.mxu0 %vm11423_vm1, %v11422_v17  ;;  %v11342_v52 = vpop.eup %11341 }
0x23fe   :  { %11035 = vmatprep.subr.bf16.mxu0 %v11431_v5 }
0x242a   :  { %v7970_v44 = vpop.xlane.xlu1 %7969 }
0x242b   :  { %11343 = vrcp.f32 %v7970_v44  ;;  %v9760_v44 = vld [vmem:[%s12731_s5 + $0x48] sm:$0xff] }
0x242c   :  { %v11049_v41 = vpack.c.bf16 %v9760_v44, %v9759_v42 }
0x242e   :  { %v11198_v27 = vpop.permute.xlu1 %11197 }
0x242f   :  { %v11200_v61 = vunpack.i.h.bf16 %v11198_v27  ;;  %v11199_v51 = vunpack.i.l.bf16 %v11198_v27  ;;  %v11053_v27 = vpack.c.bf16 %v9762_v50, %v9761_v47 }
0x2431   :  { %v11039_v48 = vpack.c.bf16 %v11200_v61, %v11199_v51 }
0x2435   :  { %v11344_v58 = vpop.eup %11343 }
0x2436   :  { %v7986_v63 = vmul.f32 %v11344_v58, %v12580_v49 }
0x246e   :  { %v8435_v9 = vpop.f32.mrb[100].mxu1 }
0x246f   :  { %v8439_v35 = vadd.f32 %v8435_v9, %v8284_v55  ;;  %v10734_v36 = vpop.f32.mrb[101].mxu1 }
0x2472   :  { %v8588_v37 = vpop.f32.mrb[102].mxu1 }
0x2473   :  { %v8592_v38 = vadd.f32 %v8588_v37, %v8439_v35  ;;  %v10746_v39 = vpop.f32.mrb[103].mxu1 }
0x2474   :  { %v9253_v39 = vld [vmem:[#allocation2 + $0x138] sm:$0xff] }
0x2475   :  { %v9205_v40 = vadd.f32 %v12608_v19, %v8592_v38 }
0x2477   :  { %v9207_v57 = vadd.f32 %v9205_v40, %v12346_v31  ;;  %v7985_v31 = vmul.f32 %v11342_v52, %v12570_v2  ;;  %v9254_v40 = vld [vmem:[#allocation2 + $0x178] sm:$0xff]  ;;  %v9763_v52 = vld [vmem:[%s12731_s5 + $0x60] sm:$0xff] }
0x2479   :  { %v9211_v26 = vsel %vm71_vm0, %v9207_v57, 0.0 }
0x247a   :  { %9212 = vadd.xlane.f32.xlu0 %v9211_v26 }
0x24cb   :  { %v8743_v60 = vpop.f32.mrb[104].mxu1 }
0x24cc   :  { %v10760_v8 = vpop.f32.mrb[105].mxu1  ;;  %10764 = vmatmul.mubr.msk.f32.vlgmr.msra.gmra.mrb[106].mxu0 %vm253_vm2, %v8743_v60 }
0x24cd   :  { %11037 = vmatpush3.bf16.msra.mxu0 %v11036_v10  ;;  %10775 = vmatprep.mubr.msk.f32.mxu0 %vm11423_vm1, %v11422_v17  ;;  %v9764_v10 = vld [vmem:[%s12731_s5 + $0x68] sm:$0xff] }
0x24ce   :  { %11038 = vmatprep.subr.bf16.mxu0 %v11431_v5  ;;  %v11057_v61 = vpack.c.bf16 %v9764_v10, %v9763_v52 }
0x24cf   :  { %v8662_v43 = vpop.f32.mrb[104].mxu0 }
0x24d0   :  { %v10753_v34 = vpop.f32.mrb[105].mxu0  ;;  %10769 = vmatmul.mubr.msk.f32.vlgmr.msra.gmra.mrb[106].mxu1 %vm253_vm2, %v8662_v43  ;;  %10776 = vmatmul.mubr.msk.f32.vlgmr.msra.gmra.mrb[108].mxu0 %vm3173_vm4, %v7985_v31 }
0x24d1   :  { %11040 = vmatpush3.bf16.msra.mxu0 %v11039_v48  ;;  %10787 = vmatprep.mubr.msk.f32.mxu0 %vm11423_vm1, %v11422_v17  ;;  %v9765_v34 = vld [vmem:[%s12731_s5 + $0x70] sm:$0xff] }
0x24d2   :  { %10779 = vmatpush3.msra.mxu1 %v12563_v56  ;;  %10780 = vmatprep.mubr.msk.f32.mxu1 %vm11423_vm1, %v11422_v17 }
0x24d3   :  { %10790 = vmatprep.subr.mxu1 %v11422_v17 }
0x24d4   :  { %10788 = vmatmul.mubr.msk.f32.vlgmr.msra.gmra.mrb[110].mxu0 %vm3173_vm4, %v7986_v63  ;;  %v9766_v63 = vld [vmem:[%s12731_s5 + $0x78] sm:$0xff] }
0x2507   :  { %v9213_v5 = vpop.xlane.xlu0 %9212 }
0x2508   :  { %v9217_v0 = vmul.f32 0.03125, %v9213_v5  ;;  %v11061_v5 = vpack.c.bf16 %v9766_v63, %v9765_v34 }
0x250a   :  { %v9219_v62 = vsub.f32 %v9207_v57, %v9217_v0  ;;  %v11041_v57 = vpack.c.bf16 %v9254_v40, %v9253_v39  ;;  %v9756_v0 = vld [vmem:[%s12732_s6 + $0x16] ss:$0 sm:$0xff]  ;;  %v9773_v39 = vld [vmem:[%s12732_s6 + $0x1c] ss:$0 sm:$0xff] }
0x250c   :  { %v9221_v1 = vmul.f32 %v9219_v62, %v9219_v62  ;;  %11042 = vmatprep.subr.bf16.mxu0 %v11041_v57 }
0x250d   :  { %11044 = vmatpush3.bf16.msra.mxu0 %v11041_v57  ;;  %v9774_v57 = vld [vmem:[%s12732_s6 + $0x1d] ss:$0 sm:$0xff] }
0x250e   :  { %v9223_v2 = vsel %vm71_vm0, %v9221_v1, 0.0 }
0x250f   :  { %9224 = vadd.xlane.f32.xlu0 %v9223_v2 }
0x259c   :  { %v9225_v3 = vpop.xlane.xlu0 %9224 }
0x259d   :  { %v9229_v20 = vmul.f32 0.03125, %v9225_v3 }
0x259f   :  { %v9231_v53 = vadd.f32 1e-05, %v9229_v20  ;;  %v8816_v4 = vpop.f32.mrb[106].mxu0 }
0x25a0   :  { %v10765_v12 = vpop.f32.mrb[107].mxu0 }
0x25a1   :  { %11345 = vrsqrt.f32 %v9231_v53 }
0x25a3   :  { %v8889_v56 = vpop.f32.mrb[106].mxu1  ;;  %v8968_v13 = vpop.f32.mrb[108].mxu0 }
0x25a4   :  { %v8890_v14 = vadd.f32 %v8889_v56, %v8816_v4  ;;  %v10770_v55 = vpop.f32.mrb[107].mxu1  ;;  %v10777_v15 = vpop.f32.mrb[109].mxu0  ;;  %10781 = vmatmul.mubr.msk.f32.vlgmr.msra.gmra.mrb[108].mxu1 %vm253_vm2, %v8968_v13  ;;  %v9768_v4 = vld [vmem:[%s12732_s6 + $0x17] ss:$0 sm:$0xff] }
0x25a5   :  { %10791 = vmatpush3.msra.mxu1 %v12578_v16  ;;  %10792 = vmatprep.mubr.msk.f32.mxu1 %vm11423_vm1, %v11422_v17 }
0x25a6   :  { %11050 = vmatprep.subr.bf16.mxu1 %v11049_v41 }
0x25a7   :  { %v9121_v54 = vpop.f32.mrb[110].mxu0 }
0x25a8   :  { %v10789_v49 = vpop.f32.mrb[111].mxu0  ;;  %10793 = vmatmul.mubr.msk.f32.vlgmr.msra.gmra.mrb[110].mxu1 %vm253_vm2, %v9121_v54 }
0x25a9   :  { %11052 = vmatpush3.bf16.msra.mxu1 %v11049_v41 }
0x25aa   :  { %11054 = vmatprep.subr.bf16.mxu1 %v11053_v27 }
0x25ab   :  { %v11346_v22 = vpop.eup %11345 }
0x25ac   :  { %v9235_v6 = vmul.f32 %v11346_v22, %v9219_v62 }
0x25ad   :  { %11056 = vmatpush3.bf16.msra.mxu1 %v11053_v27 }
0x25ae   :  { %v9243_v23 = vmul.f32 %v9753_v25, %v9235_v6  ;;  %11058 = vmatprep.subr.bf16.mxu1 %v11057_v61 }
0x25b0   :  { %v12640_v46 = vadd.f32 %v9754_v28, %v9243_v23 }
0x25b1   :  { %11060 = vmatpush3.bf16.msra.mxu1 %v11057_v61 }
0x25b2   :  { %10803 = vmatprep.mubr.msk.f32.mxu0 %vm71_vm0, %v12640_v46  ;;  %11062 = vmatprep.subr.bf16.mxu1 %v11061_v5 }
0x25b5   :  { %11064 = vmatpush3.bf16.msra.mxu1 %v11061_v5 }
0x2677   :  { %v9041_v17 = vpop.f32.mrb[108].mxu1 }
0x2678   :  { %v9045_v16 = vadd.f32 %v9041_v17, %v8890_v14  ;;  %v10782_v18 = vpop.f32.mrb[109].mxu1 }
0x267b   :  { %v9194_v29 = vpop.f32.mrb[110].mxu1 }
0x267c   :  { %v9198_v33 = vadd.f32 %v9194_v29, %v9045_v16  ;;  %v10794_v45 = vpop.f32.mrb[111].mxu1 }
0x267e   :  { %v9206_v24 = vadd.f32 %v12608_v19, %v9198_v33  ;;  %v9256_v19 = vld [vmem:[#allocation2 + $0x1f8] sm:$0xff]  ;;  %v4768_v33 = vsel %vm71_vm0, %v12113_v7, 0.0 }
0x2680   :  { %v9208_v32 = vadd.f32 %v9206_v24, %v12385_v59  ;;  %v9255_v59 = vld [vmem:[#allocation2 + $0x1b8] sm:$0xff] }
0x2681   :  { %v11045_v26 = vpack.c.bf16 %v9256_v19, %v9255_v59 }
0x2682   :  { %v9214_v30 = vsel %vm71_vm0, %v9208_v32, 0.0 }
0x2683   :  { %9215 = vadd.xlane.f32.xlu1 %v9214_v30  ;;  %11046 = vmatprep.subr.bf16.mxu0 %v11045_v26 }
0x2684   :  { %11048 = vmatpush3.bf16.msra.mxu0 %v11045_v26 }
0x2687   :  { %4766 = vadd.xlane.f32.xlu1 %v4765_v11 }
0x2710   :  { %v9216_v9 = vpop.xlane.xlu1 %9215 }
0x2711   :  { %v9218_v35 = vmul.f32 0.03125, %v9216_v9 }
0x2713   :  { %v9220_v36 = vsub.f32 %v9208_v32, %v9218_v35 }
0x2714   :  { %v4767_v35 = vpop.xlane.xlu1 %4766 }
0x2715   :  { %v9222_v37 = vmul.f32 %v9220_v36, %v9220_v36 }
0x2717   :  { %v9226_v38 = vsel %vm71_vm0, %v9222_v37, 0.0 }
0x2718   :  { %9227 = vadd.xlane.f32.xlu0 %v9226_v38 }
0x27a5   :  { %v9228_v51 = vpop.xlane.xlu0 %9227 }
0x27a6   :  { %v9230_v60 = vmul.f32 0.03125, %v9228_v51 }
0x27a8   :  { %v9232_v8 = vadd.f32 1e-05, %v9230_v60 }
0x27aa   :  { %11347 = vrsqrt.f32 %v9232_v8 }
0x27b4   :  { %v11348_v31 = vpop.eup %11347 }
0x27b5   :  { %v9236_v58 = vmul.f32 %v11348_v31, %v9220_v36  ;;  %v4771_v36 = vmul.f32 0.03125, %v4767_v35 }
0x27b7   :  { %v9244_v48 = vmul.f32 %v9753_v25, %v9236_v58  ;;  %v4773_v59 = vsub.f32 %v12104_v21, %v4771_v36 }
0x27b9   :  { %v9252_v43 = vadd.f32 %v9754_v28, %v9244_v48  ;;  %v4775_v27 = vmul.f32 %v4773_v59, %v4773_v59 }
0x27bb   :  { %10804 = vmatmul.mubr.msk.f32.vlgmr.msra.gmra.mrb[112].mxu0 %vm71_vm0, %v9252_v43  ;;  %v4777_v61 = vsel %vm71_vm0, %v4775_v27, 0.0 }
0x288e   :  { %v10805_v62 = vpop.f32.mrb[112].mxu0 }
0x288f   :  { %v9342_v1 = vadd.f32 %v10805_v62, %v9756_v0  ;;  %v9336_v2 = vpop.f32.mrb[113].mxu0 }
0x2890   :  { %v9337_v3 = vadd.f32 %v9756_v0, %v9336_v2 }
0x2891   :  { %v9346_v53 = vmax.f32 %v9342_v1, 0.0 }
0x2892   :  { %v9345_v20 = vmax.f32 %v9337_v3, 0.0 }
0x2894   :  { %10822 = vmatprep.mubr.msk.f32.mxu1 %vm4637_vm5, %v9345_v20 }
0x2895   :  { %10823 = vmatmul.mubr.msk.f32.vlgmr.msra.gmra.mrb[112].mxu1 %vm4637_vm5, %v9346_v53 }
0x2968   :  { %v10824_v12 = vpop.f32.mrb[112].mxu1 }
0x2969   :  { %v9435_v56 = vpop.f32.mrb[113].mxu1  ;;  %v9441_v13 = vadd.f32 %v10824_v12, %v9768_v4  ;;  %v9645_v12 = vld [vmem:[%s12733_s7] ss:$0 sm:$0xff] }
0x296a   :  { %v9436_v14 = vadd.f32 %v9768_v4, %v9435_v56 }
0x296b   :  { %v9445_v15 = vadd.f32 %v9441_v13, %v9252_v43  ;;  %v9646_v13 = vld [vmem:[%s12733_s7 + $0x1] ss:$0 sm:$0xff]  ;;  %s11432_s7 = smov [#allocation5]  }
0x296c   :  { %v9444_v55 = vadd.f32 %v9436_v14, %v12640_v46  ;;  %s9528_s13 = sshll.u32 %s11432_s7, 4  ;;  %s9529_s13 = int_to_ptr.vmem [resolvable:$true] %s9528_s13 }
0x296d   :  { %v9451_v49 = vsel %vm71_vm0, %v9445_v15, 0.0  ;;  %s11393_s14 = scalar_lea.vmem %s9529_s13, 512  ;;  %p11398_p9 = scmp.lt.s32.totalorder %s9529_s13, %s9529_s13 }
0x296e   :  { %v9448_v54 = vsel %vm71_vm0, %v9444_v55, 0.0  ;;  %p11394_p8 = scmp.ne.s32.totalorder %s9529_s13, %s11393_s14  ;;  %p11399_p10 = scmp.lt.s32.totalorder %s11393_s14, %s11393_s14 }
0x296f   :  { %9449 = vadd.xlane.f32.xlu0 %v9448_v54 }
0x2970   :  { %p11400_p11 = por %p11399_p10, %p11398_p9 }
0x2972   :  { %p11401_p12 = pnand %p11400_p11, %p11394_p8 }
0x2973   :  { %9452 = vadd.xlane.f32.xlu0 %v9451_v49 }
0x29fc   :  { %v9450_v22 = vpop.xlane.xlu0 %9449 }
0x29fd   :  { %v9454_v25 = vmul.f32 0.03125, %v9450_v22 }
0x29ff   :  { %v9456_v6 = vsub.f32 %v9444_v55, %v9454_v25 }
0x2a00   :  { %v9453_v28 = vpop.xlane.xlu0 %9452 }
0x2a01   :  { %v9455_v23 = vmul.f32 0.03125, %v9453_v28  ;;  %v9458_v17 = vmul.f32 %v9456_v6, %v9456_v6 }
0x2a03   :  { %v9457_v16 = vsub.f32 %v9445_v15, %v9455_v23  ;;  %v9460_v18 = vsel %vm71_vm0, %v9458_v17, 0.0 }
0x2a04   :  { %9461 = vadd.xlane.f32.xlu0 %v9460_v18 }
0x2a05   :  { %v9459_v29 = vmul.f32 %v9457_v16, %v9457_v16 }
0x2a07   :  { %v9463_v46 = vsel %vm71_vm0, %v9459_v29, 0.0 }
0x2a08   :  { %9464 = vadd.xlane.f32.xlu0 %v9463_v46 }
0x2a0c   :  { %4769 = vadd.xlane.f32.xlu0 %v4768_v33 }
0x2a91   :  { %v9462_v45 = vpop.xlane.xlu0 %9461 }
0x2a92   :  { %v9466_v24 = vmul.f32 0.03125, %v9462_v45 }
0x2a94   :  { %v9468_v32 = vadd.f32 1e-05, %v9466_v24 }
0x2a95   :  { %v9465_v30 = vpop.xlane.xlu0 %9464 }
0x2a96   :  { %11349 = vrsqrt.f32 %v9468_v32  ;;  %v9467_v11 = vmul.f32 0.03125, %v9465_v30 }
0x2a98   :  { %v9469_v9 = vadd.f32 1e-05, %v9467_v11 }
0x2a99   :  { %v4770_v38 = vpop.xlane.xlu0 %4769 }
0x2a9a   :  { %11351 = vrsqrt.f32 %v9469_v9  ;;  %v4772_v19 = vmul.f32 0.03125, %v4770_v38 }
0x2a9c   :  { %v4774_v41 = vsub.f32 %v12113_v7, %v4772_v19 }
0x2a9e   :  { %v4776_v60 = vmul.f32 %v4774_v41, %v4774_v41 }
0x2aa0   :  { %v11350_v37 = vpop.eup %11349  ;;  %v4780_v21 = vsel %vm71_vm0, %v4776_v60, 0.0 }
0x2aa1   :  { %v9472_v40 = vmul.f32 %v11350_v37, %v9456_v6 }
0x2aa3   :  { %v9480_v26 = vmul.f32 %v9773_v39, %v9472_v40 }
0x2aa4   :  { %v11352_v42 = vpop.eup %11351 }
0x2aa5   :  { %v9488_v44 = vadd.f32 %v9774_v57, %v9480_v26  ;;  %v9473_v47 = vmul.f32 %v11352_v42, %v9457_v16 }
0x2aa7   :  { %v9490_v50 = vsel %vm71_vm0, %v9488_v44, 0.0  ;;  %v9481_v52 = vmul.f32 %v9773_v39, %v9473_v47 }
0x2aa8   :  { %9491 = vadd.xlane.f32.xlu1 %v9490_v50 }
0x2aa9   :  { %v9489_v10 = vadd.f32 %v9774_v57, %v9481_v52 }
0x2aab   :  { %v9493_v51 = vsel %vm71_vm0, %v9489_v10, 0.0 }
0x2aac   :  { %4778 = vadd.xlane.f32.xlu1 %v4777_v61  ;;  %9494 = vadd.xlane.f32.xlu0 %v9493_v51 }
0x2ab0   :  { %4781 = vadd.xlane.f32.xlu0 %v4780_v21 }
0x2b35   :  { %v9492_v8 = vpop.xlane.xlu1 %9491 }
0x2b36   :  { %v9496_v31 = vmul.f32 0.03125, %v9492_v8 }
0x2b38   :  { %v9498_v58 = vsub.f32 %v9488_v44, %v9496_v31 }
0x2b39   :  { %v4779_v7 = vpop.xlane.xlu1 %4778  ;;  %v9495_v48 = vpop.xlane.xlu0 %9494 }
0x2b3a   :  { %v4783_v43 = vmul.f32 0.03125, %v4779_v7  ;;  %v9497_v34 = vmul.f32 0.03125, %v9495_v48  ;;  %v9500_v63 = vmul.f32 %v9498_v58, %v9498_v58 }
0x2b3c   :  { %v4785_v5 = vadd.f32 1e-05, %v4783_v43  ;;  %v9499_v0 = vsub.f32 %v9489_v10, %v9497_v34  ;;  %v9502_v62 = vsel %vm71_vm0, %v9500_v63, 0.0 }
0x2b3d   :  { %9503 = vadd.xlane.f32.xlu1 %v9502_v62  ;;  %v4782_v1 = vpop.xlane.xlu0 %4781 }
0x2b3e   :  { %11353 = vrsqrt.f32 %v4785_v5  ;;  %v4784_v2 = vmul.f32 0.03125, %v4782_v1  ;;  %v9501_v3 = vmul.f32 %v9499_v0, %v9499_v0 }
0x2b40   :  { %v4786_v20 = vadd.f32 1e-05, %v4784_v2  ;;  %v9505_v53 = vsel %vm71_vm0, %v9501_v3, 0.0 }
0x2b41   :  { %9506 = vadd.xlane.f32.xlu0 %v9505_v53 }
0x2b42   :  { %11355 = vrsqrt.f32 %v4786_v20 }
0x2b48   :  { %v11354_v4 = vpop.eup %11353 }
0x2b49   :  { %v4789_v56 = vmul.f32 %v11354_v4, %v4773_v59 }
0x2b4b   :  { %v4797_v14 = vmul.f32 %v9645_v12, %v4789_v56 }
0x2b4c   :  { %v11356_v55 = vpop.eup %11355 }
0x2b4d   :  { %v4805_v15 = vadd.f32 %v9646_v13, %v4797_v14  ;;  %v4790_v54 = vmul.f32 %v11356_v55, %v4774_v41 }
0x2b4f   :  { %4807 = vst.msk [vmem:[#allocation5] sm:$0xff] %vm71_vm0, %v4805_v15  ;;  %v4798_v49 = vmul.f32 %v9645_v12, %v4790_v54 }
0x2b51   :  { %v4806_v22 = vadd.f32 %v9646_v13, %v4798_v49 }
0x2b53   :  { %4808 = vst.msk [vmem:[#allocation5 + $0x8] sm:$0xff] %vm71_vm0, %v4806_v22 }
0x2bca   :  { %v9504_v25 = vpop.xlane.xlu1 %9503 }
0x2bcb   :  { %v9508_v6 = vmul.f32 0.03125, %v9504_v25 }
0x2bcd   :  { %v9510_v28 = vadd.f32 1e-05, %v9508_v6 }
0x2bce   :  { %v9507_v23 = vpop.xlane.xlu0 %9506 }
0x2bcf   :  { %11357 = vrsqrt.f32 %v9510_v28  ;;  %v9509_v17 = vmul.f32 0.03125, %v9507_v23 }
0x2bd1   :  { %v9511_v16 = vadd.f32 1e-05, %v9509_v17 }
0x2bd3   :  { %11359 = vrsqrt.f32 %v9511_v16 }
0x2bd9   :  { %v11358_v18 = vpop.eup %11357 }
0x2bda   :  { %v9514_v29 = vmul.f32 %v11358_v18, %v9498_v58 }
0x2bdc   :  { %v9516_v46 = vmul.f32 %v9645_v12, %v9514_v29 }
0x2bdd   :  { %v11360_v33 = vpop.eup %11359 }
0x2bde   :  { %v9518_v45 = vadd.f32 %v9646_v13, %v9516_v46  ;;  %v9515_v24 = vmul.f32 %v11360_v33, %v9499_v0 }
0x2be0   :  { %9521 = vst.msk [vmem:[#allocation5 + $0x10] sm:$0xff] %vm71_vm0, %v9518_v45  ;;  %v9517_v32 = vmul.f32 %v9645_v12, %v9515_v24 }
0x2be2   :  { %v9519_v30 = vadd.f32 %v9646_v13, %v9517_v32 }
0x2be4   :  { %9522 = vst.msk [vmem:[#allocation5 + $0x18] sm:$0xff] %vm71_vm0, %v9519_v30 }
0x2be5   :  { %11404 = shalt.err (!%p11401_p12)
}
0x2be6   :  { %s11405_s17 = scalar_lea.hbm %s12734_s8, 512 }
0x2be7   :  { %p11406_p13 = scmp.ne.s32.totalorder %s12734_s8, %s11405_s17  ;;  %p11409_p0 = scmp.lt.u32.totalorder %s11405_s17, %s12734_s8 }
0x2be9   :  { %p11411_p1 = pnand %p11409_p0, %p11406_p13 }
0x2beb   :  { %11414 = shalt.err (!%p11411_p1)
}
0x2bec   :  { %s11433_s21 = smov 128   ;;  %s11434_s22 = smov 8  }
0x2bed   :  { %9534 = dma.vmem_to_hbm [thread:$0]  %s9529_s13, 512, %s12734_s8, [#allocation4], %s11433_s21, %s11433_s21, %s11434_s22  }
0x2bee   :  { %11417 = dma.done.wait [#allocation4], 512  }
0x2bef   :  { %11418 = vsyncadd [#allocation4], 4294966784 }
0x2bf0   :  { %9538 = vsyncpa [#allocation3], 1 }
0x2bf1   :  { %9539 = vsyncpa [#allocation4], 1 }

</bundles_post_ra>
